<compile_context>
chip_gen: v6e
topology: v6e:2x2x1
jax: 0.10.0
libtpu: 0.0.40
codegen_flags: <defaults>
</compile_context>

<pallas_src>
import jax
import jax.numpy as jnp
from jax.experimental import pallas as pl
from jax.experimental.pallas import tpu as pltpu


# ----------------------------- helpers ---------------------------------------
def _round_up(x, m):
    return ((x + m - 1) // m) * m


def _sublane(itemsize):
    return {4: 8, 2: 16, 1: 32}.get(itemsize, 8)


def _vmem_budget():
    """(double-buffered input budget, vmem_limit_bytes), gated by generation."""
    try:
        cap = int(pltpu.get_tpu_info().vmem_capacity_bytes)
    except Exception:
        cap = 64 << 20   # conservative: assume v7x-class 64 MiB per TensorCore
    input_budget = min(24 << 20, cap // 3)      # ~21 MiB on v7x, 24 MiB on v5e/v6e
    vmem_limit = min(int(cap * 3 // 4), 96 << 20)
    return input_budget, vmem_limit


def _pick_batch_tile(b, w, k, d, emb_itemsize, budget_bytes):
    """Largest batch tile (multiple of 8) whose padded, double-buffered input
    blocks (+ single-buffered scratch) fit the VMEM budget."""
    lane = 128
    sub = _sublane(emb_itemsize)
    # Mosaic pads the trailing two dims of each VMEM block to (sublane, 128).
    ctx_row = _round_up(w, sub) * _round_up(d, lane) * emb_itemsize        # (TB,W,D)
    neg_row = w * _round_up(k, sub) * _round_up(d, lane) * emb_itemsize    # (TB,W,K,D)
    ctr_row = _round_up(d, lane) * 4                                       # (TB,D) f32
    ids_row = _round_up(w, lane) * 4                                       # (TB,W) i32
    dbl = 2 * (ctx_row + neg_row + ctr_row + ids_row)                      # double buffered
    acc_row = _round_up(w, lane) * 4 + _round_up(w, 8) * _round_up(k, lane) * 4
    per_row = dbl + acc_row

    max_tb = _round_up(b, 8)
    tb = 8
    for cand in range(8, max_tb + 8, 8):
        if cand * per_row <= budget_bytes:
            tb = cand
        if cand >= max_tb:
            break
    return min(tb, max_tb)


# ----------------------------- Pallas kernel ---------------------------------
def _fused_skipgram_kernel(ctr_ref, ctx_ref, neg_ref, ids_ref, out_ref,
                           acc_pos_ref, acc_neg_ref):
    """Fused skip-gram negative-sampling loss for one (branch, batch-tile).

    ctr_ref : (TB, D)        MWE / centre vector per batch row (f32)
    ctx_ref : (TB, W, D)     positive context embeddings
    neg_ref : (TB, W, K, D)  negative-sample embeddings
    ids_ref : (TB, W) i32    context ids (0 == pad) -> mask derived in-kernel
    out_ref : (1, 8, 128)    per-branch loss sum (broadcast scalar, written once)
    acc_*   : VMEM scratch accumulators, persistent across the batch-tile axis
    """
    t = pl.program_id(1)

    @pl.when(t == 0)
    def _init():
        acc_pos_ref[...] = jnp.zeros_like(acc_pos_ref)
        acc_neg_ref[...] = jnp.zeros_like(acc_neg_ref)

    ctr = ctr_ref[...].astype(jnp.float32)               # (TB, D)
    ctx = ctx_ref[...].astype(jnp.float32)               # (TB, W, D)
    neg = neg_ref[...].astype(jnp.float32)               # (TB, W, K, D)
    mask = (ids_ref[...] != 0).astype(jnp.float32)       # (TB, W), in-kernel

    # Positive scores and (sign folded in-kernel) negative scores.
    pos_score = jnp.sum(ctx * ctr[:, None, :], axis=-1)            # (TB, W)
    neg_score = -jnp.sum(neg * ctr[:, None, None, :], axis=-1)     # (TB, W, K)

    def _nls(x):  # -log(sigmoid(x)) = softplus(-x), numerically stable
        return jnp.log1p(jnp.exp(-jnp.abs(x))) - jnp.minimum(x, 0.0)

    # Pure VPU accumulation; no per-step reduction to a scalar, no (1,1) store.
    acc_pos_ref[...] += _nls(pos_score) * mask
    acc_neg_ref[...] += _nls(neg_score) * mask[:, :, None]

    @pl.when(t == pl.num_programs(1) - 1)
    def _finalize():
        total = jnp.sum(acc_pos_ref[...]) + jnp.sum(acc_neg_ref[...])
        # Lane-dense (8,128) store; the host side reads element [0, 0].
        out_ref[...] = jnp.full(out_ref.shape, total, dtype=jnp.float32)


# ------------------------------ JAX glue --------------------------------------
def _mwe_f(token_embeddings, lengths):
    """Stand-in for the injected mwe_f (usually an LSTM): masked mean pooling."""
    # TODO(synk): the real mwe_f is an external RNN; any seq->vector encoder can
    # be substituted here without touching the Pallas kernel.
    emb = token_embeddings.astype(jnp.float32)
    _, l, _ = emb.shape
    valid = (jnp.arange(l)[None, :] < lengths[:, None]).astype(jnp.float32)
    pooled = jnp.sum(emb * valid[:, :, None], axis=1)
    return pooled / jnp.maximum(lengths[:, None].astype(jnp.float32), 1.0)


@jax.jit
def mwe_sentence_skipgram_forward(params, left_sentence, right_sentence,
                                  right_context, left_context, lens,
                                  negative_examples_left, negative_examples_right):
    center_table = params["center_embeddings"]
    context_table = params["context_embeddings"]
    b, w = right_context.shape
    k = negative_examples_right.shape[-1]
    d = context_table.shape[1]

    mwe_left = _mwe_f(jnp.take(center_table, left_sentence, axis=0), lens["lpv_len"])
    mwe_right = _mwe_f(jnp.take(center_table, right_sentence, axis=0), lens["rpv_len"])

    emb_itemsize = jnp.dtype(context_table.dtype).itemsize
    input_budget, vmem_limit = _vmem_budget()
    tb = _pick_batch_tile(b, w, k, d, emb_itemsize, input_budget)
    bp = _round_up(b, tb)            # cdiv grid with a zero-padded tail tile
    n_tiles = bp // tb

    def pad_b(x):
        pad = [(0, bp - b)] + [(0, 0)] * (x.ndim - 1)
        return jnp.pad(x, pad)

    # Stack the two skip-gram branches along the batch axis:
    #   branch 0: (mwe_left,  right_context, negative_examples_right)
    #   branch 1: (mwe_right, left_context,  negative_examples_left)
    ctr = jnp.concatenate([pad_b(mwe_left), pad_b(mwe_right)], axis=0)           # (2*bp, D)
    ids = jnp.concatenate([pad_b(right_context), pad_b(left_context)], axis=0)   # (2*bp, W)
    neg_ids = jnp.concatenate(
        [pad_b(negative_examples_right.reshape(b, w, k)),
         pad_b(negative_examples_left.reshape(b, w, k))], axis=0)                # (2*bp, W, K)

    # Embedding gathers stay in XLA (review fallback).  No concat / negation /
    # width-1 mask tensors are materialised: sign + mask happen in-kernel.
    ctx_emb = jnp.take(context_table, ids, axis=0)        # (2*bp, W, D)
    neg_emb = jnp.take(context_table, neg_ids, axis=0)    # (2*bp, W, K, D)
    # TODO(synk): in-kernel DMA gather (table in HBM, ids scalar-prefetched) for
    # large vocabularies; also a lane-dense (D on sublanes) relayout for D<128.

    branch_out = pl.pallas_call(
        _fused_skipgram_kernel,
        out_shape=jax.ShapeDtypeStruct((2, 8, 128), jnp.float32),
        grid=(2, n_tiles),
        in_specs=[
            pl.BlockSpec((tb, d), lambda br, t: (br * n_tiles + t, 0)),
            pl.BlockSpec((tb, w, d), lambda br, t: (br * n_tiles + t, 0, 0)),
            pl.BlockSpec((tb, w, k, d), lambda br, t: (br * n_tiles + t, 0, 0, 0)),
            pl.BlockSpec((tb, w), lambda br, t: (br * n_tiles + t, 0)),
        ],
        out_specs=pl.BlockSpec((1, 8, 128), lambda br, t: (br, 0, 0)),
        scratch_shapes=[
            pltpu.VMEM((tb, w), jnp.float32),      # positive-term accumulator
            pltpu.VMEM((tb, w, k), jnp.float32),   # negative-term accumulator
        ],
        compiler_params=pltpu.CompilerParams(
            dimension_semantics=("parallel", "arbitrary"),
            vmem_limit_bytes=vmem_limit),
    )(ctr, ctx_emb, neg_emb, ids)

    branch_sums = branch_out[:, 0, 0]                                    # (2,)
    counts = jnp.stack([jnp.sum(right_context != 0), jnp.sum(left_context != 0)])
    counts = jnp.maximum(counts.astype(jnp.float32), 1.0)                # guard
    return jnp.sum(branch_sums / counts)


# ----------------------------- reference (pure JAX) ---------------------------
def _reference(params, left_sentence, right_sentence, right_context, left_context,
               lens, negative_examples_left, negative_examples_right):
    center_table = params["center_embeddings"]
    context_table = params["context_embeddings"]

    def log_sigmoid(x):
        return jnp.minimum(x, 0.0) - jnp.log1p(jnp.exp(-jnp.abs(x)))

    def branch(mwe, ctx_ids, neg_ids):
        b, w = ctx_ids.shape
        k = neg_ids.shape[-1]
        mask = (ctx_ids.reshape(-1) != 0).astype(jnp.float32)
        mwe_rows = jnp.repeat(mwe, w, axis=0)                            # (B*W, D)
        ctx = jnp.take(context_table, ctx_ids.reshape(-1), axis=0).astype(jnp.float32)
        neg = jnp.take(context_table, neg_ids.reshape(b * w, k), axis=0).astype(jnp.float32)
        pos_loss = -log_sigmoid(jnp.sum(ctx * mwe_rows, axis=1))
        neg_loss = jnp.sum(-log_sigmoid(-jnp.einsum("nkd,nd->nk", neg, mwe_rows)), axis=1)
        per_slot = (pos_loss + neg_loss) * mask
        return jnp.sum(per_slot) / jnp.maximum(jnp.sum(mask), 1.0)

    mwe_left = _mwe_f(jnp.take(center_table, left_sentence, axis=0), lens["lpv_len"])
    mwe_right = _mwe_f(jnp.take(center_table, right_sentence, axis=0), lens["rpv_len"])
    return (branch(mwe_left, right_context, negative_examples_right)
            + branch(mwe_right, left_context, negative_examples_left))


# --------------------------------- main ---------------------------------------
if __name__ == "__main__":
    key = jax.random.PRNGKey(0)
    V, D = 50, 32        # vocab size, embedding dim
    B, W = 8, 8          # batch, 2*window context size
    K = 5                # negative samples per context slot
    LS, RS = 6, 6        # max left / right sentence lengths
    N = B * W

    keys = jax.random.split(key, 10)
    emb_dtype = jnp.bfloat16   # bf16 tables halve the dominant HBM stream
    params = {
        "center_embeddings": (jax.random.normal(keys[0], (V, D), jnp.float32) * 0.1
                              ).astype(emb_dtype),
        "context_embeddings": (jax.random.normal(keys[1], (V, D), jnp.float32) * 0.1
                               ).astype(emb_dtype),
    }

    left_sentence = jax.random.randint(keys[2], (B, LS), 1, V, jnp.int32)
    right_sentence = jax.random.randint(keys[3], (B, RS), 1, V, jnp.int32)
    right_context = jax.random.randint(keys[4], (B, W), 1, V, jnp.int32)
    left_context = jax.random.randint(keys[5], (B, W), 1, V, jnp.int32)
    # A couple of pad (id 0) slots to exercise the in-kernel mask path.
    right_context = right_context.at[0, W - 1].set(0)
    left_context = left_context.at[1, 0].set(0)
    negative_examples_right = jax.random.randint(keys[6], (N, K), 1, V, jnp.int32)
    negative_examples_left = jax.random.randint(keys[7], (N, K), 1, V, jnp.int32)
    lens = {
        "lpv_len": jax.random.randint(keys[8], (B,), 1, LS + 1, jnp.int32),
        "rpv_len": jax.random.randint(keys[9], (B,), 1, RS + 1, jnp.int32),
    }

    loss = mwe_sentence_skipgram_forward(
        params, left_sentence, right_sentence, right_context, left_context,
        lens, negative_examples_left, negative_examples_right)
    loss = jax.block_until_ready(loss)

    ref = _reference(
        params, left_sentence, right_sentence, right_context, left_context,
        lens, negative_examples_left, negative_examples_right)
    assert jnp.allclose(loss, ref, rtol=1e-4, atol=1e-4), (loss, ref)

    print("KERNEL_OK")
</pallas_src>

<mosaic_0001>
module attributes {stable_mosaic.version = 11 : i64} {
  func.func @_fused_skipgram_kernel(%arg0: i32, %arg1: i32, %arg2: memref<8x32xf32, #tpu.memory_space<vmem>>, %arg3: memref<8x8x32xbf16, #tpu.memory_space<vmem>>, %arg4: memref<8x8x5x32xbf16, #tpu.memory_space<vmem>>, %arg5: memref<8x8xi32, #tpu.memory_space<vmem>>, %arg6: memref<1x8x128xf32, #tpu.memory_space<vmem>>, %arg7: memref<8x8xf32, #tpu.memory_space<vmem>>, %arg8: memref<8x8x5xf32, #tpu.memory_space<vmem>>) attributes {dimension_semantics = [#tpu.dimension_semantics<parallel>, #tpu.dimension_semantics<arbitrary>], iteration_bounds = array<i64: 2, 1>, scalar_prefetch = 0 : i64, scratch_operands = 2 : i64, tpu.core_type = #tpu.core_type<tc>, window_params = [{transform_indices = @transform_0, window_bounds = array<i64: 8, 32>}, {transform_indices = @transform_1, window_bounds = array<i64: 8, 8, 32>}, {transform_indices = @transform_2, window_bounds = array<i64: 8, 8, 5, 32>}, {transform_indices = @transform_3, window_bounds = array<i64: 8, 8>}, {transform_indices = @transform_4, window_bounds = array<i64: 1, 8, 128>}]} {
    %c0_i32 = arith.constant 0 : i32
    %0 = arith.cmpi eq, %arg1, %c0_i32 : i32
    %1 = arith.extui %0 : i1 to i32
    %c0_i32_0 = arith.constant 0 : i32
    %2 = arith.cmpi ne, %1, %c0_i32_0 : i32
    scf.if %2 {
      %cst_30 = arith.constant 0.000000e+00 : f32
      %52 = vector.broadcast %cst_30 : f32 to vector<8x8xf32>
      %c0_31 = arith.constant 0 : index
      %c0_32 = arith.constant 0 : index
      %53 = vector.load %arg7[%c0_31, %c0_32] : memref<8x8xf32, #tpu.memory_space<vmem>>, vector<8x8xf32>
      tpu.vector_store %arg7[%c0_31, %c0_32], %52 {strides = array<i32>} : memref<8x8xf32, #tpu.memory_space<vmem>>, vector<8x8xf32>,
      %cst_33 = arith.constant 0.000000e+00 : f32
      %54 = vector.broadcast %cst_33 : f32 to vector<8x8x5xf32>
      %c0_34 = arith.constant 0 : index
      %c0_35 = arith.constant 0 : index
      %c0_36 = arith.constant 0 : index
      %55 = vector.load %arg8[%c0_34, %c0_35, %c0_36] : memref<8x8x5xf32, #tpu.memory_space<vmem>>, vector<8x8x5xf32>
      tpu.vector_store %arg8[%c0_34, %c0_35, %c0_36], %54 {strides = array<i32>} : memref<8x8x5xf32, #tpu.memory_space<vmem>>, vector<8x8x5xf32>,
    } else {
    }
    %c0 = arith.constant 0 : index
    %c0_1 = arith.constant 0 : index
    %3 = vector.load %arg2[%c0, %c0_1] : memref<8x32xf32, #tpu.memory_space<vmem>>, vector<8x32xf32>
    %c0_2 = arith.constant 0 : index
    %c0_3 = arith.constant 0 : index
    %c0_4 = arith.constant 0 : index
    %4 = vector.load %arg3[%c0_2, %c0_3, %c0_4] : memref<8x8x32xbf16, #tpu.memory_space<vmem>>, vector<8x8x32xbf16>
    %5 = arith.extf %4 : vector<8x8x32xbf16> to vector<8x8x32xf32>
    %c0_5 = arith.constant 0 : index
    %c0_6 = arith.constant 0 : index
    %c0_7 = arith.constant 0 : index
    %c0_8 = arith.constant 0 : index
    %6 = vector.load %arg4[%c0_5, %c0_6, %c0_7, %c0_8] : memref<8x8x5x32xbf16, #tpu.memory_space<vmem>>, vector<8x8x5x32xbf16>
    %7 = arith.extf %6 : vector<8x8x5x32xbf16> to vector<8x8x5x32xf32>
    %c0_9 = arith.constant 0 : index
    %c0_10 = arith.constant 0 : index
    %8 = vector.load %arg5[%c0_9, %c0_10] : memref<8x8xi32, #tpu.memory_space<vmem>>, vector<8x8xi32>
    %c0_i32_11 = arith.constant 0 : i32
    %9 = vector.broadcast %c0_i32_11 : i32 to vector<8x8xi32>
    %10 = arith.cmpi ne, %8, %9 : vector<8x8xi32>
    %11 = arith.extui %10 : vector<8x8xi1> to vector<8x8xi32>
    %12 = arith.sitofp %11 : vector<8x8xi32> to vector<8x8xf32>
    %13 = vector.shape_cast %3 : vector<8x32xf32> to vector<8x1x32xf32>
    %14 = vector.broadcast %13 : vector<8x1x32xf32> to vector<8x8x32xf32>
    %15 = arith.mulf %5, %14 : vector<8x8x32xf32>
    %cst = arith.constant dense<0.000000e+00> : vector<8x8xf32>
    %16 = vector.multi_reduction <add>, %15, %cst [2] : vector<8x8x32xf32> to vector<8x8xf32>
    %17 = vector.shape_cast %3 : vector<8x32xf32> to vector<8x1x1x32xf32>
    %18 = vector.broadcast %17 : vector<8x1x1x32xf32> to vector<8x8x5x32xf32>
    %19 = arith.mulf %7, %18 : vector<8x8x5x32xf32>
    %cst_12 = arith.constant dense<0.000000e+00> : vector<8x8x5xf32>
    %20 = vector.multi_reduction <add>, %19, %cst_12 [3] : vector<8x8x5x32xf32> to vector<8x8x5xf32>
    %cst_13 = arith.constant 0.000000e+00 : f32
    %21 = vector.broadcast %cst_13 : f32 to vector<8x8x5xf32>
    %22 = arith.subf %21, %20 : vector<8x8x5xf32>
    %c0_14 = arith.constant 0 : index
    %c0_15 = arith.constant 0 : index
    %23 = vector.load %arg7[%c0_14, %c0_15] : memref<8x8xf32, #tpu.memory_space<vmem>>, vector<8x8xf32>
    %24 = math.absf %16 : vector<8x8xf32>
    %cst_16 = arith.constant 0.000000e+00 : f32
    %25 = vector.broadcast %cst_16 : f32 to vector<8x8xf32>
    %26 = arith.subf %25, %24 : vector<8x8xf32>
    %27 = math.exp %26 : vector<8x8xf32>
    %28 = math.log1p %27 : vector<8x8xf32>
    %cst_17 = arith.constant 0.000000e+00 : f32
    %29 = vector.broadcast %cst_17 : f32 to vector<8x8xf32>
    %30 = arith.minimumf %16, %29 : vector<8x8xf32>
    %31 = arith.subf %28, %30 : vector<8x8xf32>
    %32 = arith.mulf %31, %12 : vector<8x8xf32>
    %33 = arith.addf %23, %32 : vector<8x8xf32>
    %c0_18 = arith.constant 0 : index
    %c0_19 = arith.constant 0 : index
    %34 = vector.load %arg7[%c0_18, %c0_19] : memref<8x8xf32, #tpu.memory_space<vmem>>, vector<8x8xf32>
    tpu.vector_store %arg7[%c0_18, %c0_19], %33 {strides = array<i32>} : memref<8x8xf32, #tpu.memory_space<vmem>>, vector<8x8xf32>,
    %c0_20 = arith.constant 0 : index
    %c0_21 = arith.constant 0 : index
    %c0_22 = arith.constant 0 : index
    %35 = vector.load %arg8[%c0_20, %c0_21, %c0_22] : memref<8x8x5xf32, #tpu.memory_space<vmem>>, vector<8x8x5xf32>
    %36 = math.absf %22 : vector<8x8x5xf32>
    %cst_23 = arith.constant 0.000000e+00 : f32
    %37 = vector.broadcast %cst_23 : f32 to vector<8x8x5xf32>
    %38 = arith.subf %37, %36 : vector<8x8x5xf32>
    %39 = math.exp %38 : vector<8x8x5xf32>
    %40 = math.log1p %39 : vector<8x8x5xf32>
    %cst_24 = arith.constant 0.000000e+00 : f32
    %41 = vector.broadcast %cst_24 : f32 to vector<8x8x5xf32>
    %42 = arith.minimumf %22, %41 : vector<8x8x5xf32>
    %43 = arith.subf %40, %42 : vector<8x8x5xf32>
    %44 = vector.shape_cast %12 : vector<8x8xf32> to vector<8x8x1xf32>
    %45 = vector.broadcast %44 : vector<8x8x1xf32> to vector<8x8x5xf32>
    %46 = arith.mulf %43, %45 : vector<8x8x5xf32>
    %47 = arith.addf %35, %46 : vector<8x8x5xf32>
    %c0_25 = arith.constant 0 : index
    %c0_26 = arith.constant 0 : index
    %c0_27 = arith.constant 0 : index
    %48 = vector.load %arg8[%c0_25, %c0_26, %c0_27] : memref<8x8x5xf32, #tpu.memory_space<vmem>>, vector<8x8x5xf32>
    tpu.vector_store %arg8[%c0_25, %c0_26, %c0_27], %47 {strides = array<i32>} : memref<8x8x5xf32, #tpu.memory_space<vmem>>, vector<8x8x5xf32>,
    %c0_i32_28 = arith.constant 0 : i32
    %49 = arith.cmpi eq, %arg1, %c0_i32_28 : i32
    %50 = arith.extui %49 : i1 to i32
    %c0_i32_29 = arith.constant 0 : i32
    %51 = arith.cmpi ne, %50, %c0_i32_29 : i32
    scf.if %51 {
      %c0_30 = arith.constant 0 : index
      %c0_31 = arith.constant 0 : index
      %52 = vector.load %arg7[%c0_30, %c0_31] : memref<8x8xf32, #tpu.memory_space<vmem>>, vector<8x8xf32>
      %53 = vector.shape_cast %52 : vector<8x8xf32> to vector<1x8x8xf32>
      %cst_32 = arith.constant dense<0.000000e+00> : vector<1xf32>
      %54 = vector.multi_reduction <add>, %53, %cst_32 [1, 2] : vector<1x8x8xf32> to vector<1xf32>
      %55 = vector.shape_cast %54 : vector<1xf32> to vector<1x1x1xf32>
      %56 = vector.extract %55[0, 0, 0] : f32 from vector<1x1x1xf32>
      %c0_33 = arith.constant 0 : index
      %c0_34 = arith.constant 0 : index
      %c0_35 = arith.constant 0 : index
      %57 = vector.load %arg8[%c0_33, %c0_34, %c0_35] : memref<8x8x5xf32, #tpu.memory_space<vmem>>, vector<8x8x5xf32>
      %58 = vector.shape_cast %57 : vector<8x8x5xf32> to vector<1x8x8x5xf32>
      %cst_36 = arith.constant dense<0.000000e+00> : vector<1xf32>
      %59 = vector.multi_reduction <add>, %58, %cst_36 [1, 2, 3] : vector<1x8x8x5xf32> to vector<1xf32>
      %60 = vector.shape_cast %59 : vector<1xf32> to vector<1x1x1x1xf32>
      %61 = vector.extract %60[0, 0, 0, 0] : f32 from vector<1x1x1x1xf32>
      %62 = arith.addf %56, %61 : f32
      %63 = vector.broadcast %62 : f32 to vector<1x8x128xf32>
      %c0_37 = arith.constant 0 : index
      %c0_38 = arith.constant 0 : index
      %c0_39 = arith.constant 0 : index
      %64 = vector.load %arg6[%c0_37, %c0_38, %c0_39] : memref<1x8x128xf32, #tpu.memory_space<vmem>>, vector<1x8x128xf32>
      tpu.vector_store %arg6[%c0_37, %c0_38, %c0_39], %63 {strides = array<i32>} : memref<1x8x128xf32, #tpu.memory_space<vmem>>, vector<1x8x128xf32>,
    } else {
    }
    return
  }
  func.func @transform_0(%arg0: i32, %arg1: i32) -> (i32, i32) {
    %c1_i32 = arith.constant 1 : i32
    %0 = arith.muli %arg0, %c1_i32 : i32
    %1 = arith.addi %0, %arg1 : i32
    %c0_i32 = arith.constant 0 : i32
    %c0_i32_0 = arith.constant 0 : i32
    return %1, %c0_i32 : i32, i32
  }
  func.func @transform_1(%arg0: i32, %arg1: i32) -> (i32, i32, i32) {
    %c1_i32 = arith.constant 1 : i32
    %0 = arith.muli %arg0, %c1_i32 : i32
    %1 = arith.addi %0, %arg1 : i32
    %c0_i32 = arith.constant 0 : i32
    %c0_i32_0 = arith.constant 0 : i32
    %c0_i32_1 = arith.constant 0 : i32
    return %1, %c0_i32, %c0_i32_0 : i32, i32, i32
  }
  func.func @transform_2(%arg0: i32, %arg1: i32) -> (i32, i32, i32, i32) {
    %c1_i32 = arith.constant 1 : i32
    %0 = arith.muli %arg0, %c1_i32 : i32
    %1 = arith.addi %0, %arg1 : i32
    %c0_i32 = arith.constant 0 : i32
    %c0_i32_0 = arith.constant 0 : i32
    %c0_i32_1 = arith.constant 0 : i32
    %c0_i32_2 = arith.constant 0 : i32
    return %1, %c0_i32, %c0_i32_0, %c0_i32_1 : i32, i32, i32, i32
  }
  func.func @transform_3(%arg0: i32, %arg1: i32) -> (i32, i32) {
    %c1_i32 = arith.constant 1 : i32
    %0 = arith.muli %arg0, %c1_i32 : i32
    %1 = arith.addi %0, %arg1 : i32
    %c0_i32 = arith.constant 0 : i32
    %c0_i32_0 = arith.constant 0 : i32
    return %1, %c0_i32 : i32, i32
  }
  func.func @transform_4(%arg0: i32, %arg1: i32) -> (i32, i32, i32) {
    %c0_i32 = arith.constant 0 : i32
    %c0_i32_0 = arith.constant 0 : i32
    %c0_i32_1 = arith.constant 0 : i32
    return %arg0, %c0_i32, %c0_i32_0 : i32, i32, i32
  }
}

</mosaic_0001>

<bundles_post_ra>
// kernel: mwe_sentence_skipgram_forward.1
= control target key start
LH: loop header
LB: loop body
LE: loop exit
PB: predicated region body
PF: predicated region fallthrough
CT: control target
= control target key end

     0   :  { %s3748_s15 = smov 0   ;;  %s3750_s16 = smov 0   ;;  %s6343_s0 = inlined_call_operand.vmem [shape: f32[16,32], index: 0, kind: input, shape index: {}]   ;;  %s6344_s1 = inlined_call_operand.vmem [shape: bf16[16,8,32], index: 1, kind: input, shape index: {}]   ;;  %s6345_s2 = inlined_call_operand.vmem [shape: bf16[16,8,5,32], index: 2, kind: input, shape index: {}]   ;;  %s6346_s3 = inlined_call_operand.vmem [shape: s32[16,8], index: 3, kind: input, shape index: {}]   ;;  %s6347_s4 = inlined_call_operand.vmem [shape: f32[2,8,128], index: 4, kind: output, shape index: {}]  }
   0x1   :  { %s3752_s17 = smov 0  }
   0x2 LB: > { %s26_s18 = sadd.s32 1, %s3714_s16  ;;  %p3342_p0 = scmp.ge.s32.totalorder %s3718_s17, 1  ;;  %s3718_s17 = sphi %s3752_s17, %s14_s17   ;;  %s3714_s16 = sphi %s3750_s16, %s6824_s16   ;;  %s3710_s15 = sphi %s3748_s15, %s6823_s15  }
   0x3   : > { %p28_p1 = scmp.ge.s32.totalorder %s26_s18, 2  ;;  %p221_p2 = scmp.lt.s32.totalorder %s3718_s17, 3 }
   0x5   : > { %s6826_s18 = smov (%p28_p1, %s26_s18), 0  ;;  %p222_p3 = pnand %p3342_p0, %p221_p2 }
   0x7   : > { %225 = sbr.rel (%p222_p3) target bundleno = 910 (0x38e), region = 36 }
   0xc   : > { %p265_p4 = scmp.lt.s32.totalorder %s3710_s15, 1  ;;  %s3344_s19 = sshll.u32 %s3710_s15, 3  ;;  %v6348_v0 = vlaneseq  ;;  %v3720_v1 = vmov 1966171168   ;;  %vm648_vm0 = vcmask 258048   ;;  %vm559_vm1 = vcmask 261120  }
   0xd   : > { %p272_p5 = scmp.lt.s32.totalorder %s3344_s19, 15  ;;  %v464_v2 = vunpack.c.l.s4 %v3720_v1 }
   0xe   : > { %s6828_s15 = smov (!%p265_p4, %s3710_s15), 1  ;;  %v3767_v3 = vshrl.u32 %v6348_v0, 7 }
   0xf   : > { %s6830_s19 = smov (!%p272_p5, %s3344_s19), 15  ;;  %v465_v4 = vunpack.c.0.s8 %v464_v2  ;;  %s3769_s20 = sshll.u32 %s6828_s15, 3 }
  0x10   : > { %s268_s23 = scalar_lea.vmem %s6343_s0, %s3769_s20  ;;  %s3354_s24 = sshll.u32 %s6830_s19, 5  ;;  %v3782_v7 = vsub.s32 0, %v3767_v3 }
  0x11   : > { %v468_v5 = vsub.s32 %v465_v4, %v3767_v3  ;;  %s3779_s27 = scalar_lea.vmem %s6345_s2, %s3354_s24  ;;  %v312_v6 = vld [vmem:[%s268_s23] sm:$0xff]  ;;  %s3345_s28 = sshll.u32 %s6830_s19, 2 }
  0x12   : > { %6428 = vst [vmem:[#allocation4_spill] sm:$0xff] %v3782_v7  ;;  %v330_v8 = vld [vmem:[%s3779_s27 + $0x4] sm:$0x7]  ;;  %s3788_s5 = scalar_lea.vmem %s6344_s1, %s3345_s28  ;;  %v332_v10 = vld [vmem:[%s3779_s27 + $0xc] sm:$0x7]  ;;  %v462_v13 = vcombine.high %v312_v6, %v312_v6  ;;  %s291_s8 = scalar_lea.vmem %s6346_s3, %s3769_s20 }
  0x13   : > { %v469_v9 = vrot.slane %v312_v6, %v468_v5  ;;  %v329_v11 = vld [vmem:[%s3779_s27] sm:$0x7]  ;;  %v394_v12 = vunpack.c.l.bf16 %v330_v8  ;;  %v331_v15 = vld [vmem:[%s3779_s27 + $0x8] sm:$0x7]  ;;  %v396_v18 = vunpack.c.l.bf16 %v332_v10  ;;  %v333_v32 = vld [vmem:[%s3779_s27 + $0x10] sm:$0x7]  ;;  %s296_s13 = scalar_lea.vmem %s6347_s4, %s3769_s20 }
  0x14   : > { %v3356_v14 = vld [vmem:[%s3788_s5] sm:$0xff]   ;;  %v393_v19 = vunpack.c.l.bf16 %v329_v11  ;;  %v3371_v20 = vld [vmem:[%s3788_s5 + $0x8] sm:$0xff]   ;;  %v395_v21 = vunpack.c.l.bf16 %v331_v15  ;;  %v476_v27 = vrot.slane %v462_v13, %v468_v5  ;;  %v334_v37 = vld [vmem:[%s3779_s27 + $0x14] sm:$0x7]  ;;  %v397_v47 = vunpack.c.l.bf16 %v333_v32 }
  0x15   : > { %v485_v16 = vrot.slane %v469_v9, %v468_v5  ;;  %v3357_v17 = vunpack.c.l.bf16 %v3356_v14  ;;  %v477_v22 = vcombine.high %v469_v9, %v469_v9  ;;  %v3361_v25 = vunpack.c.l.bf16 %v3371_v20  ;;  %v3372_v42 = vld [vmem:[%s3788_s5 + $0x10] sm:$0xff]   ;;  %v335_v43 = vld [vmem:[%s3779_s27 + $0x18] sm:$0x7]  ;;  %v336_v52 = vld [vmem:[%s3779_s27 + $0x1c] sm:$0x7] }
  0x16   : > { %v3358_v35 = vunpack.c.h.bf16 %v3356_v14  ;;  %v3362_v41 = vunpack.c.h.bf16 %v3371_v20  ;;  %v492_v49 = vrot.slane %v476_v27, %v468_v5  ;;  %v478_v50 = vcombine.high %v476_v27, %v476_v27  ;;  %v3373_v60 = vld [vmem:[%s3788_s5 + $0x18] sm:$0xff]   ;;  %v337_v4 = vld [vmem:[%s3779_s27 + $0x20] sm:$0x7]  ;;  %v339_v11 = vld [vmem:[%s3779_s27 + $0x28] sm:$0x7] }
  0x17   : > { %v514_v23 = vrot.slane %v485_v16, %v3782_v7  ;;  %v507_v24 = vcombine.high %v485_v16, %v485_v16  ;;  %v499_v26 = vrot.slane %v477_v22, %v468_v5  ;;  %v398_v51 = vunpack.c.l.bf16 %v334_v37  ;;  %v340_v16 = vld [vmem:[%s3779_s27 + $0x2c] sm:$0x7]  ;;  %v343_v27 = vld [vmem:[%s3779_s27 + $0x38] sm:$0x7]  ;;  %v344_v32 = vld [vmem:[%s3779_s27 + $0x3c] sm:$0x7] }
  0x18   : > { %v3365_v54 = vunpack.c.l.bf16 %v3372_v42  ;;  %v3366_v55 = vunpack.c.h.bf16 %v3372_v42  ;;  %v399_v56 = vunpack.c.l.bf16 %v335_v43  ;;  %v3818_v58 = vrot.slane %v492_v49, %v3782_v7  ;;  %v391_v0 = vld [vmem:[%s3779_s27 + $0xf8] sm:$0x7] }
  0x19   : > { %v585_v28 = vmul.f32 %v514_v23, %v394_v12  ;;  %v551_v29 = vmul.f32 %v3357_v17, %v514_v23  ;;  %v587_v30 = vmul.f32 %v514_v23, %v396_v18  ;;  %v584_v31 = vmul.f32 %v514_v23, %v393_v19 }
  0x1a   : > { %v586_v33 = vmul.f32 %v514_v23, %v395_v21  ;;  %v3798_v34 = vrot.slane %v507_v24, %v3782_v7  ;;  %v509_v36 = vcombine.high %v499_v26, %v499_v26  ;;  %v3804_v40 = vrot.slane %v499_v26, %v3782_v7  ;;  %v341_v21 = vld [vmem:[%s3779_s27 + $0x30] sm:$0x7]  ;;  %v342_v26 = vld [vmem:[%s3779_s27 + $0x34] sm:$0x7] }
  0x1b   : > { %v652_v38 = vsel %vm648_vm0, %v585_v28, 0.0  ;;  %v560_v39 = vsel %vm559_vm1, %v551_v29, 0.0  ;;  %v658_v44 = vsel %vm648_vm0, %v587_v30, 0.0  ;;  %v649_v48 = vsel %vm648_vm0, %v584_v31, 0.0 }
  0x1c   : > { %653 = vadd.xlane.f32.xlu1 %v652_v38  ;;  %561 = vadd.xlane.f32.xlu0 %v560_v39  ;;  %v553_v45 = vmul.f32 %v3361_v25, %v3798_v34  ;;  %v3811_v46 = vrot.slane %v509_v36, %v3782_v7  ;;  %v655_v53 = vsel %vm648_vm0, %v586_v33, 0.0  ;;  %v552_v57 = vmul.f32 %v3358_v35, %v3804_v40  ;;  %v345_v38 = vld [vmem:[%s3779_s27 + $0x40] sm:$0x7] }
  0x1d   : > { %v506_v59 = vrot.slane %v478_v50, %v468_v5  ;;  %v508_v61 = vcombine.high %v492_v49, %v492_v49  ;;  %v588_v1 = vmul.f32 %v514_v23, %v397_v47  ;;  %v400_v2 = vunpack.c.l.bf16 %v336_v52  ;;  %v338_v5 = vld [vmem:[%s3779_s27 + $0x24] sm:$0x7] }
  0x1e   : > { %v566_v62 = vsel %vm559_vm1, %v553_v45, 0.0  ;;  %v554_v63 = vmul.f32 %v3362_v41, %v3811_v46  ;;  %v589_v9 = vmul.f32 %v514_v23, %v398_v51  ;;  %v590_v10 = vmul.f32 %v514_v23, %v399_v56  ;;  %v347_v45 = vld [vmem:[%s3779_s27 + $0x48] sm:$0x7]  ;;  %v348_v51 = vld [vmem:[%s3779_s27 + $0x4c] sm:$0x7] }
  0x1f   : > { %v3825_v6 = vrot.slane %v506_v59, %v3782_v7  ;;  %v510_v8 = vcombine.high %v506_v59, %v506_v59  ;;  %v555_v12 = vmul.f32 %v3365_v54, %v3818_v58  ;;  %v3369_v13 = vunpack.c.l.bf16 %v3373_v60 }
  0x20   : > { %659 = vadd.xlane.f32.xlu1 %v658_v44  ;;  %650 = vadd.xlane.f32.xlu0 %v649_v48  ;;  %v3831_v14 = vrot.slane %v508_v61, %v3782_v7  ;;  %v591_v15 = vmul.f32 %v514_v23, %v400_v2  ;;  %v563_v17 = vsel %vm559_vm1, %v552_v57, 0.0  ;;  %v3370_v19 = vunpack.c.h.bf16 %v3373_v60  ;;  %v346_v44 = vld [vmem:[%s3779_s27 + $0x44] sm:$0x7]  ;;  %v349_v61 = vld [vmem:[%s3779_s27 + $0x50] sm:$0x7] }
  0x21   : > { %v556_v18 = vmul.f32 %v3366_v55, %v3825_v6  ;;  %v401_v20 = vunpack.c.l.bf16 %v337_v4  ;;  %v3838_v22 = vrot.slane %v510_v8, %v3782_v7  ;;  %v3841_v24 = vsel %vm648_vm0, %v588_v1, 0.0  ;;  %v3879_v4 = vld [vmem:[%s3779_s27 + $0x54] sm:$0x7]  ;;  %v3882_v8 = vld [vmem:[%s3779_s27 + $0x58] sm:$0x7] }
  0x22   : > { %v402_v25 = vunpack.c.l.bf16 %v338_v5  ;;  %v403_v23 = vunpack.c.l.bf16 %v339_v11  ;;  %v569_v28 = vsel %vm559_vm1, %v554_v63, 0.0  ;;  %v3847_v29 = vsel %vm648_vm0, %v589_v9, 0.0  ;;  %v3891_v11 = vld [vmem:[%s3779_s27 + $0x5c] sm:$0x7] }
  0x23   : > { %v3850_v30 = vsel %vm648_vm0, %v590_v10, 0.0  ;;  %v404_v31 = vunpack.c.l.bf16 %v340_v16  ;;  %v572_v33 = vsel %vm559_vm1, %v555_v12, 0.0  ;;  %v557_v35 = vmul.f32 %v3369_v13, %v3831_v14  ;;  %v353_v12 = vld [vmem:[%s3779_s27 + $0x60] sm:$0x7]  ;;  %v354_v13 = vld [vmem:[%s3779_s27 + $0x64] sm:$0x7] }
  0x24   : > { %656 = vadd.xlane.f32.xlu0 %v655_v53  ;;  %567 = vadd.xlane.f32.xlu1 %v566_v62  ;;  %v3856_v36 = vsel %vm648_vm0, %v591_v15, 0.0  ;;  %v405_v37 = vunpack.c.l.bf16 %v341_v21  ;;  %v575_v39 = vsel %vm559_vm1, %v556_v18, 0.0  ;;  %v592_v41 = vmul.f32 %v3804_v40, %v401_v20 }
  0x25   : > { %v406_v42 = vunpack.c.l.bf16 %v342_v26  ;;  %v407_v43 = vunpack.c.l.bf16 %v343_v27  ;;  %v558_v47 = vmul.f32 %v3370_v19, %v3838_v22  ;;  %v593_v48 = vmul.f32 %v3804_v40, %v402_v25  ;;  %v355_v19 = vld [vmem:[%s3779_s27 + $0x68] sm:$0x7]  ;;  %v356_v26 = vld [vmem:[%s3779_s27 + $0x6c] sm:$0x7] }
  0x26   : > { %v594_v49 = vmul.f32 %v3804_v40, %v403_v23  ;;  %v408_v50 = vunpack.c.l.bf16 %v344_v32  ;;  %v595_v52 = vmul.f32 %v3804_v40, %v404_v31  ;;  %v596_v53 = vmul.f32 %v3804_v40, %v405_v37 }
  0x27   : > { %v597_v54 = vmul.f32 %v3804_v40, %v406_v42  ;;  %v409_v55 = vunpack.c.l.bf16 %v345_v38  ;;  %v598_v56 = vmul.f32 %v3804_v40, %v407_v43  ;;  %v410_v59 = vunpack.c.l.bf16 %v346_v44  ;;  %v359_v42 = vld [vmem:[%s3779_s27 + $0x78] sm:$0x7]  ;;  %v392_v44 = vld [vmem:[%s3779_s27 + $0xfc] sm:$0x7] }
  0x28   : > { %564 = vadd.xlane.f32.xlu0 %v563_v17  ;;  %570 = vadd.xlane.f32.xlu1 %v569_v28  ;;  %v599_v57 = vmul.f32 %v3804_v40, %v408_v50  ;;  %v411_v60 = vunpack.c.l.bf16 %v347_v45  ;;  %v578_v62 = vsel %vm559_vm1, %v557_v35, 0.0  ;;  %v3875_v63 = vsel %vm648_vm0, %v592_v41, 0.0  ;;  %v358_v41 = vld [vmem:[%s3779_s27 + $0x74] sm:$0x7] }
  0x29   : > { %v600_v1 = vmul.f32 %v3798_v34, %v409_v55  ;;  %v412_v2 = vunpack.c.l.bf16 %v348_v51  ;;  %v581_v40 = vsel %vm559_vm1, %v558_v47, 0.0  ;;  %v3886_v9 = vsel %vm648_vm0, %v593_v48, 0.0  ;;  %v360_v48 = vld [vmem:[%s3779_s27 + $0x7c] sm:$0x7] }
  0x2a   : > { %v601_v10 = vmul.f32 %v3798_v34, %v410_v59  ;;  %v602_v5 = vmul.f32 %v3798_v34, %v411_v60  ;;  %v3896_v15 = vsel %vm648_vm0, %v594_v49, 0.0  ;;  %v3899_v16 = vsel %vm648_vm0, %v595_v52, 0.0  ;;  %v362_v59 = vld [vmem:[%s3779_s27 + $0x84] sm:$0x7]  ;;  %v363_v60 = vld [vmem:[%s3779_s27 + $0x88] sm:$0x7] }
  0x2b   : > { %v3902_v17 = vsel %vm648_vm0, %v596_v53, 0.0  ;;  %v413_v18 = vunpack.c.l.bf16 %v349_v61  ;;  %v3906_v20 = vsel %vm648_vm0, %v597_v54, 0.0  ;;  %v3909_v21 = vsel %vm648_vm0, %v598_v56, 0.0  ;;  %v361_v53 = vld [vmem:[%s3779_s27 + $0x80] sm:$0x7] }
  0x2c   : > { %573 = vadd.xlane.f32.xlu0 %v572_v33  ;;  %576 = vadd.xlane.f32.xlu1 %v575_v39  ;;  %v3912_v25 = vsel %vm648_vm0, %v599_v57, 0.0  ;;  %v603_v23 = vmul.f32 %v3798_v34, %v412_v2  ;;  %v3917_v27 = vsel %vm648_vm0, %v600_v1, 0.0  ;;  %v414_v28 = vunpack.c.l.bf16 %v3879_v4  ;;  %v357_v33 = vld [vmem:[%s3779_s27 + $0x70] sm:$0x7] }
  0x2d   : > { %v417_v32 = vunpack.c.l.bf16 %v353_v12  ;;  %v3923_v35 = vsel %vm648_vm0, %v601_v10, 0.0  ;;  %v3926_v37 = vsel %vm648_vm0, %v602_v5, 0.0  ;;  %v418_v38 = vunpack.c.l.bf16 %v354_v13  ;;  %v365_v12 = vld [vmem:[%s3779_s27 + $0x90] sm:$0x7] }
  0x2e   : > { %v419_v39 = vunpack.c.l.bf16 %v355_v19  ;;  %v3931_v43 = vmul.f32 %v3798_v34, %v413_v18  ;;  %v420_v47 = vunpack.c.l.bf16 %v356_v26  ;;  %v3937_v49 = vsel %vm648_vm0, %v603_v23, 0.0  ;;  %v366_v26 = vld [vmem:[%s3779_s27 + $0x94] sm:$0x7] }
  0x2f   : > { %v608_v45 = vmul.f32 %v3811_v46, %v417_v32  ;;  %v609_v50 = vmul.f32 %v3811_v46, %v418_v38  ;;  %v421_v52 = vunpack.c.l.bf16 %v357_v33  ;;  %v422_v56 = vunpack.c.l.bf16 %v358_v41  ;;  %v367_v32 = vld [vmem:[%s3779_s27 + $0x98] sm:$0x7] }
  0x30   : > { %579 = vadd.xlane.f32.xlu0 %v578_v62  ;;  %582 = vadd.xlane.f32.xlu1 %v581_v40  ;;  %v610_v51 = vmul.f32 %v3811_v46, %v419_v39  ;;  %v611_v55 = vmul.f32 %v3811_v46, %v420_v47  ;;  %v423_v57 = vunpack.c.l.bf16 %v359_v42  ;;  %v424_v2 = vunpack.c.l.bf16 %v360_v48  ;;  %v364_v40 = vld [vmem:[%s3779_s27 + $0x8c] sm:$0x7]  ;;  %v368_v42 = vld [vmem:[%s3779_s27 + $0x9c] sm:$0x7] }
  0x31   : > { %v3943_v54 = vsel %vm648_vm0, %v608_v45, 0.0  ;;  %v3951_v61 = vsel %vm648_vm0, %v609_v50, 0.0  ;;  %v612_v1 = vmul.f32 %v3811_v46, %v421_v52  ;;  %v426_v19 = vunpack.c.l.bf16 %v362_v59  ;;  %v369_v50 = vld [vmem:[%s3779_s27 + $0xa0] sm:$0x7] }
  0x32   : > { %v3954_v62 = vsel %vm648_vm0, %v610_v51, 0.0  ;;  %v3959_v10 = vsel %vm648_vm0, %v611_v55, 0.0  ;;  %v614_v5 = vmul.f32 %v3811_v46, %v423_v57  ;;  %v615_v18 = vmul.f32 %v3811_v46, %v424_v2  ;;  %v370_v55 = vld [vmem:[%s3779_s27 + $0xa4] sm:$0x7] }
  0x33   : > { %v3965_v13 = vsel %vm648_vm0, %v612_v1, 0.0  ;;  %v427_v23 = vunpack.c.l.bf16 %v363_v60  ;;  %v428_v41 = vunpack.c.l.bf16 %v364_v40  ;;  %v617_v45 = vmul.f32 %v3818_v58, %v426_v19  ;;  %v372_v1 = vld [vmem:[%s3779_s27 + $0xac] sm:$0x7] }
  0x34   : > { %662 = vadd.xlane.f32.xlu0 %v3841_v24  ;;  %665 = vadd.xlane.f32.xlu1 %v3847_v29  ;;  %v613_v24 = vmul.f32 %v3811_v46, %v422_v56  ;;  %v425_v29 = vunpack.c.l.bf16 %v361_v53  ;;  %v3974_v38 = vsel %vm648_vm0, %v614_v5, 0.0  ;;  %v3981_v46 = vsel %vm648_vm0, %v615_v18, 0.0 }
  0x35   : > { %v618_v47 = vmul.f32 %v3818_v58, %v427_v23  ;;  %v429_v48 = vunpack.c.l.bf16 %v365_v12  ;;  %v619_v52 = vmul.f32 %v3818_v58, %v428_v41  ;;  %v430_v53 = vunpack.c.l.bf16 %v366_v26  ;;  %v374_v26 = vld [vmem:[%s3779_s27 + $0xb4] sm:$0x7] }
  0x36   : > { %v3971_v33 = vsel %vm648_vm0, %v613_v24, 0.0  ;;  %v616_v39 = vmul.f32 %v3818_v58, %v425_v29  ;;  %v3993_v56 = vsel %vm648_vm0, %v617_v45, 0.0  ;;  %v432_v60 = vunpack.c.l.bf16 %v368_v42  ;;  %v373_v29 = vld [vmem:[%s3779_s27 + $0xb0] sm:$0x7]  ;;  %v376_v42 = vld [vmem:[%s3779_s27 + $0xbc] sm:$0x7] }
  0x37   : > { %v3996_v57 = vsel %vm648_vm0, %v618_v47, 0.0  ;;  %v620_v59 = vmul.f32 %v3818_v58, %v429_v48  ;;  %v4001_v2 = vsel %vm648_vm0, %v619_v52, 0.0  ;;  %v621_v40 = vmul.f32 %v3818_v58, %v430_v53 }
  0x38   : > { %668 = vadd.xlane.f32.xlu0 %v3850_v30  ;;  %671 = vadd.xlane.f32.xlu1 %v3856_v36  ;;  %v3987_v51 = vsel %vm648_vm0, %v616_v39, 0.0  ;;  %v431_v30 = vunpack.c.l.bf16 %v367_v32  ;;  %v371_v36 = vld [vmem:[%s3779_s27 + $0xa8] sm:$0x7]  ;;  %v433_v5 = vunpack.c.l.bf16 %v369_v50  ;;  %v623_v18 = vmul.f32 %v3818_v58, %v432_v60  ;;  %v375_v32 = vld [vmem:[%s3779_s27 + $0xb8] sm:$0x7] }
  0x39   : > { %v4009_v12 = vsel %vm648_vm0, %v620_v59, 0.0  ;;  %v434_v19 = vunpack.c.l.bf16 %v370_v55  ;;  %v435_v23 = vunpack.c.l.bf16 %v371_v36  ;;  %v4015_v39 = vsel %vm648_vm0, %v621_v40, 0.0  ;;  %v377_v50 = vld [vmem:[%s3779_s27 + $0xc0] sm:$0x7]  ;;  %v378_v36 = vld [vmem:[%s3779_s27 + $0xc4] sm:$0x7] }
  0x3a   : > { %v622_v24 = vmul.f32 %v3818_v58, %v431_v30  ;;  %v4023_v45 = vsel %vm648_vm0, %v623_v18, 0.0  ;;  %v437_v48 = vunpack.c.l.bf16 %v373_v29  ;;  %v438_v30 = vunpack.c.l.bf16 %v374_v26  ;;  %v379_v59 = vld [vmem:[%s3779_s27 + $0xc8] sm:$0x7] }
  0x3b   : > { %v625_v58 = vmul.f32 %v3825_v6, %v434_v19  ;;  %v626_v47 = vmul.f32 %v3825_v6, %v435_v23  ;;  %v439_v55 = vunpack.c.l.bf16 %v375_v32  ;;  %v381_v19 = vld [vmem:[%s3779_s27 + $0xd0] sm:$0x7]  ;;  %v442_v32 = vunpack.c.l.bf16 %v378_v36 }
  0x3c   : > { %674 = vadd.xlane.f32.xlu0 %v3875_v63  ;;  %677 = vadd.xlane.f32.xlu1 %v3886_v9  ;;  %v4018_v41 = vsel %vm648_vm0, %v622_v24, 0.0  ;;  %v624_v63 = vmul.f32 %v3825_v6, %v433_v5  ;;  %v436_v9 = vunpack.c.l.bf16 %v372_v1  ;;  %v628_v40 = vmul.f32 %v3825_v6, %v437_v48  ;;  %v380_v5 = vld [vmem:[%s3779_s27 + $0xcc] sm:$0x7] }
  0x3d   : > { %v4037_v60 = vsel %vm648_vm0, %v625_v58, 0.0  ;;  %v4040_v1 = vsel %vm648_vm0, %v626_v47, 0.0  ;;  %v440_v24 = vunpack.c.l.bf16 %v376_v42  ;;  %v630_v18 = vmul.f32 %v3825_v6, %v439_v55  ;;  %v383_v42 = vld [vmem:[%s3779_s27 + $0xd8] sm:$0x7] }
  0x3e   : > { %v4029_v52 = vsel %vm648_vm0, %v624_v63, 0.0  ;;  %v627_v53 = vmul.f32 %v3825_v6, %v436_v9  ;;  %v4051_v23 = vsel %vm648_vm0, %v628_v40, 0.0  ;;  %v443_v63 = vunpack.c.l.bf16 %v379_v59  ;;  %v382_v9 = vld [vmem:[%s3779_s27 + $0xd4] sm:$0x7]  ;;  %v385_v59 = vld [vmem:[%s3779_s27 + $0xe0] sm:$0x7] }
  0x3f   : > { %v631_v26 = vmul.f32 %v3825_v6, %v440_v24  ;;  %v4060_v47 = vsel %vm648_vm0, %v630_v18, 0.0  ;;  %v445_v36 = vunpack.c.l.bf16 %v381_v19  ;;  %v455_v31 = vunpack.c.l.bf16 %v391_v0 }
  0x40   : > { %680 = vadd.xlane.f32.xlu0 %v3896_v15  ;;  %683 = vadd.xlane.f32.xlu1 %v3899_v16  ;;  %v4045_v29 = vsel %vm648_vm0, %v627_v53, 0.0  ;;  %v629_v15 = vmul.f32 %v3825_v6, %v438_v30  ;;  %v441_v16 = vunpack.c.l.bf16 %v377_v50  ;;  %v444_v50 = vunpack.c.l.bf16 %v380_v5  ;;  %v384_v53 = vld [vmem:[%s3779_s27 + $0xdc] sm:$0x7] }
  0x41   : > { %v4067_v6 = vsel %vm648_vm0, %v631_v26, 0.0  ;;  %v633_v30 = vmul.f32 %v3831_v14, %v442_v32  ;;  %v634_v55 = vmul.f32 %v3831_v14, %v443_v63  ;;  %v446_v5 = vunpack.c.l.bf16 %v382_v9  ;;  %v388_v32 = vld [vmem:[%s3779_s27 + $0xec] sm:$0x7] }
  0x42   : > { %v4057_v58 = vsel %vm648_vm0, %v629_v15, 0.0  ;;  %v632_v48 = vmul.f32 %v3831_v14, %v441_v16  ;;  %v635_v24 = vmul.f32 %v3831_v14, %v444_v50  ;;  %v386_v15 = vld [vmem:[%s3779_s27 + $0xe4] sm:$0x7]  ;;  %v636_v19 = vmul.f32 %v3831_v14, %v445_v36  ;;  %v389_v50 = vld [vmem:[%s3779_s27 + $0xf0] sm:$0x7] }
  0x43   : > { %v4079_v18 = vsel %vm648_vm0, %v633_v30, 0.0  ;;  %v4082_v16 = vsel %vm648_vm0, %v634_v55, 0.0  ;;  %v448_v26 = vunpack.c.l.bf16 %v384_v53  ;;  %v637_v9 = vmul.f32 %v3831_v14, %v446_v5 }
  0x44   : > { %686 = vadd.xlane.f32.xlu0 %v3902_v17  ;;  %689 = vadd.xlane.f32.xlu1 %v3906_v20  ;;  %v4073_v40 = vsel %vm648_vm0, %v632_v48, 0.0  ;;  %v447_v17 = vunpack.c.l.bf16 %v383_v42  ;;  %v387_v20 = vld [vmem:[%s3779_s27 + $0xe8] sm:$0x7]  ;;  %v4087_v63 = vsel %vm648_vm0, %v635_v24, 0.0  ;;  %v449_v48 = vunpack.c.l.bf16 %v385_v59  ;;  %v390_v24 = vld [vmem:[%s3779_s27 + $0xf4] sm:$0x7] }
  0x45   : > { %v4095_v30 = vsel %vm648_vm0, %v636_v19, 0.0  ;;  %v639_v53 = vmul.f32 %v3831_v14, %v448_v26  ;;  %v450_v55 = vunpack.c.l.bf16 %v386_v15  ;;  %v451_v36 = vunpack.c.l.bf16 %v387_v20 }
  0x46   : > { %v638_v42 = vmul.f32 %v3831_v14, %v447_v17  ;;  %v4101_v5 = vsel %vm648_vm0, %v637_v9, 0.0  ;;  %v640_v59 = vmul.f32 %v3838_v22, %v449_v48  ;;  %v453_v15 = vunpack.c.l.bf16 %v389_v50 }
  0x47   : > { %v641_v19 = vmul.f32 %v3838_v22, %v450_v55  ;;  %v642_v14 = vmul.f32 %v3838_v22, %v451_v36  ;;  %v454_v9 = vunpack.c.l.bf16 %v390_v24  ;;  %v605_v50 = vmul.f32 %v3798_v34, %v414_v28 }
  0x48   : > { %692 = vadd.xlane.f32.xlu0 %v3909_v21  ;;  %695 = vadd.xlane.f32.xlu1 %v3912_v25  ;;  %v4104_v17 = vsel %vm648_vm0, %v638_v42, 0.0  ;;  %v452_v21 = vunpack.c.l.bf16 %v388_v32  ;;  %v4109_v25 = vsel %vm648_vm0, %v639_v53, 0.0  ;;  %v817_v20 = vsel %vm648_vm0, %v640_v59, 0.0 }
  0x49   : > { %v820_v32 = vsel %vm648_vm0, %v641_v19, 0.0  ;;  %v823_v42 = vsel %vm648_vm0, %v642_v14, 0.0  ;;  %v644_v48 = vmul.f32 %v3838_v22, %v453_v15  ;;  %v456_v53 = vunpack.c.l.bf16 %v392_v44 }
  0x4a   : > { %v643_v26 = vmul.f32 %v3838_v22, %v452_v21  ;;  %v645_v36 = vmul.f32 %v3838_v22, %v454_v9  ;;  %v646_v0 = vmul.f32 %v3838_v22, %v455_v31  ;;  %v709_v28 = vsel %vm648_vm0, %v3931_v43, 0.0 }
  0x4b   : > { %v712_v44 = vsel %vm648_vm0, %v605_v50, 0.0  ;;  %v6429_v31 = vunpack.c.l.bf16 %v3882_v8  ;;  %v4181_v8 = vsub.s32 1, %v3767_v3 }
  0x4c   : > { %698 = vadd.xlane.f32.xlu0 %v3917_v27  ;;  %701 = vadd.xlane.f32.xlu1 %v3923_v35  ;;  %v826_v55 = vsel %vm648_vm0, %v643_v26, 0.0  ;;  %v829_v27 = vsel %vm648_vm0, %v644_v48, 0.0  ;;  %v647_v35 = vmul.f32 %v3838_v22, %v456_v53  ;;  %v832_v24 = vsel %vm648_vm0, %v645_v36, 0.0 }
  0x4d   : > { %v835_v59 = vsel %vm648_vm0, %v646_v0, 0.0  ;;  %v606_v21 = vmul.f32 %v3798_v34, %v6429_v31  ;;  %v6430_v22 = vunpack.c.l.bf16 %v3891_v11  ;;  %6431 = vst [vmem:[#allocation5_spill] sm:$0xff] %v4181_v8  ;;  %v6349_v11 = vmov 0.0  }
  0x4e   : > { %v838_v4 = vsel %vm648_vm0, %v647_v35, 0.0 }
  0x4f   : > { %v607_v19 = vmul.f32 %v3798_v34, %v6430_v22  ;;  %v457_v34 = vld [vmem:[%s291_s8] sm:$0xff] }
  0x50   : > { %704 = vadd.xlane.f32.xlu0 %v3926_v37  ;;  %707 = vadd.xlane.f32.xlu1 %v3937_v49  ;;  %v715_v37 = vsel %vm648_vm0, %v606_v21, 0.0  ;;  %vm458_vm2 = vcmp.ne.s32.totalorder %v457_v34, 0 }
  0x51   : > { %v718_v49 = vsel %vm648_vm0, %v607_v19, 0.0  ;;  %v3351_v43 = vsel %vm458_vm2, 1.0, %v6349_v11 }
  0x54   : > { %710 = vadd.xlane.f32.xlu0 %v709_v28  ;;  %713 = vadd.xlane.f32.xlu1 %v712_v44 }
  0x58   : > { %716 = vadd.xlane.f32.xlu0 %v715_v37  ;;  %719 = vadd.xlane.f32.xlu1 %v718_v49 }
  0x5c   : > { %722 = vadd.xlane.f32.xlu0 %v3943_v54  ;;  %725 = vadd.xlane.f32.xlu1 %v3951_v61  ;;  %v1037_v54 = vrot.slane %v3351_v43, %v4181_v8  ;;  %v4186_v61 = vsub.s32 2, %v3767_v3 }
  0x5e   : > { %6432 = vst [vmem:[#allocation6_spill] sm:$0xff] %v4186_v61 }
  0x60   : > { %728 = vadd.xlane.f32.xlu0 %v3954_v62  ;;  %731 = vadd.xlane.f32.xlu1 %v3959_v10  ;;  %v1044_v62 = vrot.slane %v3351_v43, %v4186_v61  ;;  %v4190_v10 = vsub.s32 3, %v3767_v3 }
  0x62   : > { %6433 = vst [vmem:[#allocation7_spill] sm:$0xff] %v4190_v10 }
  0x64   : > { %734 = vadd.xlane.f32.xlu0 %v3965_v13  ;;  %737 = vadd.xlane.f32.xlu1 %v3971_v33  ;;  %v1030_v13 = vrot.slane %v3351_v43, %v3782_v7  ;;  %v4194_v33 = vsub.s32 4, %v3767_v3 }
  0x66   : > { %6434 = vst [vmem:[#allocation8_spill] sm:$0xff] %v4194_v33 }
  0x68   : > { %740 = vadd.xlane.f32.xlu0 %v3974_v38  ;;  %743 = vadd.xlane.f32.xlu1 %v3981_v46  ;;  %v1051_v38 = vrot.slane %v3351_v43, %v4190_v10  ;;  %v4198_v46 = vsub.s32 5, %v3767_v3 }
  0x6a   : > { %6435 = vst [vmem:[#allocation9_spill] sm:$0xff] %v4198_v46 }
  0x6c   : > { %746 = vadd.xlane.f32.xlu0 %v3987_v51  ;;  %749 = vadd.xlane.f32.xlu1 %v3993_v56  ;;  %v1058_v51 = vrot.slane %v3351_v43, %v4194_v33  ;;  %v4202_v56 = vsub.s32 6, %v3767_v3 }
  0x6e   : > { %6436 = vst [vmem:[#allocation10_spill] sm:$0xff] %v4202_v56 }
  0x70   : > { %752 = vadd.xlane.f32.xlu0 %v3996_v57  ;;  %755 = vadd.xlane.f32.xlu1 %v4001_v2  ;;  %v1065_v57 = vrot.slane %v3351_v43, %v4198_v46  ;;  %v4206_v2 = vsub.s32 7, %v3767_v3 }
  0x72   : > { %6437 = vst [vmem:[#allocation11_spill] sm:$0xff] %v4206_v2 }
  0x74   : > { %758 = vadd.xlane.f32.xlu0 %v4009_v12  ;;  %761 = vadd.xlane.f32.xlu1 %v4015_v39  ;;  %v4209_v12 = vrot.slane %v3351_v43, %v4202_v56  ;;  %v4212_v39 = vrot.slane %v3351_v43, %v4206_v2 }
  0x76   : > { %6438 = vst [vmem:[#allocation12_spill] sm:$0xff] %v4209_v12  ;;  %6439 = vst [vmem:[#allocation13_spill] sm:$0xff] %v4212_v39 }
  0x78   : > { %764 = vadd.xlane.f32.xlu0 %v4018_v41  ;;  %767 = vadd.xlane.f32.xlu1 %v4023_v45 }
  0x7c   : > { %770 = vadd.xlane.f32.xlu0 %v4029_v52  ;;  %773 = vadd.xlane.f32.xlu1 %v4037_v60 }
  0x80   : > { %776 = vadd.xlane.f32.xlu0 %v4040_v1  ;;  %779 = vadd.xlane.f32.xlu1 %v4045_v29 }
  0x84   : > { %782 = vadd.xlane.f32.xlu0 %v4051_v23  ;;  %785 = vadd.xlane.f32.xlu1 %v4057_v58 }
  0x88   : > { %788 = vadd.xlane.f32.xlu0 %v4060_v47  ;;  %791 = vadd.xlane.f32.xlu1 %v4067_v6 }
  0x8c   : > { %794 = vadd.xlane.f32.xlu0 %v4073_v40  ;;  %797 = vadd.xlane.f32.xlu1 %v4079_v18 }
  0x90   : > { %800 = vadd.xlane.f32.xlu0 %v4082_v16  ;;  %803 = vadd.xlane.f32.xlu1 %v4087_v63 }
  0x94   : > { %806 = vadd.xlane.f32.xlu0 %v4095_v30  ;;  %809 = vadd.xlane.f32.xlu1 %v4101_v5 }
  0x98   : > { %812 = vadd.xlane.f32.xlu0 %v4104_v17  ;;  %815 = vadd.xlane.f32.xlu1 %v4109_v25 }
  0x9c   : > { %818 = vadd.xlane.f32.xlu0 %v817_v20  ;;  %821 = vadd.xlane.f32.xlu1 %v820_v32 }
  0xa0   : > { %824 = vadd.xlane.f32.xlu0 %v823_v42  ;;  %827 = vadd.xlane.f32.xlu1 %v826_v55 }
  0xa4   : > { %830 = vadd.xlane.f32.xlu0 %v829_v27  ;;  %833 = vadd.xlane.f32.xlu1 %v832_v24 }
  0xa5   : > { %v4216_v41 = vpop.xlane.xlu0 %561  ;;  %v4222_v60 = vpop.xlane.xlu1 %653 }
  0xa6   : > { %6440 = vst [vmem:[#allocation14_spill] sm:$0xff] %v4216_v41  ;;  %v842_v55 = vsub.f32 0.0, %v4222_v60  ;;  %v906_v34 = vand.u32 2147483647, %v4216_v41 }
  0xa8   : > { %836 = vadd.xlane.f32.xlu0 %v835_v59  ;;  %839 = vadd.xlane.f32.xlu1 %v838_v4  ;;  %v1192_v27 = vand.u32 2147483647, %v842_v55 }
  0xa9   : > { %v4218_v45 = vpop.xlane.xlu0 %650  ;;  %v4226_v29 = vpop.xlane.xlu1 %659 }
  0xaa   : > { %v844_v0 = vsub.f32 0.0, %v4226_v29  ;;  %v841_v35 = vsub.f32 0.0, %v4218_v45  ;;  %v1256_v44 = vsub.f32 0.0, %v1192_v27 }
  0xac   : > { %v1194_v4 = vand.u32 2147483647, %v844_v0  ;;  %v1191_v31 = vand.u32 2147483647, %v841_v35  ;;  %v1321_v37 = vmul.f32 1.442695, %v1256_v44 }
  0xad   : > { %v4220_v52 = vpop.xlane.xlu0 %656  ;;  %v4230_v58 = vpop.xlane.xlu1 %567 }
  0xae   : > { %6443 = vst [vmem:[#allocation17_spill] sm:$0xff] %v4230_v58  ;;  %v843_v59 = vsub.f32 0.0, %v4220_v52  ;;  %v1258_v22 = vsub.f32 0.0, %v1194_v4  ;;  %v1255_v49 = vsub.f32 0.0, %v1191_v31  ;;  %3408 = vpow2.f32 %v1321_v37 }
  0xaf   : > { %v908_v52 = vand.u32 2147483647, %v4230_v58  ;;  %v6448_v4 = vlaneseq }
  0xb0   : > { %v1193_v21 = vand.u32 2147483647, %v843_v59 }
  0xb1   : > { %v4224_v1 = vpop.xlane.xlu0 %564  ;;  %v4234_v6 = vpop.xlane.xlu1 %570  ;;  %v1132_v44 = vand.u32 127, %v6448_v4 }
  0xb2   : > { %6441 = vst [vmem:[#allocation15_spill] sm:$0xff] %v4224_v1  ;;  %6445 = vst [vmem:[#allocation19_spill] sm:$0xff] %v4234_v6  ;;  %v1257_v43 = vsub.f32 0.0, %v1193_v21  ;;  %v907_v29 = vand.u32 2147483647, %v4224_v1  ;;  %v916_v21 = vsub.f32 0.0, %v908_v52 }
  0xb3   : > { %v909_v31 = vand.u32 2147483647, %v4234_v6 }
  0xb5   : > { %v4228_v23 = vpop.xlane.xlu0 %573  ;;  %v4238_v18 = vpop.xlane.xlu1 %576 }
  0xb6   : > { %6442 = vst [vmem:[#allocation16_spill] sm:$0xff] %v4228_v23  ;;  %6446 = vst [vmem:[#allocation20_spill] sm:$0xff] %v4238_v18  ;;  %v910_v37 = vand.u32 2147483647, %v4228_v23 }
  0xb9   : > { %1039 = vbcast.lane.b32.xlu1 %v1037_v54, 256  ;;  %v4232_v47 = vpop.xlane.xlu0 %579  ;;  %v4242_v63 = vpop.xlane.xlu1 %582 }
  0xba   : > { %6444 = vst [vmem:[#allocation18_spill] sm:$0xff] %v4232_v47  ;;  %6447 = vst [vmem:[#allocation21_spill] sm:$0xff] %v4242_v63 }
  0xbb   : > { %v4312_v11 = vpop.eup %3408 }
  0xbc   : > { %v1459_v23 = vmul.f32 -0.5, %v4312_v11 }
  0xbd   : > { %1046 = vbcast.lane.b32.xlu1 %v1044_v62, 256  ;;  %v4236_v40 = vpop.xlane.xlu0 %662  ;;  %v4246_v5 = vpop.xlane.xlu1 %665 }
  0xbe   : > { %1032 = vbcast.lane.b32.xlu0 %v1030_v13, 256 }
  0xc1   : > { %1053 = vbcast.lane.b32.xlu1 %v1051_v38, 256  ;;  %v4240_v16 = vpop.xlane.xlu0 %668  ;;  %v4250_v25 = vpop.xlane.xlu1 %671 }
  0xc2   : > { %1060 = vbcast.lane.b32.xlu0 %v1058_v51, 256 }
  0xc5   : > { %1067 = vbcast.lane.b32.xlu1 %v1065_v57, 256  ;;  %v4244_v30 = vpop.xlane.xlu0 %674  ;;  %v4254_v15 = vpop.xlane.xlu1 %677 }
  0xc6   : > { %1074 = vbcast.lane.b32.xlu0 %v4209_v12, 256 }
  0xc9   : > { %1081 = vbcast.lane.b32.xlu1 %v4212_v39, 256  ;;  %v4248_v17 = vpop.xlane.xlu0 %680  ;;  %v4258_v26 = vpop.xlane.xlu1 %683  ;;  %v6458_v39 = vsub.f32 0.0, %v4254_v15 }
  0xca   : > { %2156 = vbcast.lane.b32.xlu0 %v1030_v13, 256  ;;  %v1319_v13 = vmul.f32 1.442695, %v1255_v49 }
  0xcd   : > { %2163 = vbcast.lane.b32.xlu1 %v1037_v54, 256  ;;  %v4252_v14 = vpop.xlane.xlu0 %686  ;;  %v4262_v32 = vpop.xlane.xlu1 %689 }
  0xce   : > { %2170 = vbcast.lane.b32.xlu0 %v1044_v62, 256  ;;  %v1325_v62 = vmul.f32 1.442695, %v1258_v22  ;;  %v915_v22 = vsub.f32 0.0, %v907_v29 }
  0xd0   : > { %3410 = vpow2.f32 %v1325_v62  ;;  %v917_v62 = vsub.f32 0.0, %v909_v31  ;;  %v918_v31 = vsub.f32 0.0, %v910_v37  ;;  %v6454_v37 = vsub.f32 0.0, %v4240_v16 }
  0xd1   : > { %2177 = vbcast.lane.b32.xlu1 %v1051_v38, 256  ;;  %v4256_v20 = vpop.xlane.xlu0 %692  ;;  %v4266_v48 = vpop.xlane.xlu1 %695  ;;  %3412 = vpow2.f32 %v1319_v13  ;;  %v911_v13 = vand.u32 2147483647, %v4238_v18 }
  0xd2   : > { %2184 = vbcast.lane.b32.xlu0 %v1058_v51, 256  ;;  %v914_v51 = vsub.f32 0.0, %v906_v34  ;;  %v4314_v34 = vmin.f32 %v844_v0, 0.0  ;;  %v928_v2 = vmul.f32 1.442695, %v917_v62  ;;  %v6452_v0 = vsub.f32 0.0, %v4246_v5 }
  0xd3   : > { %v919_v46 = vsub.f32 0.0, %v911_v13  ;;  %v6457_v62 = vsub.f32 0.0, %v4244_v30 }
  0xd4   : > { %v922_v60 = vmul.f32 1.442695, %v914_v51  ;;  %v6451_v51 = vsub.f32 0.0, %v4236_v40  ;;  %v1196_v56 = vand.u32 2147483647, %v6452_v0 }
  0xd5   : > { %2191 = vbcast.lane.b32.xlu1 %v1065_v57, 256  ;;  %v4260_v9 = vpop.xlane.xlu0 %698  ;;  %v4270_v50 = vpop.xlane.xlu1 %701  ;;  %v1323_v57 = vmul.f32 1.442695, %v1257_v43  ;;  %v4302_v43 = vsub.s32 %v1132_v44, %v3767_v3  ;;  %v4316_v3 = vmin.f32 %v841_v35, 0.0  ;;  %v924_v44 = vmul.f32 1.442695, %v915_v22 }
  0xd6   : > { %v1195_v52 = vand.u32 2147483647, %v6451_v51  ;;  %v930_v0 = vmul.f32 1.442695, %v918_v31  ;;  %v932_v51 = vmul.f32 1.442695, %v919_v46 }
  0xd7   : > { %3414 = vpow2.f32 %v1323_v57  ;;  %6450 = vst [vmem:[#allocation23_spill] sm:$0xff] %v4302_v43  ;;  %v4306_v57 = vmin.f32 %v842_v55, 0.0  ;;  %v4318_v43 = vmin.f32 %v843_v59, 0.0  ;;  %v1456_v59 = vadd.f32 1.0, %v4312_v11 }
  0xd8   : > { %3416 = vpow2.f32 %v922_v60  ;;  %v926_v60 = vmul.f32 1.442695, %v916_v21  ;;  %v1197_v55 = vand.u32 2147483647, %v6454_v37  ;;  %v1259_v33 = vsub.f32 0.0, %v1195_v52 }
  0xd9   : > { %v4264_v42 = vpop.xlane.xlu0 %704  ;;  %v4277_v24 = vpop.xlane.xlu1 %707  ;;  %v1199_v61 = vand.u32 2147483647, %v6457_v62  ;;  %v1200_v52 = vand.u32 2147483647, %v6458_v39  ;;  %v6461_v62 = vsub.f32 0.0, %v4248_v17  ;;  %v6375_v37 = vsub.f32 0.0, %v4258_v26 }
  0xda   : > { %3418 = vpow2.f32 %v926_v60  ;;  %v6455_v60 = vsub.f32 0.0, %v4250_v25  ;;  %v1261_v13 = vsub.f32 0.0, %v1197_v55  ;;  %v912_v39 = vand.u32 2147483647, %v4232_v47 }
  0xdb   : > { %3420 = vpow2.f32 %v924_v44  ;;  %v1260_v44 = vsub.f32 0.0, %v1196_v56  ;;  %v1327_v56 = vmul.f32 1.442695, %v1259_v33  ;;  %v1201_v55 = vand.u32 2147483647, %v6461_v62 }
  0xdc   : > { %v1198_v8 = vand.u32 2147483647, %v6455_v60  ;;  %3422 = vpow2.f32 %v928_v2  ;;  %v1263_v58 = vsub.f32 0.0, %v1199_v61  ;;  %v1264_v60 = vsub.f32 0.0, %v1200_v52 }
  0xdd   : > { %v4268_v53 = vpop.xlane.xlu0 %710  ;;  %v4282_v19 = vpop.xlane.xlu1 %713  ;;  %3424 = vlog2.f32 %v1456_v59  ;;  %v1329_v6 = vmul.f32 1.442695, %v1260_v44  ;;  %v6377_v44 = vsub.f32 0.0, %v4252_v14  ;;  %v920_v61 = vsub.f32 0.0, %v912_v39 }
  0xde   : > { %v4324_v29 = vpop.eup %3410  ;;  %3426 = vpow2.f32 %v930_v0  ;;  %v1262_v59 = vsub.f32 0.0, %v1198_v8  ;;  %v1331_v0 = vmul.f32 1.442695, %v1261_v13  ;;  %v913_v8 = vand.u32 2147483647, %v4242_v63 }
  0xdf   : > { %v4335_v21 = vpop.eup %3412  ;;  %v1474_v35 = vadd.f32 1.0, %v4324_v29  ;;  %v1477_v62 = vmul.f32 -0.5, %v4324_v29  ;;  %v1202_v1 = vand.u32 2147483647, %v6375_v37  ;;  %v1480_v13 = vand.u32 2147483647, %v4324_v29 }
  0xe0   : > { %v1447_v31 = vadd.f32 1.0, %v4335_v21 }
  0xe1   : > { %v4273_v36 = vpop.xlane.xlu0 %716  ;;  %v4287_v38 = vpop.xlane.xlu1 %719  ;;  %3428 = vlog2.f32 %v1474_v35  ;;  %v1333_v35 = vmul.f32 1.442695, %v1262_v59  ;;  %v1450_v59 = vmul.f32 -0.5, %v4335_v21  ;;  %vm4402_vm4 = vcmp.lt.f32.partialorder %v1480_v13, 0.0004427343 }
  0xe2   : > { %3430 = vpow2.f32 %v932_v51  ;;  %v1265_v51 = vsub.f32 0.0, %v1201_v55  ;;  %v921_v55 = vsub.f32 0.0, %v913_v8  ;;  %v1478_v8 = vadd.f32 1.0, %v1477_v62 }
  0xe3   : > { %3432 = vlog2.f32 %v1447_v31  ;;  %v1335_v31 = vmul.f32 1.442695, %v1263_v58  ;;  %v1460_v58 = vadd.f32 1.0, %v1459_v23  ;;  %v1266_v23 = vsub.f32 0.0, %v1202_v1 }
  0xe4   : > { %v4339_v10 = vpop.eup %3414 }
  0xe5   : > { %v4280_v28 = vpop.xlane.xlu0 %722  ;;  %v4293_v27 = vpop.xlane.xlu1 %725  ;;  %v1465_v7 = vadd.f32 1.0, %v4339_v10  ;;  %v1468_v37 = vmul.f32 -0.5, %v4339_v10 }
  0xe6   : > { %v4357_v46 = vpop.eup %3416 }
  0xe7   : > { %6460 = vst [vmem:[#allocation27_spill] sm:$0xff] %v4357_v46  ;;  %3434 = vlog2.f32 %v1465_v7  ;;  %v938_v33 = vadd.f32 1.0, %v4357_v46  ;;  %v1337_v7 = vmul.f32 1.442695, %v1264_v60 }
  0xe8   : > { %3436 = vpow2.f32 %v1327_v56  ;;  %v1462_v56 = vand.u32 2147483647, %v4312_v11 }
  0xe9   : > { %v4285_v54 = vpop.xlane.xlu0 %728  ;;  %v4310_v4 = vpop.xlane.xlu1 %731  ;;  %3438 = vpow2.f32 %v1329_v6  ;;  %v1339_v6 = vmul.f32 1.442695, %v1265_v51  ;;  %v1451_v51 = vadd.f32 1.0, %v1450_v59  ;;  %v6491_v59 = vsub.f32 0.0, %v4266_v48 }
  0xea   : > { %3440 = vpow2.f32 %v1331_v0  ;;  %v1203_v0 = vand.u32 2147483647, %v6377_v44  ;;  %v1471_v44 = vand.u32 2147483647, %v4339_v10  ;;  %vm4397_vm3 = vcmp.lt.f32.partialorder %v1462_v56, 0.0004427343 }
  0xeb   : > { %3442 = vlog2.f32 %v938_v33  ;;  %v1469_v33 = vadd.f32 1.0, %v1468_v37  ;;  %v1479_v56 = vmul.f32 %v4324_v29, %v1478_v8  ;;  %v6481_v29 = vsub.f32 0.0, %v4262_v32 }
  0xec   : > { %3444 = vpow2.f32 %v1333_v35  ;;  %v1267_v62 = vsub.f32 0.0, %v1203_v0  ;;  %vm4422_vm6 = vcmp.lt.f32.partialorder %v1471_v44, 0.0004427343  ;;  %v6482_v8 = vsub.f32 0.0, %v4246_v5 }
  0xed   : > { %v4289_v45 = vpop.xlane.xlu0 %734  ;;  %v4345_v12 = vpop.xlane.xlu1 %737  ;;  %3446 = vpow2.f32 %v1335_v31  ;;  %v936_v31 = vmul.f32 1.442695, %v921_v55  ;;  %v1341_v55 = vmul.f32 1.442695, %v1266_v23  ;;  %v1470_v44 = vmul.f32 %v4339_v10, %v1469_v33 }
  0xee   : > { %6456 = vst [vmem:[#allocation25_spill] sm:$0xff] %v4345_v12  ;;  %3448 = vpow2.f32 %v1337_v7  ;;  %v1461_v7 = vmul.f32 %v4312_v11, %v1460_v58  ;;  %v4416_v11 = vmul.f32 %v4335_v21, %v1451_v51 }
  0xf1   : > { %v4298_v49 = vpop.xlane.xlu0 %740  ;;  %v4363_v18 = vpop.xlane.xlu1 %743 }
  0xf2   : > { %6449 = vst [vmem:[#allocation22_spill] sm:$0xff] %v4298_v49  ;;  %6462 = vst [vmem:[#allocation28_spill] sm:$0xff] %v4363_v18 }
  0xf5   : > { %v4329_v22 = vpop.xlane.xlu0 %746  ;;  %v4383_v60 = vpop.xlane.xlu1 %749 }
  0xf6   : > { %6453 = vst [vmem:[#allocation24_spill] sm:$0xff] %v4329_v22  ;;  %6466 = vst [vmem:[#allocation32_spill] sm:$0xff] %v4383_v60  ;;  %v1453_v22 = vand.u32 2147483647, %v4335_v21  ;;  %v4431_v21 = vmin.f32 %v6482_v8, 0.0  ;;  %v6486_v8 = vsub.f32 0.0, %v4244_v30 }
  0xf8   : > { %vm4418_vm5 = vcmp.lt.f32.partialorder %v1453_v22, 0.0004427343  ;;  %v1343_v22 = vmul.f32 1.442695, %v1267_v62  ;;  %v4453_v10 = vmin.f32 %v6486_v8, 0.0  ;;  %v6490_v8 = vsub.f32 0.0, %v4254_v15 }
  0xf9   : > { %v4355_v2 = vpop.xlane.xlu0 %752 }
  0xfa   : > { %6459 = vst [vmem:[#allocation26_spill] sm:$0xff] %v4355_v2  ;;  %v4375_v2 = vpop.eup %3418  ;;  %3450 = vpow2.f32 %v1339_v6  ;;  %v4413_v6 = vpop.xlane.xlu1 %755 }
  0xfb   : > { %6464 = vst [vmem:[#allocation30_spill] sm:$0xff] %v4375_v2  ;;  %v4379_v39 = vpop.eup %3420  ;;  %6476 = vst [vmem:[#allocation37_spill] sm:$0xff] %v4413_v6  ;;  %v6495_v6 = vsub.f32 0.0, %v4270_v50 }
  0xfc   : > { %6465 = vst [vmem:[#allocation31_spill] sm:$0xff] %v4379_v39  ;;  %v4387_v47 = vpop.eup %3422 }
  0xfd   : > { %v4370_v52 = vpop.xlane.xlu0 %758  ;;  %6467 = vst [vmem:[#allocation33_spill] sm:$0xff] %v4387_v47  ;;  %v3425_v35 = vpop.eup %3424 }
  0xfe   : > { %6463 = vst [vmem:[#allocation29_spill] sm:$0xff] %v4370_v52  ;;  %v934_v52 = vmul.f32 1.442695, %v920_v61  ;;  %v4395_v18 = vpop.eup %3426  ;;  %v1458_v63 = vmul.f32 0.6931472, %v3425_v35  ;;  %v6483_v35 = vsub.f32 0.0, %v4240_v16 }
  0xff   : > { %6469 = vst [vmem:[#allocation35_spill] sm:$0xff] %v4395_v18  ;;  %v3429_v1 = vpop.eup %3428  ;;  %v6386_v16 = vsub.f32 0.0, %v4260_v9  ;;  %v1208_v18 = vand.u32 2147483647, %v6495_v6 }
 0x100   : > { %3452 = vpow2.f32 %v934_v52  ;;  %v4406_v60 = vpop.eup %3430  ;;  %v1476_v58 = vmul.f32 0.6931472, %v3429_v1  ;;  %v4438_v51 = vmin.f32 %v6483_v35, 0.0  ;;  %v1464_v62 = vsel %vm4397_vm3, %v1461_v7, %v1458_v63  ;;  %v4466_v7 = vpop.xlane.xlu1 %761 }
 0x101   : > { %v4393_v2 = vpop.xlane.xlu0 %764  ;;  %6474 = vst [vmem:[#allocation36_spill] sm:$0xff] %v4406_v60  ;;  %v3433_v0 = vpop.eup %3432  ;;  %3454 = vpow2.f32 %v936_v31  ;;  %6488 = vst [vmem:[#allocation40_spill] sm:$0xff] %v4466_v7  ;;  %v1207_v15 = vand.u32 2147483647, %v6386_v16 }
 0x102   : > { %6468 = vst [vmem:[#allocation34_spill] sm:$0xff] %v4393_v2  ;;  %v6475_v2 = vsub.f32 0.0, %v4236_v40  ;;  %v1204_v40 = vand.u32 2147483647, %v6481_v29  ;;  %v3435_v52 = vpop.eup %3434  ;;  %v6484_v29 = vsub.f32 0.0, %v4250_v25  ;;  %3456 = vpow2.f32 %v1341_v55 }
 0x103   : > { %v4433_v23 = vpop.eup %3436  ;;  %v1449_v25 = vmul.f32 0.6931472, %v3433_v0  ;;  %v1482_v63 = vsel %vm4402_vm4, %v1479_v56, %v1476_v58  ;;  %v1467_v30 = vmul.f32 0.6931472, %v3435_v52  ;;  %3458 = vpow2.f32 %v1343_v22 }
 0x104   : > { %v4411_v47 = vmin.f32 %v6475_v2, 0.0  ;;  %v6383_v2 = vsub.f32 0.0, %v4256_v20  ;;  %v4442_v60 = vmin.f32 %v6484_v29, 0.0  ;;  %v4447_v5 = vpop.eup %3438  ;;  %v1268_v35 = vsub.f32 0.0, %v1204_v40  ;;  %v4516_v37 = vpop.xlane.xlu1 %767 }
 0x105   : > { %v4445_v31 = vpop.xlane.xlu0 %770  ;;  %v4456_v33 = vpop.eup %3440  ;;  %v1483_v61 = vadd.f32 1.0, %v4433_v23  ;;  %v4471_v0 = vsub.f32 %v1464_v62, %v4306_v57  ;;  %v1492_v40 = vadd.f32 1.0, %v4447_v5  ;;  %v1206_v56 = vand.u32 2147483647, %v6491_v59  ;;  %6498 = vst [vmem:[#allocation45_spill] sm:$0xff] %v4516_v37 }
 0x106   : > { %6485 = vst [vmem:[#allocation38_spill] sm:$0xff] %v4445_v31  ;;  %v1205_v29 = vand.u32 2147483647, %v6383_v2  ;;  %v4461_v31 = vpop.eup %3442  ;;  %v4476_v2 = vmin.f32 %v6490_v8, 0.0  ;;  %v1501_v58 = vadd.f32 1.0, %v4456_v33  ;;  %v6492_v22 = vsub.f32 0.0, %v4248_v17 }
 0x107   : > { %6487 = vst [vmem:[#allocation39_spill] sm:$0xff] %v4461_v31  ;;  %v4468_v55 = vpop.eup %3444  ;;  %6489 = vst [vmem:[#allocation41_spill] sm:$0xff] %v4471_v0  ;;  %v6493_v57 = vsub.f32 0.0, %v4258_v26  ;;  %v4496_v0 = vsub.f32 %v1482_v63, %v4314_v34  ;;  %v1345_v59 = vmul.f32 1.442695, %v1268_v35  ;;  %v1455_v26 = vsel %vm4418_vm5, %v4416_v11, %v1449_v25 }
 0x108   : > { %v4480_v52 = vpop.eup %3446  ;;  %v4485_v1 = vmin.f32 %v6492_v22, 0.0  ;;  %v1269_v7 = vsub.f32 0.0, %v1205_v29  ;;  %v1473_v22 = vsel %vm4422_vm6, %v1470_v44, %v1467_v30  ;;  %3460 = vlog2.f32 %v1483_v61 }
 0x109   : > { %v4489_v62 = vmin.f32 %v6493_v57, 0.0  ;;  %v4493_v8 = vpop.eup %3448  ;;  %6494 = vst [vmem:[#allocation42_spill] sm:$0xff] %v4496_v0  ;;  %v4500_v17 = vpop.xlane.xlu0 %776  ;;  %v1510_v57 = vadd.f32 1.0, %v4468_v55  ;;  %3462 = vlog2.f32 %v1492_v40  ;;  %v1519_v34 = vadd.f32 1.0, %v4480_v52 }
 0x10a   : > { %6496 = vst [vmem:[#allocation43_spill] sm:$0xff] %v4500_v17  ;;  %v4508_v16 = vpop.eup %3450  ;;  %v1270_v35 = vsub.f32 0.0, %v1206_v56  ;;  %v1486_v63 = vmul.f32 -0.5, %v4433_v23  ;;  %3464 = vlog2.f32 %v1501_v58  ;;  %v1528_v11 = vadd.f32 1.0, %v4493_v8 }
 0x10b   : > { %v1271_v13 = vsub.f32 0.0, %v1207_v15  ;;  %v6499_v44 = vsub.f32 0.0, %v4252_v14  ;;  %3466 = vpow2.f32 %v1345_v59  ;;  %v1347_v30 = vmul.f32 1.442695, %v1269_v7 }
 0x10c   : > { %v1272_v61 = vsub.f32 0.0, %v1208_v18  ;;  %v4523_v40 = vsub.f32 %v1455_v26, %v4316_v3  ;;  %v4526_v56 = vsub.f32 %v1473_v22, %v4318_v43  ;;  %3468 = vlog2.f32 %v1510_v57 }
 0x10d   : > { %v4512_v29 = vpop.eup %3452  ;;  %v4520_v25 = vmin.f32 %v6499_v44, 0.0  ;;  %v1537_v58 = vadd.f32 1.0, %v4508_v16  ;;  %v1495_v15 = vmul.f32 -0.5, %v4447_v5  ;;  %3470 = vlog2.f32 %v1519_v34  ;;  %v4534_v7 = vpop.xlane.xlu0 %782 }
 0x10e   : > { %6497 = vst [vmem:[#allocation44_spill] sm:$0xff] %v4512_v29  ;;  %6500 = vst [vmem:[#allocation46_spill] sm:$0xff] %v4523_v40  ;;  %v4529_v6 = vpop.eup %3454  ;;  %v1349_v14 = vmul.f32 1.442695, %v1270_v35  ;;  %v6503_v44 = vsub.f32 0.0, %v4264_v42  ;;  %v1487_v18 = vadd.f32 1.0, %v1486_v63  ;;  %3472 = vlog2.f32 %v1528_v11 }
 0x10f   : > { %6501 = vst [vmem:[#allocation47_spill] sm:$0xff] %v4526_v56  ;;  %6502 = vst [vmem:[#allocation48_spill] sm:$0xff] %v4529_v6  ;;  %v1351_v3 = vmul.f32 1.442695, %v1271_v13  ;;  %v4537_v26 = vpop.eup %3456  ;;  %v1489_v22 = vand.u32 2147483647, %v4433_v23  ;;  %3474 = vpow2.f32 %v1347_v30  ;;  %v4550_v13 = vpop.xlane.xlu1 %773 }
 0x110   : > { %v1209_v59 = vand.u32 2147483647, %v6503_v44  ;;  %6504 = vst [vmem:[#allocation49_spill] sm:$0xff] %v4534_v7  ;;  %v1504_v57 = vmul.f32 -0.5, %v4456_v33  ;;  %v1353_v17 = vmul.f32 1.442695, %v1272_v61  ;;  %3476 = vlog2.f32 %v1537_v58  ;;  %v4552_v43 = vpop.eup %3458 }
 0x111   : > { %v1498_v34 = vand.u32 2147483647, %v4447_v5  ;;  %v6505_v35 = vsub.f32 0.0, %v4262_v32  ;;  %v6506_v63 = vsub.f32 0.0, %v4256_v20  ;;  %6507 = vst [vmem:[#allocation50_spill] sm:$0xff] %v4550_v13  ;;  %v1496_v7 = vadd.f32 1.0, %v1495_v15 }
 0x112   : > { %v1513_v0 = vmul.f32 -0.5, %v4468_v55  ;;  %3478 = vpow2.f32 %v1349_v14  ;;  %v1273_v30 = vsub.f32 0.0, %v1209_v59  ;;  %v4556_v61 = vmul.f32 %v4433_v23, %v1487_v18  ;;  %v4567_v14 = vpop.xlane.xlu0 %788 }
 0x113   : > { %v4544_v44 = vmin.f32 %v6505_v35, 0.0  ;;  %v4548_v11 = vmin.f32 %v6506_v63, 0.0  ;;  %v1546_v32 = vadd.f32 1.0, %v4537_v26  ;;  %3480 = vpow2.f32 %v1351_v3  ;;  %6511 = vst [vmem:[#allocation51_spill] sm:$0xff] %v4567_v14  ;;  %v4585_v29 = vpop.xlane.xlu1 %779 }
 0x114   : > { %v6508_v58 = vsub.f32 0.0, %v4277_v24  ;;  %vm4561_vm7 = vcmp.lt.f32.partialorder %v1489_v22, 0.0004427343  ;;  %v1505_v63 = vadd.f32 1.0, %v1504_v57  ;;  %v1522_v15 = vmul.f32 -0.5, %v4480_v52  ;;  %6516 = vst [vmem:[#allocation53_spill] sm:$0xff] %v4585_v29 }
 0x115   : > { %v1531_v13 = vmul.f32 -0.5, %v4493_v8  ;;  %3482 = vpow2.f32 %v1353_v17  ;;  %vm4569_vm8 = vcmp.lt.f32.partialorder %v1498_v34, 0.0004427343  ;;  %v1507_v59 = vand.u32 2147483647, %v4456_v33  ;;  %v3461_v57 = vpop.eup %3460 }
 0x116   : > { %v1210_v20 = vand.u32 2147483647, %v6508_v58  ;;  %v1555_v18 = vadd.f32 1.0, %v4552_v43  ;;  %v6514_v3 = vsub.f32 0.0, %v4266_v48  ;;  %v4580_v58 = vmul.f32 %v4447_v5, %v1496_v7  ;;  %v3463_v34 = vpop.eup %3462 }
 0x117   : > { %v1514_v37 = vadd.f32 1.0, %v1513_v0  ;;  %v1516_v17 = vand.u32 2147483647, %v4468_v55  ;;  %v1355_v14 = vmul.f32 1.442695, %v1273_v30  ;;  %v1540_v40 = vmul.f32 -0.5, %v4508_v16  ;;  %v3465_v48 = vpop.eup %3464 }
 0x118   : > { %v4577_v22 = vmin.f32 %v6514_v3, 0.0  ;;  %v1525_v56 = vand.u32 2147483647, %v4480_v52  ;;  %3484 = vlog2.f32 %v1546_v32  ;;  %v1274_v6 = vsub.f32 0.0, %v1210_v20  ;;  %v4591_v7 = vpop.eup %3466 }
 0x119   : > { %v4588_v3 = vmul.f32 %v4456_v33, %v1505_v63  ;;  %v1523_v41 = vadd.f32 1.0, %v1522_v15  ;;  %v1532_v5 = vadd.f32 1.0, %v1531_v13  ;;  %v1549_v0 = vmul.f32 -0.5, %v4537_v26  ;;  %v3469_v29 = vpop.eup %3468  ;;  %v4605_v15 = vpop.xlane.xlu0 %794 }
 0x11a   : > { %6515 = vst [vmem:[#allocation52_spill] sm:$0xff] %v4577_v22  ;;  %v1485_v30 = vmul.f32 0.6931472, %v3461_v57  ;;  %vm4593_vm9 = vcmp.lt.f32.partialorder %v1507_v59, 0.0004427343  ;;  %3486 = vlog2.f32 %v1555_v18  ;;  %v1558_v13 = vmul.f32 -0.5, %v4552_v43  ;;  %v3471_v59 = vpop.eup %3470 }
 0x11b   : > { %v1534_v32 = vand.u32 2147483647, %v4493_v8  ;;  %v1494_v31 = vmul.f32 0.6931472, %v3463_v34  ;;  %vm4599_vm10 = vcmp.lt.f32.partialorder %v1516_v17, 0.0004427343  ;;  %3488 = vpow2.f32 %v1355_v14  ;;  %v3473_v49 = vpop.eup %3472 }
 0x11c   : > { %6521 = vst [vmem:[#allocation54_spill] sm:$0xff] %v4605_v15  ;;  %v1515_v57 = vmul.f32 %v4468_v55, %v1514_v37  ;;  %vm4608_vm11 = vcmp.lt.f32.partialorder %v1525_v56, 0.0004427343  ;;  %v1541_v20 = vadd.f32 1.0, %v1540_v40  ;;  %v1543_v17 = vand.u32 2147483647, %v4508_v16  ;;  %v4618_v12 = vpop.eup %3474 }
 0x11d   : > { %v1357_v34 = vmul.f32 1.442695, %v1274_v6  ;;  %v1524_v46 = vmul.f32 %v4480_v52, %v1523_v41  ;;  %v4615_v14 = vmul.f32 %v4493_v8, %v1532_v5  ;;  %v1550_v63 = vadd.f32 1.0, %v1549_v0  ;;  %v4627_v41 = vpop.xlane.xlu1 %785  ;;  %v3477_v52 = vpop.eup %3476 }
 0x11e   : > { %v1564_v15 = vadd.f32 1.0, %v4591_v7  ;;  %v1491_v55 = vsel %vm4561_vm7, %v4556_v61, %v1485_v30  ;;  %v1552_v37 = vand.u32 2147483647, %v4537_v26  ;;  %v6524_v40 = vsub.f32 0.0, %v4268_v53  ;;  %6525 = vst [vmem:[#allocation55_spill] sm:$0xff] %v4627_v41 }
 0x11f   : > { %v1500_v8 = vsel %vm4569_vm8, %v4580_v58, %v1494_v31  ;;  %v1503_v5 = vmul.f32 0.6931472, %v3465_v48  ;;  %vm4632_vm12 = vcmp.lt.f32.partialorder %v1534_v32, 0.0004427343  ;;  %v1559_v61 = vadd.f32 1.0, %v1558_v13  ;;  %v4638_v22 = vpop.eup %3478 }
 0x120   : > { %v1211_v6 = vand.u32 2147483647, %v6524_v40  ;;  %v6528_v35 = vsub.f32 0.0, %v4282_v19  ;;  %v1512_v40 = vmul.f32 0.6931472, %v3469_v29  ;;  %v4641_v56 = vmul.f32 %v4508_v16, %v1541_v20  ;;  %v4648_v23 = vpop.eup %3480  ;;  %v4654_v29 = vpop.xlane.xlu0 %800 }
 0x121   : > { %vm4643_vm13 = vcmp.lt.f32.partialorder %v1543_v17, 0.0004427343  ;;  %v1561_v31 = vand.u32 2147483647, %v4552_v43  ;;  %3490 = vpow2.f32 %v1357_v34  ;;  %v1521_v58 = vmul.f32 0.6931472, %v3471_v59 }
 0x122   : > { %v1212_v30 = vand.u32 2147483647, %v6528_v35  ;;  %v4651_v48 = vmul.f32 %v4537_v26, %v1550_v63  ;;  %3492 = vlog2.f32 %v1564_v15  ;;  %v1573_v32 = vadd.f32 1.0, %v4618_v12  ;;  %6531 = vst [vmem:[#allocation56_spill] sm:$0xff] %v4654_v29  ;;  %v4656_v16 = vpop.eup %3482 }
 0x123   : > { %v4659_v20 = vsub.f32 %v1491_v55, %v4411_v47  ;;  %v4662_v13 = vsub.f32 %v1500_v8, %v4431_v21  ;;  %v1275_v17 = vsub.f32 0.0, %v1211_v6  ;;  %v6532_v34 = vsub.f32 0.0, %v4273_v36 }
 0x124   : > { %v1509_v26 = vsel %vm4593_vm9, %v4588_v3, %v1503_v5  ;;  %vm4669_vm14 = vcmp.lt.f32.partialorder %v1552_v37, 0.0004427343  ;;  %v4674_v15 = vmul.f32 %v4552_v43, %v1559_v61  ;;  %v1582_v47 = vadd.f32 1.0, %v4638_v22  ;;  %v4684_v3 = vpop.xlane.xlu1 %791 }
 0x125   : > { %v1213_v59 = vand.u32 2147483647, %v6532_v34  ;;  %v1276_v55 = vsub.f32 0.0, %v1212_v30  ;;  %v1518_v21 = vsel %vm4599_vm10, %v1515_v57, %v1512_v40  ;;  %v1530_v6 = vmul.f32 0.6931472, %v3473_v49  ;;  %6536 = vst [vmem:[#allocation57_spill] sm:$0xff] %v4684_v3  ;;  %v3485_v37 = vpop.eup %3484 }
 0x126   : > { %v1591_v8 = vadd.f32 1.0, %v4648_v23  ;;  %v6535_v35 = vsub.f32 0.0, %v4260_v9  ;;  %v1527_v43 = vsel %vm4608_vm11, %v1524_v46, %v1521_v58  ;;  %v1539_v5 = vmul.f32 0.6931472, %v3477_v52 }
 0x127   : > { %vm4688_vm15 = vcmp.lt.f32.partialorder %v1561_v31, 0.0004427343  ;;  %3494 = vlog2.f32 %v1573_v32  ;;  %v1600_v49 = vadd.f32 1.0, %v4656_v16  ;;  %v4694_v33 = vsub.f32 %v1509_v26, %v4438_v51  ;;  %v3487_v34 = vpop.eup %3486  ;;  %v4704_v31 = vpop.xlane.xlu0 %806 }
 0x128   : > { %v4682_v39 = vmin.f32 %v6535_v35, 0.0  ;;  %v6539_v9 = vsub.f32 0.0, %v4270_v50  ;;  %v1359_v30 = vmul.f32 1.442695, %v1275_v17  ;;  %v1277_v40 = vsub.f32 0.0, %v1213_v59  ;;  %6540 = vst [vmem:[#allocation58_spill] sm:$0xff] %v4704_v31  ;;  %v4706_v58 = vpop.eup %3488 }
 0x129   : > { %v4701_v46 = vsub.f32 %v1518_v21, %v4442_v60  ;;  %v1567_v18 = vmul.f32 -0.5, %v4591_v7  ;;  %3496 = vlog2.f32 %v1582_v47  ;;  %v1361_v52 = vmul.f32 1.442695, %v1276_v55  ;;  %v4720_v55 = vpop.xlane.xlu1 %797  ;;  %v6587_v31 = vld [vmem:[#allocation14_spill] sm:$0xff] }
 0x12a   : > { %v4698_v57 = vmin.f32 %v6539_v9, 0.0  ;;  %v4709_v51 = vsub.f32 %v1527_v43, %v4453_v10  ;;  %v1536_v50 = vsel %vm4632_vm12, %v4615_v14, %v1530_v6  ;;  %v1548_v32 = vmul.f32 0.6931472, %v3485_v37  ;;  %6541 = vst [vmem:[#allocation59_spill] sm:$0xff] %v4720_v55 }
 0x12b   : > { %3498 = vlog2.f32 %v1591_v8  ;;  %v1545_v60 = vsel %vm4643_vm13, %v4641_v56, %v1539_v5  ;;  %v1570_v17 = vand.u32 2147483647, %v4591_v7  ;;  %v6401_v59 = vsub.f32 0.0, %v4287_v38  ;;  %v4750_v63 = vpop.xlane.xlu0 %812 }
 0x12c   : > { %3500 = vlog2.f32 %v1600_v49  ;;  %v1557_v26 = vmul.f32 0.6931472, %v3487_v34  ;;  %v1363_v47 = vmul.f32 1.442695, %v1277_v40  ;;  %v6400_v10 = vsub.f32 0.0, %v4280_v28  ;;  %6546 = vst [vmem:[#allocation60_spill] sm:$0xff] %v4750_v63 }
 0x12d   : > { %3502 = vpow2.f32 %v1359_v30  ;;  %v1568_v0 = vadd.f32 1.0, %v1567_v18  ;;  %v1609_v14 = vadd.f32 1.0, %v4706_v58  ;;  %v6542_v21 = vsub.f32 0.0, %v4264_v42  ;;  %v6577_v63 = vld [vmem:[#allocation27_spill] sm:$0xff] }
 0x12e   : > { %3504 = vpow2.f32 %v1361_v52  ;;  %v4728_v56 = vsub.f32 %v1536_v50, %v4476_v2  ;;  %v1554_v41 = vsel %vm4669_vm14, %v4651_v48, %v1548_v32  ;;  %v1576_v8 = vmul.f32 -0.5, %v4618_v12  ;;  %v4738_v43 = vpop.eup %3490  ;;  %v4769_v32 = vpop.xlane.xlu1 %803 }
 0x12f   : > { %v4725_v6 = vmin.f32 %v6542_v21, 0.0  ;;  %v6543_v35 = vsub.f32 0.0, %v4277_v24  ;;  %v4741_v42 = vsub.f32 %v1545_v60, %v4485_v1  ;;  %vm4743_vm0 = vcmp.lt.f32.partialorder %v1570_v17, 0.0004427343  ;;  %v3493_v49 = vpop.eup %3492  ;;  %6548 = vst [vmem:[#allocation61_spill] sm:$0xff] %v4769_v32 }
 0x130   : > { %v1579_v2 = vand.u32 2147483647, %v4618_v12  ;;  %v1214_v48 = vand.u32 2147483647, %v6401_v59  ;;  %v1563_v24 = vsel %vm4688_vm15, %v4674_v15, %v1557_v26  ;;  %v1585_v9 = vmul.f32 -0.5, %v4638_v22 }
 0x131   : > { %v4736_v37 = vmin.f32 %v6543_v35, 0.0  ;;  %3506 = vpow2.f32 %v1363_v47  ;;  %v1215_v1 = vand.u32 2147483647, %v6400_v10  ;;  %v4759_v30 = vsub.f32 %v1554_v41, %v4489_v62 }
 0x132   : > { %v1569_v40 = vmul.f32 %v4591_v7, %v1568_v0  ;;  %v1594_v34 = vmul.f32 -0.5, %v4648_v23  ;;  %3508 = vlog2.f32 %v1609_v14  ;;  %v1577_v18 = vadd.f32 1.0, %v1576_v8  ;;  %v4803_v5 = vpop.xlane.xlu1 %809 }
 0x133   : > { %v1603_v52 = vmul.f32 -0.5, %v4656_v16  ;;  %v1618_v61 = vadd.f32 1.0, %v4738_v43  ;;  %v6547_v15 = vsub.f32 0.0, %v4268_v53  ;;  %v4772_v60 = vsub.f32 %v1563_v24, %v4520_v25  ;;  %6557 = vst [vmem:[#allocation63_spill] sm:$0xff] %v4803_v5 }
 0x134   : > { %v1566_v62 = vmul.f32 0.6931472, %v3493_v49  ;;  %v1588_v7 = vand.u32 2147483647, %v4638_v22  ;;  %v1278_v17 = vsub.f32 0.0, %v1214_v48  ;;  %v3495_v26 = vpop.eup %3494  ;;  %v1586_v0 = vadd.f32 1.0, %v1585_v9  ;;  %v4786_v49 = vpop.xlane.xlu0 %818 }
 0x135   : > { %v4767_v50 = vmin.f32 %v6547_v15, 0.0  ;;  %vm4775_vm1 = vcmp.lt.f32.partialorder %v1579_v2, 0.0004427343  ;;  %v1597_v14 = vand.u32 2147483647, %v4648_v23  ;;  %v1279_v53 = vsub.f32 0.0, %v1215_v1 }
 0x136   : > { %v1595_v21 = vadd.f32 1.0, %v1594_v34  ;;  %v1606_v41 = vand.u32 2147483647, %v4656_v16  ;;  %v1612_v8 = vmul.f32 -0.5, %v4706_v58  ;;  %v6551_v25 = vsub.f32 0.0, %v4282_v19  ;;  %6552 = vst [vmem:[#allocation62_spill] sm:$0xff] %v4786_v49  ;;  %v3497_v48 = vpop.eup %3496 }
 0x137   : > { %v1578_v2 = vmul.f32 %v4618_v12, %v1577_v18  ;;  %v1604_v24 = vadd.f32 1.0, %v1603_v52  ;;  %3510 = vlog2.f32 %v1618_v61  ;;  %v866_v9 = vsub.f32 0.0, %v4293_v27 }
 0x138   : > { %v4784_v35 = vmin.f32 %v6551_v25, 0.0  ;;  %v3499_v15 = vpop.eup %3498  ;;  %v1572_v1 = vsel %vm4743_vm0, %v1569_v40, %v1566_v62  ;;  %v1575_v34 = vmul.f32 0.6931472, %v3495_v26  ;;  %vm4792_vm2 = vcmp.lt.f32.partialorder %v1588_v7, 0.0004427343 }
 0x139   : > { %v1621_v19 = vmul.f32 -0.5, %v4738_v43  ;;  %v1365_v25 = vmul.f32 1.442695, %v1278_v17  ;;  %v3501_v59 = vpop.eup %3500  ;;  %v1587_v49 = vmul.f32 %v4638_v22, %v1586_v0  ;;  %vm4798_vm3 = vcmp.lt.f32.partialorder %v1597_v14, 0.0004427343 }
 0x13a   : > { %v1615_v27 = vand.u32 2147483647, %v4706_v58  ;;  %v1367_v18 = vmul.f32 1.442695, %v1279_v53  ;;  %v4805_v40 = vpop.eup %3502  ;;  %v1596_v52 = vmul.f32 %v4648_v23, %v1595_v21  ;;  %vm4808_vm4 = vcmp.lt.f32.partialorder %v1606_v41, 0.0004427343 }
 0x13b   : > { %v1613_v62 = vadd.f32 1.0, %v1612_v8  ;;  %v6560_v22 = vsub.f32 0.0, %v4273_v36  ;;  %v4816_v17 = vpop.eup %3504  ;;  %v4819_v26 = vsub.f32 %v1572_v1, %v4544_v44  ;;  %v1605_v0 = vmul.f32 %v4656_v16, %v1604_v24  ;;  %v4825_v8 = vpop.xlane.xlu0 %824 }
 0x13c   : > { %v1216_v14 = vand.u32 2147483647, %v866_v9  ;;  %v867_v53 = vsub.f32 0.0, %v4285_v54  ;;  %v1581_v23 = vsel %vm4775_vm1, %v1578_v2, %v1575_v34  ;;  %v1584_v21 = vmul.f32 0.6931472, %v3497_v48  ;;  %6562 = vst [vmem:[#allocation65_spill] sm:$0xff] %v4825_v8 }
 0x13d   : > { %v4814_v7 = vmin.f32 %v6560_v22, 0.0  ;;  %6561 = vst [vmem:[#allocation64_spill] sm:$0xff] %v4819_v26  ;;  %v1622_v41 = vadd.f32 1.0, %v1621_v19  ;;  %3512 = vpow2.f32 %v1365_v25  ;;  %v1593_v36 = vmul.f32 0.6931472, %v3499_v15 }
 0x13e   : > { %v1602_v22 = vmul.f32 0.6931472, %v3501_v59  ;;  %vm4827_vm5 = vcmp.lt.f32.partialorder %v1615_v27, 0.0004427343  ;;  %v1627_v44 = vadd.f32 1.0, %v4805_v40  ;;  %3514 = vpow2.f32 %v1367_v18  ;;  %v4832_v16 = vpop.eup %3506  ;;  %v4846_v27 = vpop.xlane.xlu1 %815 }
 0x13f   : > { %v1614_v54 = vmul.f32 %v4706_v58, %v1613_v62  ;;  %v1624_v47 = vand.u32 2147483647, %v4738_v43  ;;  %v1630_v48 = vmul.f32 -0.5, %v4805_v40  ;;  %v1636_v2 = vadd.f32 1.0, %v4816_v17  ;;  %v3509_v24 = vpop.eup %3508  ;;  %6567 = vst [vmem:[#allocation66_spill] sm:$0xff] %v4846_v27 }
 0x140   : > { %v6565_v59 = vsub.f32 0.0, %v4287_v38  ;;  %v6566_v1 = vsub.f32 0.0, %v4280_v28  ;;  %v1280_v19 = vsub.f32 0.0, %v1216_v14  ;;  %v1217_v25 = vand.u32 2147483647, %v867_v53 }
 0x141   : > { %v4849_v58 = vsub.f32 %v1581_v23, %v4548_v11  ;;  %v4852_v18 = vmul.f32 %v4738_v43, %v1622_v41  ;;  %v1639_v62 = vmul.f32 -0.5, %v4816_v17  ;;  %v4855_v8 = vmin.f32 %v866_v9, 0.0  ;;  %v4868_v23 = vpop.xlane.xlu0 %830 }
 0x142   : > { %v4840_v15 = vmin.f32 %v6565_v59, 0.0  ;;  %v4844_v34 = vmin.f32 %v6566_v1, 0.0  ;;  %v1590_v38 = vsel %vm4792_vm2, %v1587_v49, %v1584_v21  ;;  %v1599_v28 = vsel %vm4798_vm3, %v1596_v52, %v1593_v36  ;;  %6571 = vst [vmem:[#allocation68_spill] sm:$0xff] %v4868_v23 }
 0x143   : > { %6568 = vst [vmem:[#allocation67_spill] sm:$0xff] %v4849_v58  ;;  %v1608_v14 = vsel %vm4808_vm4, %v1605_v0, %v1602_v22  ;;  %3516 = vlog2.f32 %v1627_v44  ;;  %v1611_v59 = vmul.f32 0.6931472, %v3509_v24  ;;  %vm4863_vm6 = vcmp.lt.f32.partialorder %v1624_v47, 0.0004427343  ;;  %v6572_v0 = vld [vmem:[#allocation52_spill] sm:$0xff] }
 0x144   : > { %v1631_v43 = vadd.f32 1.0, %v1630_v48  ;;  %3518 = vlog2.f32 %v1636_v2  ;;  %v1645_v9 = vadd.f32 1.0, %v4832_v16  ;;  %v1369_v10 = vmul.f32 1.442695, %v1280_v19  ;;  %v3511_v61 = vpop.eup %3510  ;;  %v6574_v22 = vld [vmem:[#allocation25_spill] sm:$0xff] }
 0x145   : > { %v1281_v49 = vsub.f32 0.0, %v1217_v25  ;;  %v868_v12 = vsub.f32 0.0, %v4310_v4  ;;  %v869_v52 = vsub.f32 0.0, %v4289_v45  ;;  %v4873_v21 = vsub.f32 %v1590_v38, %v6572_v0  ;;  %v4886_v45 = vpop.xlane.xlu1 %821 }
 0x146   : > { %v1640_v41 = vadd.f32 1.0, %v1639_v62  ;;  %v4875_v36 = vmin.f32 %v867_v53, 0.0  ;;  %v6407_v44 = vsub.f32 0.0, %v6574_v22  ;;  %v4879_v47 = vsub.f32 %v1599_v28, %v4682_v39  ;;  %6575 = vst [vmem:[#allocation25_spill] sm:$0xff] %v4886_v45  ;;  %v4898_v28 = vpop.xlane.xlu0 %836 }
 0x147   : > { %6573 = vst [vmem:[#allocation52_spill] sm:$0xff] %v4873_v21  ;;  %v4882_v48 = vsub.f32 %v1608_v14, %v4698_v57  ;;  %v1633_v2 = vand.u32 2147483647, %v4805_v40  ;;  %v1648_v4 = vmul.f32 -0.5, %v4832_v16  ;;  %v1617_v24 = vsel %vm4827_vm5, %v1614_v54, %v1611_v59  ;;  %6576 = vst [vmem:[#allocation69_spill] sm:$0xff] %v4898_v28  ;;  %v6581_v28 = vld [vmem:[#allocation31_spill] sm:$0xff] }
 0x148   : > { %v4891_v53 = vmul.f32 %v4805_v40, %v1631_v43  ;;  %v1642_v1 = vand.u32 2147483647, %v4816_v17  ;;  %3520 = vlog2.f32 %v1645_v9  ;;  %v1620_v39 = vmul.f32 0.6931472, %v3511_v61  ;;  %v6579_v9 = vld [vmem:[#allocation22_spill] sm:$0xff] }
 0x149   : > { %3522 = vpow2.f32 %v1369_v10  ;;  %v1371_v19 = vmul.f32 1.442695, %v1281_v49  ;;  %v1218_v57 = vand.u32 2147483647, %v868_v12  ;;  %v4895_v25 = vmul.f32 %v4816_v17, %v1640_v41  ;;  %v6580_v49 = vld [vmem:[#allocation39_spill] sm:$0xff] }
 0x14a   : > { %v1651_v62 = vand.u32 2147483647, %v4832_v16  ;;  %v1219_v38 = vand.u32 2147483647, %v869_v52  ;;  %v941_v54 = vmul.f32 -0.5, %v6577_v63  ;;  %v4901_v14 = vpop.eup %3512  ;;  %v4904_v40 = vsub.f32 %v1617_v24, %v4725_v6  ;;  %v4917_v24 = vpop.xlane.xlu1 %827 }
 0x14b   : > { %v1649_v59 = vadd.f32 1.0, %v1648_v4  ;;  %v1220_v43 = vand.u32 2147483647, %v6407_v44  ;;  %v871_v10 = vsub.f32 0.0, %v6579_v9  ;;  %v4909_v17 = vpop.eup %3514  ;;  %v940_v61 = vmul.f32 0.6931472, %v6580_v49 }
 0x14c   : > { %6578 = vst [vmem:[#allocation27_spill] sm:$0xff] %v4904_v40  ;;  %v942_v0 = vadd.f32 1.0, %v941_v54  ;;  %v944_v41 = vand.u32 2147483647, %v6577_v63  ;;  %v947_v23 = vadd.f32 1.0, %v6581_v28  ;;  %v1626_v6 = vsel %vm4863_vm6, %v4852_v18, %v1620_v39  ;;  %6582 = vst [vmem:[#allocation22_spill] sm:$0xff] %v4917_v24 }
 0x14d   : > { %3524 = vpow2.f32 %v1371_v19  ;;  %v1282_v4 = vsub.f32 0.0, %v1218_v57  ;;  %vm4919_vm7 = vcmp.lt.f32.partialorder %v1633_v2, 0.0004427343  ;;  %v1654_v9 = vadd.f32 1.0, %v4901_v14  ;;  %v6597_v44 = vld [vmem:[#allocation30_spill] sm:$0xff] }
 0x14e   : > { %v1657_v54 = vmul.f32 -0.5, %v4901_v14  ;;  %v1283_v49 = vsub.f32 0.0, %v1219_v38  ;;  %v943_v45 = vmul.f32 %v6577_v63, %v942_v0  ;;  %v3722_v27 = vmov 0   ;;  %v1033_v0 = vpop.permute.xlu0 %1032 }
 0x14f   : > { %3406 = vset.pattern.permute.xlu1 %v3722_v27  ;;  %3405 = vset.pattern.permute.xlu0 %v3722_v27  ;;  %vm4926_vm8 = vcmp.lt.f32.partialorder %v1642_v1, 0.0004427343  ;;  %v1666_v11 = vmul.f32 -0.5, %v4909_v17  ;;  %v1284_v2 = vsub.f32 0.0, %v1220_v43  ;;  %vm945_vm9 = vcmp.lt.f32.partialorder %v944_v41, 0.0004427343 }
 0x150   : > { %3526 = vlog2.f32 %v947_v23  ;;  %v3517_v39 = vpop.eup %3516  ;;  %v4932_v19 = vmul.f32 %v4832_v16, %v1649_v59  ;;  %v1663_v57 = vadd.f32 1.0, %v4909_v17  ;;  %v1221_v38 = vand.u32 2147483647, %v871_v10 }
 0x151   : > { %v946_v63 = vsel %vm945_vm9, %v943_v45, %v940_v61  ;;  %v3519_v24 = vpop.eup %3518  ;;  %v1373_v27 = vmul.f32 1.442695, %v1282_v4  ;;  %v4935_v1 = vmin.f32 %v868_v12, 0.0  ;;  %v4937_v5 = vmin.f32 %v869_v52, 0.0  ;;  %v4948_v12 = vpop.xlane.xlu1 %833 }
 0x152   : > { %v6588_v32 = vmin.f32 %v6587_v31, 0.0  ;;  %v4942_v23 = vsub.f32 %v1626_v6, %v4736_v37  ;;  %3528 = vlog2.f32 %v1654_v9  ;;  %v1658_v16 = vadd.f32 1.0, %v1657_v54  ;;  %6592 = vst [vmem:[#allocation31_spill] sm:$0xff] %v4948_v12  ;;  %v6595_v54 = vld [vmem:[#allocation35_spill] sm:$0xff] }
 0x153   : > { %v1375_v59 = vmul.f32 1.442695, %v1283_v49  ;;  %v1629_v41 = vmul.f32 0.6931472, %v3517_v39  ;;  %vm4944_vm10 = vcmp.lt.f32.partialorder %v1651_v62, 0.0004427343  ;;  %3530 = vlog2.f32 %v1663_v57 }
 0x154   : > { %v1018_v43 = vsub.f32 %v946_v63, %v6588_v32  ;;  %6589 = vst [vmem:[#allocation39_spill] sm:$0xff] %v4942_v23  ;;  %v1667_v45 = vadd.f32 1.0, %v1666_v11  ;;  %v1377_v61 = vmul.f32 1.442695, %v1284_v2  ;;  %v1638_v4 = vmul.f32 0.6931472, %v3519_v24 }
 0x155   : > { %v1285_v31 = vsub.f32 0.0, %v1221_v38  ;;  %v6593_v32 = vld [vmem:[#allocation28_spill] sm:$0xff]  ;;  %v3521_v37 = vpop.eup %3520  ;;  %3532 = vpow2.f32 %v1373_v27  ;;  %v6594_v6 = vsub.f32 0.0, %v6574_v22  ;;  %v950_v62 = vmul.f32 -0.5, %v6581_v28 }
 0x156   : > { %v1091_v52 = vmul.f32 %v1033_v0, %v1018_v43  ;;  %v872_v63 = vsub.f32 0.0, %v6593_v32  ;;  %v974_v49 = vadd.f32 1.0, %v6595_v54  ;;  %v4957_v11 = vpop.eup %3522  ;;  %v4960_v2 = vmul.f32 %v4901_v14, %v1658_v16  ;;  %v6600_v32 = vld [vmem:[#allocation26_spill] sm:$0xff] }
 0x157   : > { %v4953_v9 = vmin.f32 %v6594_v6, 0.0  ;;  %v1660_v24 = vand.u32 2147483647, %v4901_v14  ;;  %v1669_v39 = vand.u32 2147483647, %v4909_v17  ;;  %3534 = vpow2.f32 %v1375_v59  ;;  %v4976_v59 = vpop.xlane.xlu1 %839 }
 0x158   : > { %1108 = vperm.xlu0 %3405, %v1091_v52   ;;  %v1635_v22 = vsel %vm4919_vm7, %v4891_v53, %v1629_v41  ;;  %v4968_v57 = vmul.f32 %v4909_v17, %v1667_v45  ;;  %3536 = vpow2.f32 %v1377_v61  ;;  %v4970_v38 = vmin.f32 %v871_v10, 0.0  ;;  %6596 = vst [vmem:[#allocation14_spill] sm:$0xff] %v4976_v59  ;;  %v6598_v41 = vld [vmem:[#allocation24_spill] sm:$0xff] }
 0x159   : > { %v1644_v0 = vsel %vm4926_vm8, %v4895_v25, %v1638_v4  ;;  %v1647_v27 = vmul.f32 0.6931472, %v3521_v37  ;;  %v1379_v43 = vmul.f32 1.442695, %v1285_v31  ;;  %v1222_v14 = vand.u32 2147483647, %v872_v63 }
 0x15a   : > { %v1675_v16 = vmul.f32 -0.5, %v4957_v11  ;;  %v951_v52 = vadd.f32 1.0, %v950_v62  ;;  %3538 = vlog2.f32 %v974_v49  ;;  %v956_v53 = vadd.f32 1.0, %v6597_v44  ;;  %v4979_v17 = vpop.eup %3524  ;;  %v6599_v45 = vld [vmem:[#allocation32_spill] sm:$0xff] }
 0x15b   : > { %v873_v10 = vsub.f32 0.0, %v6598_v41  ;;  %v874_v61 = vsub.f32 0.0, %v6599_v45  ;;  %v875_v18 = vsub.f32 0.0, %v6600_v32  ;;  %v953_v25 = vand.u32 2147483647, %v6581_v28  ;;  %v6603_v37 = vld [vmem:[#allocation44_spill] sm:$0xff] }
 0x15c   : > { %v4986_v4 = vsub.f32 %v1635_v22, %v4767_v50  ;;  %v4989_v31 = vsub.f32 %v1644_v0, %v4784_v35  ;;  %3540 = vlog2.f32 %v956_v53  ;;  %v992_v6 = vadd.f32 1.0, %v6603_v37 }
 0x15d   : > { %v3527_v62 = vpop.eup %3526  ;;  %v1653_v49 = vsel %vm4944_vm10, %v4932_v19, %v1647_v27  ;;  %v1672_v41 = vadd.f32 1.0, %v4957_v11  ;;  %v1286_v32 = vsub.f32 0.0, %v1222_v14  ;;  %v1676_v59 = vadd.f32 1.0, %v1675_v16  ;;  %v1040_v16 = vpop.permute.xlu1 %1039 }
 0x15e   : > { %6601 = vst [vmem:[#allocation28_spill] sm:$0xff] %v4986_v4  ;;  %6602 = vst [vmem:[#allocation35_spill] sm:$0xff] %v4989_v31  ;;  %3542 = vpow2.f32 %v1379_v43  ;;  %v949_v50 = vmul.f32 0.6931472, %v3527_v62  ;;  %v952_v22 = vmul.f32 %v6581_v28, %v951_v52  ;;  %v1681_v35 = vadd.f32 1.0, %v4979_v17  ;;  %v6607_v52 = vld [vmem:[#allocation15_spill] sm:$0xff] }
 0x15f   : > { %v1684_v0 = vmul.f32 -0.5, %v4979_v17  ;;  %v1223_v53 = vand.u32 2147483647, %v873_v10  ;;  %vm954_vm11 = vcmp.lt.f32.partialorder %v953_v25, 0.0004427343  ;;  %v3529_v12 = vpop.eup %3528  ;;  %v5004_v19 = vmin.f32 %v872_v63, 0.0 }
 0x160   : > { %vm5000_vm12 = vcmp.lt.f32.partialorder %v1660_v24, 0.0004427343  ;;  %v1224_v27 = vand.u32 2147483647, %v874_v61  ;;  %v955_v14 = vsel %vm954_vm11, %v952_v22, %v949_v50  ;;  %3544 = vlog2.f32 %v992_v6  ;;  %v3531_v25 = vpop.eup %3530  ;;  %v6611_v22 = vld [vmem:[#allocation33_spill] sm:$0xff] }
 0x161   : > { %v5007_v43 = vsub.f32 %v1653_v49, %v4814_v7  ;;  %3546 = vlog2.f32 %v1672_v41  ;;  %v1381_v28 = vmul.f32 1.442695, %v1286_v32  ;;  %v6608_v62 = vmin.f32 %v6607_v52, 0.0  ;;  %v1047_v23 = vpop.permute.xlu1 %1046 }
 0x162   : > { %vm5011_vm13 = vcmp.lt.f32.partialorder %v1669_v39, 0.0004427343  ;;  %v5016_v63 = vmul.f32 %v4957_v11, %v1676_v59  ;;  %v959_v6 = vmul.f32 -0.5, %v6597_v44  ;;  %v965_v7 = vadd.f32 1.0, %v6611_v22  ;;  %v5021_v49 = vpop.eup %3532 }
 0x163   : > { %6606 = vst [vmem:[#allocation30_spill] sm:$0xff] %v5007_v43  ;;  %v1019_v45 = vsub.f32 %v955_v14, %v6608_v62  ;;  %3548 = vlog2.f32 %v1681_v35  ;;  %v1685_v41 = vadd.f32 1.0, %v1684_v0  ;;  %v1287_v32 = vsub.f32 0.0, %v1223_v53  ;;  %v6617_v0 = vld [vmem:[#allocation48_spill] sm:$0xff] }
 0x164   : > { %v5023_v52 = vpop.eup %3534  ;;  %v5025_v39 = vmin.f32 %v873_v10, 0.0  ;;  %v1288_v62 = vsub.f32 0.0, %v1224_v27  ;;  %v977_v59 = vmul.f32 -0.5, %v6595_v54  ;;  %3550 = vlog2.f32 %v965_v7  ;;  %v6616_v10 = vld [vmem:[#allocation36_spill] sm:$0xff] }
 0x165   : > { %v1092_v14 = vmul.f32 %v1040_v16, %v1019_v45  ;;  %v5028_v55 = vpop.eup %3536  ;;  %v1656_v50 = vmul.f32 0.6931472, %v3529_v12  ;;  %3552 = vpow2.f32 %v1381_v28  ;;  %v5030_v43 = vmin.f32 %v874_v61, 0.0  ;;  %v6615_v45 = vld [vmem:[#allocation37_spill] sm:$0xff] }
 0x166   : > { %6612 = vst [vmem:[#allocation24_spill] sm:$0xff] %v5025_v39  ;;  %v5032_v21 = vand.u32 2147483647, %v875_v18  ;;  %v5034_v35 = vmin.f32 %v875_v18, 0.0  ;;  %v960_v53 = vadd.f32 1.0, %v959_v6  ;;  %v983_v16 = vadd.f32 1.0, %v6616_v10 }
 0x167   : > { %6613 = vst [vmem:[#allocation32_spill] sm:$0xff] %v5030_v43  ;;  %1111 = vperm.xlu1 %3406, %v1092_v14   ;;  %v3539_v27 = vpop.eup %3538  ;;  %v1665_v31 = vmul.f32 0.6931472, %v3531_v25  ;;  %v5039_v7 = vmul.f32 %v4979_v17, %v1685_v41  ;;  %v5041_v4 = vmul.f32 1.442695, %v1287_v32  ;;  %v978_v28 = vadd.f32 1.0, %v977_v59 }
 0x168   : > { %6614 = vst [vmem:[#allocation26_spill] sm:$0xff] %v5034_v35  ;;  %v962_v12 = vand.u32 2147483647, %v6597_v44  ;;  %v5044_v61 = vmul.f32 1.442695, %v1288_v62  ;;  %v995_v18 = vmul.f32 -0.5, %v6603_v37  ;;  %3554 = vlog2.f32 %v983_v16 }
 0x169   : > { %v3541_v14 = vpop.eup %3540  ;;  %v1662_v6 = vsel %vm5000_vm12, %v4960_v2, %v1656_v50  ;;  %v1690_v25 = vadd.f32 1.0, %v5021_v49  ;;  %v980_v41 = vand.u32 2147483647, %v6595_v54  ;;  %v1001_v32 = vadd.f32 1.0, %v6617_v0 }
 0x16a   : > { %v976_v3 = vmul.f32 0.6931472, %v3539_v27  ;;  %v958_v35 = vmul.f32 0.6931472, %v3541_v14  ;;  %v961_v62 = vmul.f32 %v6597_v44, %v960_v53  ;;  %v968_v59 = vmul.f32 -0.5, %v6611_v22  ;;  %v1061_v27 = vpop.permute.xlu0 %1060 }
 0x16b   : > { %v5055_v58 = vpop.eup %3542  ;;  %v1671_v16 = vsel %vm5011_vm13, %v4968_v57, %v1665_v31  ;;  %v1693_v2 = vmul.f32 -0.5, %v5021_v49  ;;  %vm963_vm14 = vcmp.lt.f32.partialorder %v962_v12, 0.0004427343  ;;  %3556 = vlog2.f32 %v1001_v32  ;;  %v6620_v57 = vld [vmem:[#allocation17_spill] sm:$0xff] }
 0x16c   : > { %v1699_v29 = vadd.f32 1.0, %v5023_v52  ;;  %v979_v50 = vmul.f32 %v6595_v54, %v978_v28  ;;  %v964_v14 = vsel %vm963_vm14, %v961_v62, %v958_v35  ;;  %v996_v44 = vadd.f32 1.0, %v995_v18 }
 0x16d   : > { %v3545_v53 = vpop.eup %3544  ;;  %v1702_v43 = vmul.f32 -0.5, %v5023_v52  ;;  %vm5064_vm15 = vcmp.lt.f32.partialorder %v980_v41, 0.0004427343  ;;  %v6621_v31 = vmin.f32 %v6620_v57, 0.0  ;;  %v998_v12 = vand.u32 2147483647, %v6603_v37 }
 0x16e   : > { %v3547_v32 = vpop.eup %3546  ;;  %v982_v54 = vsel %vm5064_vm15, %v979_v50, %v976_v3  ;;  %v994_v28 = vmul.f32 0.6931472, %v3545_v53  ;;  %v969_v35 = vadd.f32 1.0, %v968_v59  ;;  %v986_v18 = vmul.f32 -0.5, %v6616_v10  ;;  %v6623_v53 = vld [vmem:[#allocation16_spill] sm:$0xff] }
 0x16f   : > { %v1020_v24 = vsub.f32 %v964_v14, %v6621_v31  ;;  %v5075_v62 = vsub.f32 %v1662_v6, %v4840_v15  ;;  %v1696_v41 = vand.u32 2147483647, %v5021_v49  ;;  %v971_v26 = vand.u32 2147483647, %v6611_v22 }
 0x170   : > { %v5079_v57 = vpop.eup %3548  ;;  %v5082_v14 = vsub.f32 %v1671_v16, %v4844_v34  ;;  %3558 = vlog2.f32 %v1690_v25  ;;  %v1694_v39 = vadd.f32 1.0, %v1693_v2  ;;  %v997_v3 = vmul.f32 %v6603_v37, %v996_v44  ;;  %v1075_v25 = vpop.permute.xlu0 %1074 }
 0x171   : > { %6622 = vst [vmem:[#allocation44_spill] sm:$0xff] %v5075_v62  ;;  %v1093_v40 = vmul.f32 %v1047_v23, %v1020_v24  ;;  %v3551_v59 = vpop.eup %3550  ;;  %3560 = vlog2.f32 %v1699_v29  ;;  %v1703_v50 = vadd.f32 1.0, %v1702_v43  ;;  %v6624_v15 = vmin.f32 %v6623_v53, 0.0  ;;  %v1054_v2 = vpop.permute.xlu1 %1053 }
 0x172   : > { %vm5087_vm0 = vcmp.lt.f32.partialorder %v998_v12, 0.0004427343  ;;  %v5091_v31 = vpop.eup %3552  ;;  %v967_v16 = vmul.f32 0.6931472, %v3551_v59  ;;  %v970_v37 = vmul.f32 %v6611_v22, %v969_v35  ;;  %v987_v29 = vadd.f32 1.0, %v986_v18  ;;  %v6630_v59 = vld [vmem:[#allocation18_spill] sm:$0xff] }
 0x173   : > { %v1022_v6 = vsub.f32 %v982_v54, %v6624_v15  ;;  %1114 = vperm.xlu1 %3406, %v1093_v40   ;;  %v1000_v34 = vsel %vm5087_vm0, %v997_v3, %v994_v28  ;;  %v6627_v43 = vand.u32 2147483647, %v4957_v11  ;;  %vm972_vm2 = vcmp.lt.f32.partialorder %v971_v26, 0.0004427343 }
 0x174   : > { %v989_v12 = vand.u32 2147483647, %v6616_v10  ;;  %v5105_v54 = vmul.f32 %v5021_v49, %v1694_v39  ;;  %v1708_v28 = vadd.f32 1.0, %v5028_v55  ;;  %v973_v22 = vsel %vm972_vm2, %v970_v37, %v967_v16 }
 0x175   : > { %vm5098_vm1 = vcmp.lt.f32.partialorder %v6627_v43, 0.0004427343  ;;  %v1095_v24 = vmul.f32 %v1061_v27, %v1022_v6  ;;  %v1004_v35 = vmul.f32 -0.5, %v6617_v0  ;;  %v3555_v18 = vpop.eup %3554  ;;  %v1711_v11 = vmul.f32 -0.5, %v5028_v55  ;;  %v6632_v27 = vld [vmem:[#allocation19_spill] sm:$0xff] }
 0x176   : > { %v1289_v3 = vsub.f32 0.0, %v5032_v21  ;;  %v6631_v53 = vmin.f32 %v6630_v59, 0.0  ;;  %v6633_v26 = vmin.f32 %v6632_v27, 0.0  ;;  %v1714_v39 = vand.u32 2147483647, %v5028_v55 }
 0x177   : > { %1120 = vperm.xlu1 %3406, %v1095_v24   ;;  %3562 = vpow2.f32 %v5041_v4  ;;  %v985_v23 = vmul.f32 0.6931472, %v3555_v18  ;;  %v988_v16 = vmul.f32 %v6616_v10, %v987_v29  ;;  %v5119_v37 = vmul.f32 %v5023_v52, %v1703_v50  ;;  %v5129_v18 = vpop.permute.xlu0 %2156  ;;  %v1068_v29 = vpop.permute.xlu1 %1067 }
 0x178   : > { %v1024_v15 = vsub.f32 %v1000_v34, %v6631_v53  ;;  %v1021_v6 = vsub.f32 %v973_v22, %v6633_v26  ;;  %vm990_vm3 = vcmp.lt.f32.partialorder %v989_v12, 0.0004427343  ;;  %v3557_v21 = vpop.eup %3556  ;;  %v1674_v59 = vmul.f32 0.6931472, %v3547_v32  ;;  %v6658_v22 = vld [vmem:[#allocation47_spill] sm:$0xff] }
 0x179   : > { %v6634_v34 = vand.u32 2147483647, %v4979_v17  ;;  %v6637_v24 = vsub.f32 0.0, %v6615_v45  ;;  %v991_v10 = vsel %vm990_vm3, %v988_v16, %v985_v23  ;;  %v1005_v50 = vadd.f32 1.0, %v1004_v35 }
 0x17a   : > { %v1097_v43 = vmul.f32 %v1075_v25, %v1024_v15  ;;  %v1094_v40 = vmul.f32 %v1054_v2, %v1021_v6  ;;  %3564 = vlog2.f32 %v1708_v28  ;;  %v1387_v25 = vmul.f32 1.442695, %v1289_v3  ;;  %v6638_v2 = vld [vmem:[#allocation20_spill] sm:$0xff] }
 0x17b   : > { %vm5123_vm4 = vcmp.lt.f32.partialorder %v6634_v34, 0.0004427343  ;;  %v1226_v4 = vand.u32 2147483647, %v6637_v24  ;;  %v6639_v12 = vmin.f32 %v6638_v2, 0.0  ;;  %v1712_v53 = vadd.f32 1.0, %v1711_v11 }
 0x17c   : > { %1117 = vperm.xlu0 %3405, %v1094_v40   ;;  %1126 = vperm.xlu1 %3406, %v1097_v43   ;;  %v1007_v17 = vand.u32 2147483647, %v6617_v0  ;;  %v1720_v15 = vmul.f32 -0.5, %v5055_v58  ;;  %3566 = vpow2.f32 %v5044_v61  ;;  %v1003_v27 = vmul.f32 0.6931472, %v3557_v21  ;;  %v6640_v28 = vld [vmem:[#allocation4_spill] sm:$0xff] }
 0x17d   : > { %v1023_v32 = vsub.f32 %v991_v10, %v6639_v12  ;;  %v1717_v26 = vadd.f32 1.0, %v5055_v58  ;;  %v2218_v40 = vrot.slane %v5129_v18, %v6640_v28  ;;  %v1680_v3 = vsel %vm5098_vm1, %v5016_v63, %v1674_v59  ;;  %v3559_v43 = vpop.eup %3558  ;;  %v6641_v21 = vld [vmem:[#allocation29_spill] sm:$0xff]  ;;  %v6645_v59 = vld [vmem:[#allocation40_spill] sm:$0xff]  ;;  %v6647_v2 = vld [vmem:[#allocation6_spill] sm:$0xff] }
 0x17e   : > { %v1683_v23 = vmul.f32 0.6931472, %v5079_v57  ;;  %v1290_v11 = vsub.f32 0.0, %v1226_v4  ;;  %v1006_v16 = vmul.f32 %v6617_v0, %v1005_v50  ;;  %v1729_v61 = vmul.f32 -0.5, %v5091_v31  ;;  %v6644_v10 = vld [vmem:[#allocation13_spill] sm:$0xff]  ;;  %v3561_v44 = vpop.eup %3560  ;;  %v6646_v50 = vld [vmem:[#allocation46_spill] sm:$0xff] }
 0x17f   : > { %v1096_v35 = vmul.f32 %v1068_v29, %v1023_v32  ;;  %3568 = vpow2.f32 %v1387_v25  ;;  %v877_v34 = vsub.f32 0.0, %v6641_v21  ;;  %vm5147_vm5 = vcmp.lt.f32.partialorder %v1007_v17, 0.0004427343  ;;  %v6655_v21 = vld [vmem:[#allocation21_spill] sm:$0xff] }
 0x180   : > { %2205 = vbcast.lane.b32.xlu1 %v6644_v10, 256  ;;  %v1721_v63 = vadd.f32 1.0, %v1720_v15  ;;  %v1726_v57 = vadd.f32 1.0, %v5091_v31  ;;  %v878_v4 = vsub.f32 0.0, %v6645_v59  ;;  %v1009_v0 = vsel %vm5147_vm5, %v1006_v16, %v1003_v27  ;;  %v6657_v10 = vld [vmem:[#allocation12_spill] sm:$0xff] }
 0x181   : > { %1123 = vperm.xlu0 %3405, %v1096_v35   ;;  %v5157_v29 = vmul.f32 %v5028_v55, %v1712_v53  ;;  %3570 = vlog2.f32 %v1717_v26  ;;  %v2535_v25 = vmul.f32 %v2218_v40, %v6646_v50  ;;  %v2226_v12 = vrot.slane %v5129_v18, %v6647_v2  ;;  %v6654_v40 = vld [vmem:[#allocation34_spill] sm:$0xff] }
 0x182   : > { %v5163_v32 = vsub.f32 %v1680_v3, %v4855_v8  ;;  %vm5167_vm6 = vcmp.lt.f32.partialorder %v1696_v41, 0.0004427343  ;;  %v6650_v15 = vand.u32 2147483647, %v5023_v52  ;;  %v1389_v27 = vmul.f32 1.442695, %v1290_v11  ;;  %v1082_v3 = vpop.permute.xlu1 %1081 }
 0x183   : > { %v6653_v26 = vsub.f32 0.0, %v6615_v45  ;;  %v879_v8 = vsub.f32 0.0, %v6654_v40  ;;  %v1689_v49 = vsel %vm5123_vm4, %v5039_v7, %v1683_v23  ;;  %v1730_v41 = vadd.f32 1.0, %v1729_v61  ;;  %v6659_v23 = vld [vmem:[#allocation5_spill] sm:$0xff] }
 0x184   : > { %vm5173_vm7 = vcmp.lt.f32.partialorder %v6650_v15, 0.0004427343  ;;  %v1227_v16 = vand.u32 2147483647, %v877_v34  ;;  %v6656_v52 = vmin.f32 %v6655_v21, 0.0  ;;  %2664 = vperm.xlu1 %3406, %v2535_v25   ;;  %v5189_v11 = vmul.f32 %v5055_v58, %v1721_v63  ;;  %v5192_v50 = vpop.eup %3562 }
 0x185   : > { %v5179_v35 = vmin.f32 %v6653_v26, 0.0  ;;  %2198 = vbcast.lane.b32.xlu0 %v6657_v10, 256  ;;  %3572 = vlog2.f32 %v1726_v57  ;;  %v1228_v59 = vand.u32 2147483647, %v878_v4  ;;  %v2537_v7 = vmul.f32 %v2226_v12, %v6658_v22  ;;  %v6660_v26 = vld [vmem:[#allocation8_spill] sm:$0xff] }
 0x186   : > { %v1025_v24 = vsub.f32 %v1009_v0, %v6656_v52  ;;  %v2222_v61 = vrot.slane %v5129_v18, %v6659_v23  ;;  %v2234_v0 = vrot.slane %v5129_v18, %v6660_v26  ;;  %v5200_v25 = vsub.f32 %v1689_v49, %v4875_v36  ;;  %v5229_v6 = vpop.permute.xlu1 %2163 }
 0x187   : > { %vm5204_vm8 = vcmp.lt.f32.partialorder %v1714_v39, 0.0004427343  ;;  %3574 = vpow2.f32 %v1389_v27  ;;  %v5208_v57 = vmin.f32 %v877_v34, 0.0  ;;  %v1229_v40 = vand.u32 2147483647, %v879_v8  ;;  %v3565_v36 = vpop.eup %3564  ;;  %v6665_v39 = vld [vmem:[#allocation38_spill] sm:$0xff] }
 0x188   : > { %v1098_v15 = vmul.f32 %v1082_v3, %v1025_v24  ;;  %v1692_v12 = vmul.f32 0.6931472, %v3559_v43  ;;  %v1701_v3 = vmul.f32 0.6931472, %v3561_v44  ;;  %v5211_v21 = vmul.f32 %v5091_v31, %v1730_v41  ;;  %2670 = vperm.xlu1 %3406, %v2537_v7   ;;  %v6666_v34 = vld [vmem:[#allocation41_spill] sm:$0xff]  ;;  %v6667_v44 = vld [vmem:[#allocation7_spill] sm:$0xff] }
 0x189   : > { %v1291_v52 = vsub.f32 0.0, %v1227_v16  ;;  %v1292_v49 = vsub.f32 0.0, %v1228_v59  ;;  %v5213_v24 = vmin.f32 %v878_v4, 0.0  ;;  %v5215_v55 = vmin.f32 %v879_v8, 0.0  ;;  %v5218_v27 = vpop.eup %3566  ;;  %v6668_v16 = vld [vmem:[#allocation10_spill] sm:$0xff]  ;;  %v6669_v7 = vld [vmem:[#allocation45_spill] sm:$0xff] }
 0x18a   : > { %1129 = vperm.xlu0 %3405, %v1098_v15   ;;  %v2536_v22 = vmul.f32 %v2222_v61, %v6666_v34  ;;  %v2539_v43 = vmul.f32 %v2234_v0, %v4659_v20  ;;  %v2230_v41 = vrot.slane %v5129_v18, %v6667_v44  ;;  %v2242_v15 = vrot.slane %v5129_v18, %v6668_v16 }
 0x18b   : > { %6663 = vst [vmem:[#allocation15_spill] sm:$0xff] %v5213_v24  ;;  %6664 = vst [vmem:[#allocation33_spill] sm:$0xff] %v5215_v55  ;;  %v1735_v59 = vadd.f32 1.0, %v5192_v50  ;;  %v1738_v4 = vmul.f32 -0.5, %v5192_v50  ;;  %v1293_v8 = vsub.f32 0.0, %v1229_v40  ;;  %v1698_v61 = vsel %vm5167_vm6, %v5105_v54, %v1692_v12  ;;  %v6671_v24 = vld [vmem:[#allocation50_spill] sm:$0xff] }
 0x18c   : > { %v1707_v20 = vsel %vm5173_vm7, %v5119_v37, %v1701_v3  ;;  %v1710_v0 = vmul.f32 0.6931472, %v3565_v36  ;;  %v1391_v34 = vmul.f32 1.442695, %v1291_v52  ;;  %2676 = vperm.xlu1 %3406, %v2539_v43   ;;  %v5237_v10 = vpop.eup %3568  ;;  %v1744_v45 = vadd.f32 1.0, %v5218_v27  ;;  %v6672_v54 = vld [vmem:[#allocation42_spill] sm:$0xff] }
 0x18d   : > { %v6670_v62 = vsub.f32 0.0, %v6665_v39  ;;  %v882_v17 = vsub.f32 0.0, %v6671_v24  ;;  %v2538_v12 = vmul.f32 %v2230_v41, %v6672_v54  ;;  %v2541_v53 = vmul.f32 %v2242_v15, %v4694_v33  ;;  %v6673_v37 = vld [vmem:[#allocation9_spill] sm:$0xff] }
 0x18e   : > { %2667 = vperm.xlu0 %3405, %v2536_v22   ;;  %v2238_v3 = vrot.slane %v5129_v18, %v6673_v37  ;;  %v2250_v52 = vrot.slane %v5229_v6, %v6640_v28  ;;  %v3571_v36 = vpop.eup %3570  ;;  %v5251_v22 = vsub.f32 %v1698_v61, %v4935_v1  ;;  %v5254_v43 = vsub.f32 %v1707_v20, %v4937_v5  ;;  %v6677_v61 = vld [vmem:[#allocation43_spill] sm:$0xff] }
 0x18f   : > { %v1231_v55 = vand.u32 2147483647, %v6670_v62  ;;  %v6674_v62 = vand.u32 2147483647, %v5055_v58  ;;  %3576 = vlog2.f32 %v1735_v59  ;;  %v1739_v33 = vadd.f32 1.0, %v1738_v4  ;;  %v6678_v4 = vld [vmem:[#allocation11_spill] sm:$0xff] }
 0x190   : > { %v1716_v41 = vsel %vm5204_vm8, %v5157_v29, %v1710_v0  ;;  %v1750_v15 = vand.u32 2147483647, %v5218_v27  ;;  %v1753_v1 = vadd.f32 1.0, %v5237_v10  ;;  %3578 = vpow2.f32 %v1391_v34  ;;  %2682 = vperm.xlu1 %3406, %v2541_v53  }
 0x191   : > { %vm5258_vm9 = vcmp.lt.f32.partialorder %v6674_v62, 0.0004427343  ;;  %3580 = vlog2.f32 %v1744_v45  ;;  %v1393_v5 = vmul.f32 1.442695, %v1292_v49  ;;  %v1295_v58 = vsub.f32 0.0, %v1231_v55 }
 0x192   : > { %2673 = vperm.xlu0 %3405, %v2538_v12   ;;  %v6417_v20 = vsub.f32 0.0, %v6677_v61  ;;  %v3573_v54 = vpop.eup %3572  ;;  %v2540_v59 = vmul.f32 %v2238_v3, %v4662_v13  ;;  %v2246_v62 = vrot.slane %v5129_v18, %v6678_v4  ;;  %v2543_v29 = vmul.f32 %v2250_v52, %v4709_v51  ;;  %v5283_v12 = vpop.permute.xlu0 %2170 }
 0x193   : > { %v2258_v63 = vrot.slane %v5229_v6, %v6647_v2  ;;  %v6679_v0 = vand.u32 2147483647, %v5091_v31  ;;  %v1747_v45 = vmul.f32 -0.5, %v5218_v27  ;;  %v1395_v49 = vmul.f32 1.442695, %v1293_v8 }
 0x194   : > { %v6682_v55 = vsub.f32 0.0, %v6669_v7  ;;  %vm303_vm11 = vcmask 39936   ;;  %v5285_v18 = vpop.eup %3574  ;;  %v5288_v51 = vsub.f32 %v1716_v41, %v4953_v9  ;;  %v1719_v53 = vmul.f32 0.6931472, %v3571_v36  ;;  %2688 = vperm.xlu1 %3406, %v2543_v29  }
 0x195   : > { %vm5276_vm10 = vcmp.lt.f32.partialorder %v6679_v0, 0.0004427343  ;;  %3582 = vlog2.f32 %v1753_v1  ;;  %v1232_v31 = vand.u32 2147483647, %v882_v17  ;;  %v6683_v3 = vmov 0.0  }
 0x196   : > { %v1230_v13 = vand.u32 2147483647, %v6682_v55  ;;  %2679 = vperm.xlu0 %3405, %v2540_v59   ;;  %304 = vst.msk [vmem:[#allocation3] sm:$0xff] %vm303_vm11, %v6683_v3  ;;  %305 = vst.msk [vmem:[#allocation3 + $0x8] sm:$0xff] %vm303_vm11, %v6683_v3  ;;  %v1756_v9 = vmul.f32 -0.5, %v5237_v10  ;;  %3584 = vpow2.f32 %v1393_v5  ;;  %v2542_v36 = vmul.f32 %v2246_v62, %v4701_v46 }
 0x197   : > { %306 = vst.msk [vmem:[#allocation3 + $0x10] sm:$0xff] %vm303_vm11, %v6683_v3  ;;  %307 = vst.msk [vmem:[#allocation3 + $0x18] sm:$0xff] %vm303_vm11, %v6683_v3  ;;  %v1399_v8 = vmul.f32 1.442695, %v1295_v58  ;;  %v1233_v52 = vand.u32 2147483647, %v6417_v20  ;;  %v2254_v41 = vrot.slane %v5229_v6, %v6659_v23  ;;  %v2545_v1 = vmul.f32 %v2258_v63, %v4741_v42 }
 0x198   : > { %308 = vst.msk [vmem:[#allocation3 + $0x20] sm:$0xff] %vm303_vm11, %v6683_v3  ;;  %309 = vst.msk [vmem:[#allocation3 + $0x28] sm:$0xff] %vm303_vm11, %v6683_v3  ;;  %v2282_v59 = vrot.slane %v5283_v12, %v6640_v28  ;;  %v5318_v29 = vmul.f32 %v5192_v50, %v1739_v33  ;;  %v1762_v0 = vadd.f32 1.0, %v5285_v18  ;;  %3586 = vpow2.f32 %v1395_v49 }
 0x199   : > { %310 = vst.msk [vmem:[#allocation3 + $0x30] sm:$0xff] %vm303_vm11, %v6683_v3  ;;  %311 = vst.msk [vmem:[#allocation3 + $0x38] sm:$0xff] %vm303_vm11, %v6683_v3  ;;  %v1294_v5 = vsub.f32 0.0, %v1230_v13  ;;  %v1725_v58 = vsel %vm5258_vm9, %v5189_v11, %v1719_v53  ;;  %v1728_v46 = vmul.f32 0.6931472, %v3573_v54  ;;  %v1765_v62 = vmul.f32 -0.5, %v5285_v18  ;;  %2694 = vperm.xlu1 %3406, %v2545_v1  }
 0x19a   : > { %v1296_v55 = vsub.f32 0.0, %v1232_v31  ;;  %2685 = vperm.xlu0 %3405, %v2542_v36   ;;  %v1748_v42 = vadd.f32 1.0, %v1747_v45  ;;  %v1757_v63 = vadd.f32 1.0, %v1756_v9  ;;  %3588 = vpow2.f32 %v1399_v8 }
 0x19b   : > { %v1297_v20 = vsub.f32 0.0, %v1233_v52  ;;  %v2544_v33 = vmul.f32 %v2254_v41, %v4728_v56  ;;  %v2262_v49 = vrot.slane %v5229_v6, %v6667_v44  ;;  %v2551_v13 = vmul.f32 %v2282_v59, %v4879_v47  ;;  %v6689_v52 = vld [vmem:[#allocation53_spill] sm:$0xff] }
 0x19c   : > { %v2266_v11 = vrot.slane %v5229_v6, %v6660_v26  ;;  %v5332_v40 = vsub.f32 %v1725_v58, %v4970_v38  ;;  %v1759_v54 = vand.u32 2147483647, %v5237_v10  ;;  %3590 = vlog2.f32 %v1762_v0  ;;  %v3577_v53 = vpop.eup %3576 }
 0x19d   : > { %v1397_v45 = vmul.f32 1.442695, %v1294_v5  ;;  %v1734_v56 = vsel %vm5276_vm10, %v5211_v21, %v1728_v46  ;;  %v6684_v31 = vand.u32 2147483647, %v5192_v50  ;;  %vm5346_vm13 = vcmp.lt.f32.partialorder %v1750_v15, 0.0004427343  ;;  %2712 = vperm.xlu1 %3406, %v2551_v13   ;;  %v5351_v34 = vpop.eup %3578 }
 0x19e   : > { %v1766_v38 = vadd.f32 1.0, %v1765_v62  ;;  %v1401_v8 = vmul.f32 1.442695, %v1296_v55  ;;  %v884_v36 = vsub.f32 0.0, %v6689_v52  ;;  %2691 = vperm.xlu0 %3405, %v2544_v33   ;;  %v5354_v50 = vmul.f32 %v5218_v27, %v1748_v42  ;;  %v3581_v59 = vpop.eup %3580  ;;  %v5377_v62 = vpop.permute.xlu1 %2177  ;;  %v6694_v33 = vld [vmem:[#allocation49_spill] sm:$0xff]  ;;  %v6698_v52 = vld [vmem:[#allocation55_spill] sm:$0xff] }
 0x19f   : > { %vm5340_vm12 = vcmp.lt.f32.partialorder %v6684_v31, 0.0004427343  ;;  %v5357_v21 = vmul.f32 %v5237_v10, %v1757_v63  ;;  %v6690_v41 = vsub.f32 0.0, %v6669_v7  ;;  %v1403_v1 = vmul.f32 1.442695, %v1297_v20 }
 0x1a0   : > { %v2546_v0 = vmul.f32 %v2262_v49, %v4759_v30  ;;  %v2286_v5 = vrot.slane %v5283_v12, %v6659_v23  ;;  %v2547_v58 = vmul.f32 %v2266_v11, %v4772_v60  ;;  %v2270_v27 = vrot.slane %v5229_v6, %v6673_v37 }
 0x1a1   : > { %v5361_v15 = vmin.f32 %v6690_v41, 0.0  ;;  %v5370_v46 = vsub.f32 %v1734_v56, %v5004_v19  ;;  %v1768_v10 = vand.u32 2147483647, %v5285_v18  ;;  %3592 = vpow2.f32 %v1397_v45 }
 0x1a2   : > { %v6691_v7 = vsub.f32 0.0, %v6665_v39  ;;  %vm5379_vm14 = vcmp.lt.f32.partialorder %v1759_v54, 0.0004427343  ;;  %v5384_v60 = vmul.f32 %v5285_v18, %v1766_v38  ;;  %v1771_v55 = vadd.f32 1.0, %v5351_v34  ;;  %2697 = vperm.xlu0 %3405, %v2546_v0   ;;  %2700 = vperm.xlu1 %3406, %v2547_v58   ;;  %v3583_v42 = vpop.eup %3582  ;;  %v6695_v54 = vld [vmem:[#allocation64_spill] sm:$0xff]  ;;  %v6712_v58 = vld [vmem:[#allocation57_spill] sm:$0xff] }
 0x1a3   : > { %3594 = vpow2.f32 %v1401_v8  ;;  %v1234_v19 = vand.u32 2147483647, %v884_v36  ;;  %v1737_v63 = vmul.f32 0.6931472, %v3577_v53  ;;  %v1746_v39 = vmul.f32 0.6931472, %v3581_v59  ;;  %v5388_v13 = vpop.eup %3584 }
 0x1a4   : > { %v5375_v20 = vmin.f32 %v6691_v7, 0.0  ;;  %3596 = vpow2.f32 %v1403_v1  ;;  %v885_v49 = vsub.f32 0.0, %v6694_v33  ;;  %v2552_v11 = vmul.f32 %v2286_v5, %v4882_v48 }
 0x1a5   : > { %v2290_v18 = vrot.slane %v5283_v12, %v6647_v2  ;;  %v2548_v45 = vmul.f32 %v2270_v27, %v6695_v54  ;;  %v2314_v56 = vrot.slane %v5377_v62, %v6640_v28  ;;  %v5398_v31 = vmin.f32 %v882_v17, 0.0  ;;  %v5407_v41 = vpop.eup %3586  ;;  %v6702_v27 = vld [vmem:[#allocation27_spill] sm:$0xff] }
 0x1a6   : > { %v6696_v53 = vsub.f32 0.0, %v6677_v61  ;;  %v5404_v8 = vmin.f32 %v884_v36, 0.0  ;;  %v886_v48 = vsub.f32 0.0, %v6698_v52  ;;  %3598 = vlog2.f32 %v1771_v55  ;;  %2715 = vperm.xlu0 %3405, %v2552_v11  }
 0x1a7   : > { %v1774_v1 = vmul.f32 -0.5, %v5351_v34  ;;  %v1298_v59 = vsub.f32 0.0, %v1234_v19  ;;  %v5410_v0 = vmin.f32 %v885_v49, 0.0  ;;  %2703 = vperm.xlu1 %3406, %v2548_v45   ;;  %v1743_v24 = vsel %vm5340_vm12, %v5318_v29, %v1737_v63  ;;  %v5419_v5 = vpop.eup %3588  ;;  %v6703_v63 = vld [vmem:[#allocation24_spill] sm:$0xff] }
 0x1a8   : > { %v5402_v38 = vmin.f32 %v6696_v53, 0.0  ;;  %6697 = vst [vmem:[#allocation37_spill] sm:$0xff] %v5404_v8  ;;  %v1752_v17 = vsel %vm5346_vm13, %v5354_v50, %v1746_v39  ;;  %v1755_v61 = vmul.f32 0.6931472, %v3583_v42  ;;  %v1780_v36 = vadd.f32 1.0, %v5388_v13  ;;  %v6705_v53 = vld [vmem:[#allocation39_spill] sm:$0xff] }
 0x1a9   : > { %6699 = vst [vmem:[#allocation36_spill] sm:$0xff] %v5410_v0  ;;  %vm5421_vm15 = vcmp.lt.f32.partialorder %v1768_v10, 0.0004427343  ;;  %v2553_v7 = vmul.f32 %v2290_v18, %v6702_v27  ;;  %v2294_v55 = vrot.slane %v5283_v12, %v6667_v44  ;;  %v2559_v29 = vmul.f32 %v2314_v56, %v5082_v14  ;;  %v3591_v42 = vpop.eup %3590  ;;  %v6704_v14 = vld [vmem:[#allocation32_spill] sm:$0xff] }
 0x1aa   : > { %v2274_v9 = vrot.slane %v5229_v6, %v6668_v16  ;;  %v1777_v47 = vand.u32 2147483647, %v5351_v34  ;;  %v1783_v50 = vmul.f32 -0.5, %v5388_v13  ;;  %v1789_v19 = vadd.f32 1.0, %v5407_v41  ;;  %v6715_v0 = vld [vmem:[#allocation52_spill] sm:$0xff] }
 0x1ab   : > { %v1792_v10 = vmul.f32 -0.5, %v5407_v41  ;;  %v5436_v39 = vsub.f32 %v1743_v24, %v6703_v63  ;;  %v1775_v33 = vadd.f32 1.0, %v1774_v1  ;;  %v1405_v11 = vmul.f32 1.442695, %v1298_v59  ;;  %2718 = vperm.xlu0 %3405, %v2553_v7   ;;  %2736 = vperm.xlu1 %3406, %v2559_v29   ;;  %v6706_v1 = vld [vmem:[#allocation67_spill] sm:$0xff] }
 0x1ac   : > { %v1235_v18 = vand.u32 2147483647, %v885_v49  ;;  %v5439_v54 = vsub.f32 %v1752_v17, %v6704_v14  ;;  %v1761_v45 = vsel %vm5379_vm14, %v5357_v21, %v1755_v61  ;;  %3600 = vlog2.f32 %v1780_v36  ;;  %v6707_v21 = vld [vmem:[#allocation26_spill] sm:$0xff] }
 0x1ad   : > { %v1807_v56 = vadd.f32 1.0, %v5419_v5  ;;  %v2554_v27 = vmul.f32 %v2294_v55, %v6705_v53  ;;  %v2318_v24 = vrot.slane %v5377_v62, %v6659_v23  ;;  %v2549_v59 = vmul.f32 %v2274_v9, %v6706_v1 }
 0x1ae   : > { %v2322_v49 = vrot.slane %v5377_v62, %v6647_v2  ;;  %v1764_v7 = vmul.f32 0.6931472, %v3591_v42  ;;  %v1784_v17 = vadd.f32 1.0, %v1783_v50  ;;  %3602 = vlog2.f32 %v1789_v19  ;;  %v5451_v63 = vpop.eup %3592  ;;  %v6708_v19 = vld [vmem:[#allocation51_spill] sm:$0xff] }
 0x1af   : > { %v1793_v29 = vadd.f32 1.0, %v1792_v10  ;;  %v5454_v30 = vsub.f32 %v1761_v45, %v6707_v21  ;;  %v5457_v61 = vmul.f32 %v5351_v34, %v1775_v33  ;;  %v1786_v36 = vand.u32 2147483647, %v5388_v13  ;;  %2721 = vperm.xlu0 %3405, %v2554_v27   ;;  %2706 = vperm.xlu1 %3406, %v2549_v59  }
 0x1b0   : > { %3604 = vpow2.f32 %v1405_v11  ;;  %v5460_v55 = vpop.eup %3594  ;;  %v1795_v9 = vand.u32 2147483647, %v5407_v41  ;;  %v1236_v50 = vand.u32 2147483647, %v886_v48  ;;  %v6418_v10 = vsub.f32 0.0, %v6708_v19 }
 0x1b1   : > { %3606 = vlog2.f32 %v1807_v56  ;;  %v5466_v42 = vpop.eup %3596  ;;  %v2560_v34 = vmul.f32 %v2318_v24, %v5163_v32  ;;  %v2298_v33 = vrot.slane %v5283_v12, %v6660_v26  ;;  %v2561_v11 = vmul.f32 %v2322_v49, %v5200_v25  ;;  %v5487_v24 = vpop.permute.xlu0 %2184 }
 0x1b2   : > { %v2302_v14 = vrot.slane %v5283_v12, %v6673_v37  ;;  %v1770_v45 = vsel %vm5421_vm15, %v5384_v60, %v1764_v7  ;;  %vm5477_vm0 = vcmp.lt.f32.partialorder %v1777_v47, 0.0004427343  ;;  %v5482_v53 = vmul.f32 %v5388_v13, %v1784_v17  ;;  %v6713_v7 = vld [vmem:[#allocation28_spill] sm:$0xff] }
 0x1b3   : > { %v5485_v32 = vmul.f32 %v5407_v41, %v1793_v29  ;;  %v1299_v27 = vsub.f32 0.0, %v1235_v18  ;;  %v1801_v25 = vmul.f32 -0.5, %v5451_v63  ;;  %v1816_v1 = vadd.f32 1.0, %v5460_v55  ;;  %2739 = vperm.xlu0 %3405, %v2560_v34   ;;  %2742 = vperm.xlu1 %3406, %v2561_v11   ;;  %v3599_v13 = vpop.eup %3598 }
 0x1b4   : > { %v5493_v60 = vmin.f32 %v886_v48, 0.0  ;;  %v888_v47 = vsub.f32 0.0, %v6712_v58  ;;  %v1810_v59 = vmul.f32 -0.5, %v5419_v5  ;;  %v1825_v41 = vadd.f32 1.0, %v5466_v42  ;;  %v6714_v48 = vld [vmem:[#allocation35_spill] sm:$0xff] }
 0x1b5   : > { %v1300_v18 = vsub.f32 0.0, %v1236_v50  ;;  %v1237_v49 = vand.u32 2147483647, %v6418_v10  ;;  %v2555_v17 = vmul.f32 %v2298_v33, %v6713_v7  ;;  %v2278_v52 = vrot.slane %v5229_v6, %v6678_v4 }
 0x1b6   : > { %6711 = vst [vmem:[#allocation48_spill] sm:$0xff] %v5493_v60  ;;  %v2556_v29 = vmul.f32 %v2302_v14, %v6714_v48  ;;  %v2346_v21 = vrot.slane %v5487_v24, %v6640_v28  ;;  %v5507_v34 = vsub.f32 %v1770_v45, %v5179_v35  ;;  %v1798_v11 = vadd.f32 1.0, %v5451_v63 }
 0x1b7   : > { %v1813_v50 = vand.u32 2147483647, %v5419_v5  ;;  %v1819_v58 = vmul.f32 -0.5, %v5460_v55  ;;  %v1773_v10 = vmul.f32 0.6931472, %v3599_v13  ;;  %v1802_v60 = vadd.f32 1.0, %v1801_v25  ;;  %2724 = vperm.xlu0 %3405, %v2555_v17  }
 0x1b8   : > { %3608 = vlog2.f32 %v1816_v1  ;;  %v1407_v33 = vmul.f32 1.442695, %v1299_v27  ;;  %2727 = vperm.xlu1 %3406, %v2556_v29   ;;  %v1811_v6 = vadd.f32 1.0, %v1810_v59  ;;  %v1409_v14 = vmul.f32 1.442695, %v1300_v18  ;;  %v6723_v29 = vld [vmem:[#allocation30_spill] sm:$0xff] }
 0x1b9   : > { %3610 = vlog2.f32 %v1825_v41  ;;  %v1301_v7 = vsub.f32 0.0, %v1237_v49  ;;  %v3601_v48 = vpop.eup %3600  ;;  %v2550_v35 = vmul.f32 %v2278_v52, %v6715_v0  ;;  %v2326_v45 = vrot.slane %v5377_v62, %v6667_v44  ;;  %v6722_v49 = vld [vmem:[#allocation54_spill] sm:$0xff]  ;;  %v6732_v18 = vld [vmem:[#allocation15_spill] sm:$0xff] }
 0x1ba   : > { %v2567_v8 = vmul.f32 %v2346_v21, %v5436_v39  ;;  %v2306_v13 = vrot.slane %v5283_v12, %v6668_v16  ;;  %vm5518_vm1 = vcmp.lt.f32.partialorder %v1786_v36, 0.0004427343  ;;  %3612 = vlog2.f32 %v1798_v11 }
 0x1bb   : > { %v1804_v27 = vand.u32 2147483647, %v5451_v63  ;;  %v1820_v1 = vadd.f32 1.0, %v1819_v58  ;;  %v1238_v59 = vand.u32 2147483647, %v888_v47  ;;  %v3603_v41 = vpop.eup %3602  ;;  %v1779_v0 = vsel %vm5477_vm0, %v5457_v61, %v1773_v10  ;;  %2709 = vperm.xlu0 %3405, %v2550_v35  }
 0x1bc   : > { %vm5526_vm2 = vcmp.lt.f32.partialorder %v1795_v9, 0.0004427343  ;;  %v5531_v39 = vmul.f32 %v5451_v63, %v1802_v60  ;;  %vm5533_vm3 = vcmp.lt.f32.partialorder %v1813_v50, 0.0004427343  ;;  %3614 = vpow2.f32 %v1407_v33  ;;  %2760 = vperm.xlu1 %3406, %v2567_v8  }
 0x1bd   : > { %v889_v17 = vsub.f32 0.0, %v6722_v49  ;;  %v5538_v52 = vpop.eup %3604  ;;  %v1812_v61 = vmul.f32 %v5419_v5, %v1811_v6  ;;  %v1822_v9 = vand.u32 2147483647, %v5460_v55  ;;  %3616 = vpow2.f32 %v1409_v14 }
 0x1be   : > { %v1411_v10 = vmul.f32 1.442695, %v1301_v7  ;;  %v3607_v56 = vpop.eup %3606  ;;  %v2562_v63 = vmul.f32 %v2326_v45, %v5251_v22  ;;  %v2350_v60 = vrot.slane %v5487_v24, %v6659_v23  ;;  %v2557_v21 = vmul.f32 %v2306_v13, %v6723_v29 }
 0x1bf   : > { %v2354_v11 = vrot.slane %v5487_v24, %v6647_v2  ;;  %v5549_v8 = vsub.f32 %v1779_v0, %v5208_v57  ;;  %v5552_v5 = vmul.f32 %v5460_v55, %v1820_v1  ;;  %v6724_v50 = vsub.f32 0.0, %v6708_v19  ;;  %v6725_v55 = vld [vmem:[#allocation59_spill] sm:$0xff] }
 0x1c0   : > { %v1302_v33 = vsub.f32 0.0, %v1238_v59  ;;  %v1782_v22 = vmul.f32 0.6931472, %v3601_v48  ;;  %v1834_v6 = vadd.f32 1.0, %v5538_v52  ;;  %v5559_v14 = vmin.f32 %v888_v47, 0.0  ;;  %2745 = vperm.xlu0 %3405, %v2562_v63   ;;  %2730 = vperm.xlu1 %3406, %v2557_v21  }
 0x1c1   : > { %v5556_v58 = vmin.f32 %v6724_v50, 0.0  ;;  %v1239_v7 = vand.u32 2147483647, %v889_v17  ;;  %v1791_v57 = vmul.f32 0.6931472, %v3603_v41  ;;  %3618 = vpow2.f32 %v1411_v10  ;;  %v6726_v41 = vld [vmem:[#allocation56_spill] sm:$0xff]  ;;  %v5573_v10 = vpop.permute.xlu1 %2191 }
 0x1c2   : > { %v1809_v35 = vmul.f32 0.6931472, %v3607_v56  ;;  %v890_v45 = vsub.f32 0.0, %v6725_v55  ;;  %v2568_v19 = vmul.f32 %v2350_v60, %v5439_v54  ;;  %v2330_v13 = vrot.slane %v5377_v62, %v6660_v26 }
 0x1c3   : > { %v2569_v48 = vmul.f32 %v2354_v11, %v5454_v30  ;;  %v2334_v47 = vrot.slane %v5377_v62, %v6673_v37  ;;  %v1828_v1 = vmul.f32 -0.5, %v5466_v42  ;;  %v1831_v59 = vand.u32 2147483647, %v5466_v42 }
 0x1c4   : > { %v1413_v0 = vmul.f32 1.442695, %v1302_v33  ;;  %v891_v56 = vsub.f32 0.0, %v6726_v41  ;;  %v1788_v54 = vsel %vm5518_vm1, %v5482_v53, %v1782_v22  ;;  %vm5578_vm4 = vcmp.lt.f32.partialorder %v1822_v9, 0.0004427343  ;;  %2763 = vperm.xlu0 %3405, %v2568_v19   ;;  %v6729_v53 = vld [vmem:[#allocation61_spill] sm:$0xff] }
 0x1c5   : > { %3620 = vlog2.f32 %v1834_v6  ;;  %v1837_v30 = vmul.f32 -0.5, %v5538_v52  ;;  %v1303_v60 = vsub.f32 0.0, %v1239_v7  ;;  %2766 = vperm.xlu1 %3406, %v2569_v48   ;;  %v3609_v29 = vpop.eup %3608  ;;  %v1797_v21 = vsel %vm5526_vm2, %v5485_v32, %v1791_v57  ;;  %v6735_v19 = vld [vmem:[#allocation33_spill] sm:$0xff]  ;;  %v6737_v57 = vld [vmem:[#allocation58_spill] sm:$0xff] }
 0x1c6   : > { %v1815_v11 = vsel %vm5533_vm3, %v1812_v61, %v1809_v35  ;;  %v1240_v25 = vand.u32 2147483647, %v890_v45  ;;  %v892_v9 = vsub.f32 0.0, %v6729_v53  ;;  %v3611_v50 = vpop.eup %3610  ;;  %vm5589_vm5 = vcmp.lt.f32.partialorder %v1804_v27, 0.0004427343 }
 0x1c7   : > { %v2563_v22 = vmul.f32 %v2330_v13, %v5254_v43  ;;  %v2310_v6 = vrot.slane %v5283_v12, %v6678_v4  ;;  %v2564_v7 = vmul.f32 %v2334_v47, %v5288_v51  ;;  %v2378_v32 = vrot.slane %v5573_v10, %v6640_v28  ;;  %v3613_v27 = vpop.eup %3612 }
 0x1c8   : > { %v5600_v36 = vsub.f32 %v1788_v54, %v6732_v18  ;;  %v1829_v61 = vadd.f32 1.0, %v1828_v1  ;;  %vm5602_vm6 = vcmp.lt.f32.partialorder %v1831_v59, 0.0004427343  ;;  %3622 = vpow2.f32 %v1413_v0  ;;  %v6736_v0 = vld [vmem:[#allocation44_spill] sm:$0xff] }
 0x1c9   : > { %v2127_v43 = vsub.f32 %v1815_v11, %v5375_v20  ;;  %v1838_v35 = vadd.f32 1.0, %v1837_v30  ;;  %v1840_v12 = vand.u32 2147483647, %v5538_v52  ;;  %v1415_v55 = vmul.f32 1.442695, %v1303_v60  ;;  %2748 = vperm.xlu0 %3405, %v2563_v22   ;;  %2751 = vperm.xlu1 %3406, %v2564_v7   ;;  %v5608_v51 = vpop.eup %3614 }
 0x1ca   : > { %v5611_v13 = vsub.f32 %v1797_v21, %v6735_v19  ;;  %v1818_v48 = vmul.f32 0.6931472, %v3609_v29  ;;  %v1827_v47 = vmul.f32 0.6931472, %v3611_v50  ;;  %v1304_v1 = vsub.f32 0.0, %v1240_v25  ;;  %v5613_v59 = vpop.eup %3616 }
 0x1cb   : > { %v2558_v54 = vmul.f32 %v2310_v6, %v6736_v0  ;;  %v2358_v20 = vrot.slane %v5487_v24, %v6667_v44  ;;  %v2575_v30 = vmul.f32 %v2378_v32, %v2127_v43  ;;  %v2338_v60 = vrot.slane %v5377_v62, %v6668_v16  ;;  %v6741_v0 = vld [vmem:[#allocation60_spill] sm:$0xff] }
 0x1cc   : > { %v5620_v11 = vmul.f32 0.6931472, %v3613_v27  ;;  %v1830_v22 = vmul.f32 %v5466_v42, %v1829_v61  ;;  %v5625_v29 = vmin.f32 %v889_v17, 0.0  ;;  %v1241_v21 = vand.u32 2147483647, %v891_v56 }
 0x1cd   : > { %v5630_v25 = vmul.f32 %v5538_v52, %v1838_v35  ;;  %v1843_v50 = vadd.f32 1.0, %v5608_v51  ;;  %3624 = vpow2.f32 %v1415_v55  ;;  %v1242_v6 = vand.u32 2147483647, %v892_v9  ;;  %2733 = vperm.xlu0 %3405, %v2558_v54   ;;  %2784 = vperm.xlu1 %3406, %v2575_v30  }
 0x1ce   : > { %v1824_v42 = vsel %vm5578_vm4, %v5552_v5, %v1818_v48  ;;  %v1833_v49 = vsel %vm5602_vm6, %v1830_v22, %v1827_v47  ;;  %v1417_v17 = vmul.f32 1.442695, %v1304_v1  ;;  %v5640_v7 = vmin.f32 %v890_v45, 0.0  ;;  %v5642_v52 = vpop.eup %3618  ;;  %v6740_v47 = vld [vmem:[#allocation63_spill] sm:$0xff] }
 0x1cf   : > { %v2570_v32 = vmul.f32 %v2358_v20, %v5507_v34  ;;  %v2382_v18 = vrot.slane %v5573_v10, %v6659_v23  ;;  %v2565_v61 = vmul.f32 %v2338_v60, %v5332_v40  ;;  %v2386_v27 = vrot.slane %v5573_v10, %v6647_v2 }
 0x1d0   : > { %v1806_v5 = vsel %vm5589_vm5, %v5531_v39, %v5620_v11  ;;  %v1852_v45 = vadd.f32 1.0, %v5613_v59  ;;  %v1305_v63 = vsub.f32 0.0, %v1241_v21  ;;  %v893_v43 = vsub.f32 0.0, %v6737_v57 }
 0x1d1   : > { %v2128_v34 = vsub.f32 %v1824_v42, %v5398_v31  ;;  %v2129_v35 = vsub.f32 %v1833_v49, %v5402_v38  ;;  %vm5658_vm7 = vcmp.lt.f32.partialorder %v1840_v12, 0.0004427343  ;;  %3626 = vlog2.f32 %v1843_v50  ;;  %2769 = vperm.xlu0 %3405, %v2570_v32   ;;  %2754 = vperm.xlu1 %3406, %v2565_v61  }
 0x1d2   : > { %v1306_v40 = vsub.f32 0.0, %v1242_v6  ;;  %v3621_v19 = vpop.eup %3620  ;;  %v1861_v48 = vadd.f32 1.0, %v5642_v52  ;;  %3628 = vpow2.f32 %v1417_v17  ;;  %v894_v1 = vsub.f32 0.0, %v6740_v47 }
 0x1d3   : > { %v895_v54 = vsub.f32 0.0, %v6741_v0  ;;  %v2576_v20 = vmul.f32 %v2382_v18, %v2128_v34  ;;  %v2362_v31 = vrot.slane %v5487_v24, %v6660_v26  ;;  %v2577_v38 = vmul.f32 %v2386_v27, %v2129_v35  ;;  %v6743_v34 = vld [vmem:[#allocation66_spill] sm:$0xff] }
 0x1d4   : > { %v2366_v12 = vrot.slane %v5487_v24, %v6673_v37  ;;  %3630 = vlog2.f32 %v1852_v45  ;;  %v1419_v30 = vmul.f32 1.442695, %v1305_v63  ;;  %v5671_v60 = vmin.f32 %v891_v56, 0.0  ;;  %v6742_v56 = vld [vmem:[#allocation62_spill] sm:$0xff] }
 0x1d5   : > { %v1243_v22 = vand.u32 2147483647, %v893_v43  ;;  %v5675_v21 = vpop.eup %3622  ;;  %v1836_v50 = vmul.f32 0.6931472, %v3621_v19  ;;  %v1846_v6 = vmul.f32 -0.5, %v5608_v51  ;;  %v1855_v42 = vmul.f32 -0.5, %v5613_v59  ;;  %2787 = vperm.xlu0 %3405, %v2576_v20   ;;  %2790 = vperm.xlu1 %3406, %v2577_v38  }
 0x1d6   : > { %v1421_v49 = vmul.f32 1.442695, %v1306_v40  ;;  %3632 = vlog2.f32 %v1861_v48  ;;  %v1244_v17 = vand.u32 2147483647, %v894_v1  ;;  %v1245_v41 = vand.u32 2147483647, %v895_v54 }
 0x1d7   : > { %v897_v32 = vsub.f32 0.0, %v6742_v56  ;;  %v2571_v18 = vmul.f32 %v2362_v31, %v5549_v8  ;;  %v2342_v61 = vrot.slane %v5377_v62, %v6678_v4  ;;  %v2572_v27 = vmul.f32 %v2366_v12, %v5600_v36  ;;  %v6744_v48 = vld [vmem:[#allocation25_spill] sm:$0xff] }
 0x1d8   : > { %vm301_vm8 = vcmask 64512   ;;  %v1870_v45 = vadd.f32 1.0, %v5675_v21  ;;  %3634 = vpow2.f32 %v1419_v30  ;;  %v1307_v63 = vsub.f32 0.0, %v1243_v22 }
 0x1d9   : > { %v896_v35 = vsub.f32 0.0, %v6743_v34  ;;  %302 = vst.msk [vmem:[#allocation2] sm:$0xff] %vm301_vm8, %v6683_v3  ;;  %v1847_v40 = vadd.f32 1.0, %v1846_v6  ;;  %v1849_v19 = vand.u32 2147483647, %v5608_v51  ;;  %v6419_v20 = vsub.f32 0.0, %v6744_v48  ;;  %2772 = vperm.xlu0 %3405, %v2571_v18   ;;  %2775 = vperm.xlu1 %3406, %v2572_v27  }
 0x1da   : > { %v1858_v8 = vand.u32 2147483647, %v5613_v59  ;;  %v5695_v62 = vpop.eup %3624  ;;  %v1842_v36 = vsel %vm5658_vm7, %v5630_v25, %v1836_v50  ;;  %v1864_v31 = vmul.f32 -0.5, %v5642_v52  ;;  %3636 = vpow2.f32 %v1421_v49  ;;  %v6745_v50 = vld [vmem:[#allocation37_spill] sm:$0xff] }
 0x1db   : > { %v1308_v38 = vsub.f32 0.0, %v1244_v17  ;;  %v1309_v3 = vsub.f32 0.0, %v1245_v41  ;;  %v1247_v12 = vand.u32 2147483647, %v897_v32  ;;  %v2566_v30 = vmul.f32 %v2342_v61, %v5370_v46 }
 0x1dc   : > { %v2390_v22 = vrot.slane %v5573_v10, %v6667_v44  ;;  %v1856_v6 = vadd.f32 1.0, %v1855_v42  ;;  %3638 = vlog2.f32 %v1870_v45  ;;  %v1423_v18 = vmul.f32 1.442695, %v1307_v63 }
 0x1dd   : > { %v1246_v55 = vand.u32 2147483647, %v896_v35  ;;  %v5714_v25 = vsub.f32 %v1806_v5, %v5361_v15  ;;  %v2130_v49 = vsub.f32 %v1842_v36, %v6745_v50  ;;  %v1879_v46 = vadd.f32 1.0, %v5695_v62  ;;  %2757 = vperm.xlu0 %3405, %v2566_v30  }
 0x1de   : > { %v1248_v42 = vand.u32 2147483647, %v6419_v20  ;;  %v3627_v17 = vpop.eup %3626  ;;  %vm5720_vm9 = vcmp.lt.f32.partialorder %v1849_v19, 0.0004427343  ;;  %v1865_v61 = vadd.f32 1.0, %v1864_v31  ;;  %v1873_v39 = vmul.f32 -0.5, %v5675_v21 }
 0x1df   : > { %v1867_v33 = vand.u32 2147483647, %v5642_v52  ;;  %v1425_v15 = vmul.f32 1.442695, %v1308_v38  ;;  %v5726_v11 = vpop.eup %3628  ;;  %v1848_v5 = vmul.f32 %v5608_v51, %v1847_v40  ;;  %v1427_v27 = vmul.f32 1.442695, %v1309_v3 }
 0x1e0   : > { %v1311_v45 = vsub.f32 0.0, %v1247_v12  ;;  %v2578_v63 = vmul.f32 %v2390_v22, %v2130_v49  ;;  %v1857_v36 = vmul.f32 %v5613_v59, %v1856_v6  ;;  %vm5730_vm10 = vcmp.lt.f32.partialorder %v1858_v8, 0.0004427343  ;;  %v6750_v20 = vld [vmem:[#allocation65_spill] sm:$0xff] }
 0x1e1   : > { %3640 = vpow2.f32 %v1423_v18  ;;  %v1310_v31 = vsub.f32 0.0, %v1246_v55  ;;  %v3631_v30 = vpop.eup %3630  ;;  %v5736_v38 = vmin.f32 %v892_v9, 0.0  ;;  %v1312_v50 = vsub.f32 0.0, %v1248_v42 }
 0x1e2   : > { %3642 = vlog2.f32 %v1879_v46  ;;  %v6422_v51 = vsub.f32 0.0, %v6750_v20  ;;  %2793 = vperm.xlu0 %3405, %v2578_v63   ;;  %v1866_v40 = vmul.f32 %v5642_v52, %v1865_v61  ;;  %vm5740_vm12 = vcmp.lt.f32.partialorder %v1867_v33, 0.0004427343  ;;  %v6754_v61 = vld [vmem:[#allocation22_spill] sm:$0xff] }
 0x1e3   : > { %v1874_v8 = vadd.f32 1.0, %v1873_v39  ;;  %v1888_v3 = vadd.f32 1.0, %v5726_v11  ;;  %3644 = vpow2.f32 %v1425_v15  ;;  %v3633_v12 = vpop.eup %3632  ;;  %v1845_v22 = vmul.f32 0.6931472, %v3627_v17 }
 0x1e4   : > { %v1876_v53 = vand.u32 2147483647, %v5675_v21  ;;  %3646 = vpow2.f32 %v1427_v27  ;;  %v1431_v9 = vmul.f32 1.442695, %v1311_v45  ;;  %v1854_v6 = vmul.f32 0.6931472, %v3631_v30 }
 0x1e5   : > { %v1882_v18 = vmul.f32 -0.5, %v5695_v62  ;;  %v5749_v52 = vmin.f32 %v893_v43, 0.0  ;;  %v1429_v55 = vmul.f32 1.442695, %v1310_v31  ;;  %v5751_v49 = vpop.eup %3634  ;;  %v5755_v46 = vmin.f32 %v894_v1, 0.0  ;;  %v6759_v30 = vld [vmem:[#allocation36_spill] sm:$0xff] }
 0x1e6   : > { %v1433_v42 = vmul.f32 1.442695, %v1312_v50  ;;  %v1249_v17 = vand.u32 2147483647, %v6422_v51  ;;  %v6421_v33 = vsub.f32 0.0, %v6754_v61  ;;  %v5761_v39 = vmul.f32 %v5675_v21, %v1874_v8  ;;  %v6760_v8 = vld [vmem:[#allocation68_spill] sm:$0xff] }
 0x1e7   : > { %6753 = vst [vmem:[#allocation17_spill] sm:$0xff] %v5755_v46  ;;  %v1885_v57 = vand.u32 2147483647, %v5695_v62  ;;  %3648 = vlog2.f32 %v1888_v3  ;;  %v5766_v43 = vmin.f32 %v895_v54, 0.0  ;;  %v5768_v15 = vpop.eup %3636  ;;  %v1851_v47 = vsel %vm5720_vm9, %v1848_v5, %v1845_v22 }
 0x1e8   : > { %v1863_v1 = vmul.f32 0.6931472, %v3633_v12  ;;  %vm5772_vm13 = vcmp.lt.f32.partialorder %v1876_v53, 0.0004427343  ;;  %v1891_v21 = vmul.f32 -0.5, %v5726_v11  ;;  %3650 = vpow2.f32 %v1431_v9  ;;  %v6761_v12 = vld [vmem:[#allocation48_spill] sm:$0xff] }
 0x1e9   : > { %6755 = vst [vmem:[#allocation16_spill] sm:$0xff] %v5766_v43  ;;  %v1860_v45 = vsel %vm5730_vm10, %v1857_v36, %v1854_v6  ;;  %v1883_v63 = vadd.f32 1.0, %v1882_v18  ;;  %v1897_v0 = vadd.f32 1.0, %v5751_v49  ;;  %3652 = vpow2.f32 %v1429_v55  ;;  %v3639_v54 = vpop.eup %3638  ;;  %v6764_v55 = vld [vmem:[#allocation31_spill] sm:$0xff] }
 0x1ea   : > { %v5782_v41 = vmin.f32 %v896_v35, 0.0  ;;  %3654 = vpow2.f32 %v1433_v42  ;;  %v1313_v5 = vsub.f32 0.0, %v1249_v17  ;;  %v1250_v31 = vand.u32 2147483647, %v6421_v33 }
 0x1eb   : > { %v5787_v50 = vsub.f32 %v1851_v47, %v6759_v30  ;;  %v1900_v19 = vmul.f32 -0.5, %v5751_v49  ;;  %v1906_v36 = vadd.f32 1.0, %v5768_v15  ;;  %v6420_v3 = vsub.f32 0.0, %v6760_v8 }
 0x1ec   : > { %6758 = vst [vmem:[#allocation18_spill] sm:$0xff] %v5782_v41  ;;  %v5793_v22 = vsub.f32 %v1860_v45, %v6761_v12  ;;  %v1869_v34 = vsel %vm5740_vm12, %v1866_v40, %v1863_v1  ;;  %v1892_v35 = vadd.f32 1.0, %v1891_v21  ;;  %v1909_v53 = vmul.f32 -0.5, %v5768_v15 }
 0x1ed   : > { %v1872_v9 = vmul.f32 0.6931472, %v3639_v54  ;;  %v1884_v6 = vmul.f32 %v5695_v62, %v1883_v63  ;;  %vm5799_vm14 = vcmp.lt.f32.partialorder %v1885_v57, 0.0004427343  ;;  %3656 = vlog2.f32 %v1897_v0  ;;  %v5816_v63 = vpop.permute.xlu1 %1111 }
 0x1ee   : > { %v6423_v42 = vsub.f32 0.0, %v6764_v55  ;;  %v5804_v17 = vpop.eup %3640  ;;  %v1894_v47 = vand.u32 2147483647, %v5726_v11  ;;  %v5809_v40 = vmin.f32 %v897_v32, 0.0  ;;  %v1435_v59 = vmul.f32 1.442695, %v1313_v5 }
 0x1ef   : > { %v1314_v1 = vsub.f32 0.0, %v1250_v31  ;;  %v3643_v21 = vpop.eup %3642  ;;  %v5812_v62 = vsub.f32 %v1869_v34, %v5556_v58  ;;  %v1901_v57 = vadd.f32 1.0, %v1900_v19  ;;  %3658 = vlog2.f32 %v1906_v36  ;;  %v6765_v34 = vld [vmem:[#allocation69_spill] sm:$0xff] }
 0x1f0   : > { %v1251_v45 = vand.u32 2147483647, %v6420_v3  ;;  %v5818_v0 = vpop.eup %3644  ;;  %v5821_v54 = vmul.f32 %v5726_v11, %v1892_v35  ;;  %v1903_v56 = vand.u32 2147483647, %v5751_v49  ;;  %v1910_v32 = vadd.f32 1.0, %v1909_v53 }
 0x1f1   : > { %v1912_v5 = vand.u32 2147483647, %v5768_v15  ;;  %v5825_v31 = vpop.eup %3646  ;;  %v1878_v58 = vsel %vm5772_vm13, %v5761_v39, %v1872_v9  ;;  %v1915_v30 = vadd.f32 1.0, %v5804_v17  ;;  %v1918_v19 = vmul.f32 -0.5, %v5804_v17  ;;  %v6768_v9 = vld [vmem:[#allocation14_spill] sm:$0xff]  ;;  %v5856_v33 = vpop.permute.xlu1 %1114 }
 0x1f2   : > { %v1252_v36 = vand.u32 2147483647, %v6423_v42  ;;  %v1881_v11 = vmul.f32 0.6931472, %v3643_v21  ;;  %3660 = vpow2.f32 %v1435_v59  ;;  %v1437_v12 = vmul.f32 1.442695, %v1314_v1 }
 0x1f3   : > { %vm5835_vm15 = vcmp.lt.f32.partialorder %v1894_v47, 0.0004427343  ;;  %v5840_v3 = vmul.f32 %v5751_v49, %v1901_v57  ;;  %v1927_v39 = vmul.f32 -0.5, %v5818_v0  ;;  %v1315_v27 = vsub.f32 0.0, %v1251_v45 }
 0x1f4   : > { %v3649_v51 = vpop.eup %3648  ;;  %v5845_v42 = vsub.f32 %v1878_v58, %v5559_v14  ;;  %v1936_v1 = vmul.f32 -0.5, %v5825_v31  ;;  %v6770_v47 = vsub.f32 0.0, %v6744_v48  ;;  %3662 = vlog2.f32 %v1915_v30 }
 0x1f5   : > { %v5853_v35 = vpop.eup %3650  ;;  %v1919_v49 = vadd.f32 1.0, %v1918_v19  ;;  %v1924_v57 = vadd.f32 1.0, %v5818_v0  ;;  %v1316_v45 = vsub.f32 0.0, %v1252_v36  ;;  %v1887_v14 = vsel %vm5799_vm14, %v1884_v6, %v1881_v11 }
 0x1f6   : > { %6769 = vst [vmem:[#allocation19_spill] sm:$0xff] %v5845_v42  ;;  %v5851_v21 = vmin.f32 %v6770_v47, 0.0  ;;  %v5858_v41 = vpop.eup %3652  ;;  %v1933_v58 = vadd.f32 1.0, %v5825_v31  ;;  %3664 = vpow2.f32 %v1437_v12  ;;  %v6771_v48 = vsub.f32 0.0, %v6765_v34  ;;  %v6778_v34 = vld [vmem:[#allocation23_spill] sm:$0xff] }
 0x1f7   : > { %v5865_v59 = vpop.eup %3654  ;;  %v5868_v30 = vmul.f32 %v5768_v15, %v1910_v32  ;;  %v1928_v19 = vadd.f32 1.0, %v1927_v39  ;;  %v1439_v36 = vmul.f32 1.442695, %v1315_v27  ;;  %v6772_v43 = vsub.f32 0.0, %v6768_v9  ;;  %v1109_v39 = vpop.permute.xlu0 %1108 }
 0x1f8   : > { %v1253_v47 = vand.u32 2147483647, %v6771_v48  ;;  %v1890_v42 = vmul.f32 0.6931472, %v3649_v51  ;;  %vm5872_vm0 = vcmp.lt.f32.partialorder %v1903_v56, 0.0004427343  ;;  %v5879_v48 = vsub.f32 %v1887_v14, %v5625_v29  ;;  %v5882_v27 = vpop.permute.xlu1 %1120 }
 0x1f9   : > { %v1254_v55 = vand.u32 2147483647, %v6772_v43  ;;  %v1937_v11 = vadd.f32 1.0, %v1936_v1  ;;  %v1951_v12 = vadd.f32 1.0, %v5853_v35  ;;  %3666 = vlog2.f32 %v1924_v57 }
 0x1fa   : > { %v1945_v15 = vmul.f32 -0.5, %v5858_v41  ;;  %v1441_v32 = vmul.f32 1.442695, %v1316_v45  ;;  %v3657_v51 = vpop.eup %3656  ;;  %vm5884_vm1 = vcmp.lt.f32.partialorder %v1912_v5, 0.0004427343  ;;  %v5889_v56 = vmul.f32 %v5804_v17, %v1919_v49 }
 0x1fb   : > { %3668 = vlog2.f32 %v1933_v58  ;;  %v1960_v1 = vadd.f32 1.0, %v5865_v59  ;;  %v1317_v29 = vsub.f32 0.0, %v1253_v47  ;;  %v5893_v57 = vmul.f32 %v5818_v0, %v1928_v19  ;;  %v1118_v45 = vpop.permute.xlu0 %1117 }
 0x1fc   : > { %3670 = vpow2.f32 %v1439_v36  ;;  %v1318_v14 = vsub.f32 0.0, %v1254_v55  ;;  %v3659_v6 = vpop.eup %3658  ;;  %v1896_v5 = vsel %vm5835_vm15, %v5821_v54, %v1890_v42  ;;  %v5900_v9 = vmul.f32 %v5825_v31, %v1937_v11  ;;  %v5906_v36 = vpop.permute.xlu1 %1126 }
 0x1fd   : > { %v1942_v49 = vadd.f32 1.0, %v5858_v41  ;;  %3672 = vlog2.f32 %v1951_v12  ;;  %v5903_v58 = vmul.f32 0.6931472, %v3657_v51  ;;  %v1946_v47 = vadd.f32 1.0, %v1945_v15 }
 0x1fe   : > { %6777 = vst [vmem:[#allocation20_spill] sm:$0xff] %v5900_v9  ;;  %3674 = vpow2.f32 %v1441_v32  ;;  %v1443_v55 = vmul.f32 1.442695, %v1317_v29  ;;  %v1136_v53 = vrot.slane %v1109_v39, %v6778_v34  ;;  %v1140_v42 = vrot.slane %v5816_v63, %v6778_v34 }
 0x1ff   : > { %3676 = vlog2.f32 %v1960_v1  ;;  %v5911_v54 = vpop.eup %3660  ;;  %v1908_v11 = vmul.f32 0.6931472, %v3659_v6  ;;  %v1445_v12 = vmul.f32 1.442695, %v1318_v14  ;;  %vm1165_vm2 = vcmask 1041409   ;;  %v1124_v29 = vpop.permute.xlu0 %1123  ;;  %v1183_v6 = vld [vmem:[#allocation3] sm:$0xff] }
 0x200   : > { %v1144_v15 = vrot.slane %v5856_v33, %v6778_v34  ;;  %v2136_v32 = vsub.f32 %v1896_v5, %v5640_v7  ;;  %3678 = vlog2.f32 %v1942_v49  ;;  %vm1167_vm3 = vcmask 1042434  }
 0x201   : > { %v1148_v51 = vrot.slane %v1118_v45, %v6778_v34  ;;  %v1905_v39 = vsel %vm5872_vm0, %v5840_v3, %v5903_v58  ;;  %v6779_v63 = vand.u32 2147483647, %v5804_v17  ;;  %v5928_v1 = vmul.f32 %v5858_v41, %v1946_v47  ;;  %v5934_v45 = vpop.permute.xlu1 %2205  ;;  %v3663_v14 = vpop.eup %3662 }
 0x202   : > { %v6783_v7 = vsub.f32 0.0, %v6750_v20  ;;  %vm1169_vm5 = vcmask 1043459   ;;  %v1969_v3 = vadd.f32 1.0, %v5911_v54  ;;  %v6784_v17 = vsub.f32 0.0, %v6754_v61 }
 0x203   : > { %vm5923_vm4 = vcmp.lt.f32.partialorder %v6779_v63, 0.0004427343  ;;  %6782 = vst [vmem:[#allocation4_spill] sm:$0xff] %v5928_v1  ;;  %3680 = vpow2.f32 %v1443_v55  ;;  %v1166_v5 = vsel %vm1165_vm2, %v1140_v42, %v1136_v53  ;;  %v5942_v49 = vpop.eup %3664  ;;  %v1914_v20 = vsel %vm5884_vm1, %v5868_v30, %v1908_v11  ;;  %v5957_v30 = vpop.permute.xlu0 %2198 }
 0x204   : > { %v5932_v33 = vmin.f32 %v6783_v7, 0.0  ;;  %v5939_v18 = vmin.f32 %v6784_v17, 0.0  ;;  %3682 = vpow2.f32 %v1445_v12  ;;  %v1168_v58 = vsel %vm1167_vm3, %v1144_v15, %v1166_v5 }
 0x205   : > { %v1152_v47 = vrot.slane %v5882_v27, %v6778_v34  ;;  %v1954_v63 = vmul.f32 -0.5, %v5853_v35  ;;  %v1170_v61 = vsel %vm1169_vm5, %v1148_v51, %v1168_v58  ;;  %vm1171_vm6 = vcmask 1044484   ;;  %v2665_v11 = vpop.permute.xlu1 %2664 }
 0x206   : > { %6785 = vst [vmem:[#allocation29_spill] sm:$0xff] %v5939_v18  ;;  %v1156_v55 = vrot.slane %v1124_v29, %v6778_v34  ;;  %v5953_v53 = vmul.f32 0.6931472, %v3663_v14  ;;  %v1957_v42 = vand.u32 2147483647, %v5853_v35  ;;  %v1963_v43 = vmul.f32 -0.5, %v5865_v59  ;;  %v5959_v12 = vpop.eup %3666 }
 0x207   : > { %vm1173_vm7 = vcmask 1045509   ;;  %3684 = vlog2.f32 %v1969_v3  ;;  %v1978_v27 = vadd.f32 1.0, %v5942_v49  ;;  %v2414_v15 = vrot.slane %v5957_v30, %v6659_v23  ;;  %v1130_v9 = vpop.permute.xlu0 %1129 }
 0x208   : > { %v2410_v51 = vrot.slane %v5957_v30, %v6640_v28  ;;  %v5966_v7 = vpop.eup %3668  ;;  %v1172_v29 = vsel %vm1171_vm6, %v1152_v47, %v1170_v61  ;;  %vm1175_vm9 = vcmask 1046534   ;;  %v1160_v14 = vrot.slane %v5906_v36, %v6778_v34 }
 0x209   : > { %v2394_v17 = vrot.slane %v5573_v10, %v6660_v26  ;;  %v5973_v3 = vpop.eup %3670  ;;  %v1174_v5 = vsel %vm1173_vm7, %v1156_v55, %v1172_v29  ;;  %v2584_v58 = vmul.f32 %v2414_v15, %v2136_v32  ;;  %v2370_v1 = vrot.slane %v5487_v24, %v6668_v16  ;;  %v2671_v8 = vpop.permute.xlu1 %2670 }
 0x20a   : > { %v2583_v19 = vmul.f32 %v2410_v51, %v5879_v48  ;;  %v3673_v18 = vpop.eup %3672  ;;  %v2137_v47 = vsub.f32 %v1905_v39, %v5671_v60  ;;  %v5981_v61 = vsub.f32 %v1914_v20, %v5736_v38  ;;  %v1955_v36 = vadd.f32 1.0, %v1954_v63  ;;  %v905_v38 = vld [vmem:[#allocation2] sm:$0xff] }
 0x20b   : > { %vm1177_vm10 = vcmask 1047559   ;;  %v5983_v46 = vpop.eup %3674  ;;  %vm5989_vm12 = vcmp.lt.f32.partialorder %v1957_v42, 0.0004427343  ;;  %v1964_v55 = vadd.f32 1.0, %v1963_v43  ;;  %v1164_v60 = vrot.slane %v1130_v9, %v6778_v34  ;;  %2811 = vperm.xlu0 %3405, %v2584_v58  }
 0x20c   : > { %2808 = vperm.xlu1 %3406, %v2583_v19   ;;  %v3677_v39 = vpop.eup %3676  ;;  %3686 = vlog2.f32 %v1978_v27  ;;  %v1987_v20 = vadd.f32 1.0, %v5973_v3  ;;  %v1176_v63 = vsel %vm1175_vm9, %v1160_v14, %v1174_v5  ;;  %v2374_v15 = vrot.slane %v5487_v24, %v6678_v4  ;;  %v2668_v14 = vpop.permute.xlu0 %2667 }
 0x20d   : > { %v1178_v42 = vsel %vm1177_vm10, %v1164_v60, %v1176_v63  ;;  %v2579_v51 = vmul.f32 %v2394_v17, %v5787_v50  ;;  %v2573_v43 = vmul.f32 %v2370_v1, %v5611_v13  ;;  %v2418_v9 = vrot.slane %v5957_v30, %v6647_v2  ;;  %v6003_v19 = vpop.eup %3678  ;;  %v2677_v5 = vpop.permute.xlu1 %2676 }
 0x20e   : > { %v1953_v29 = vmul.f32 0.6931472, %v3673_v18  ;;  %v1956_v27 = vmul.f32 %v5853_v35, %v1955_v36  ;;  %v1966_v58 = vand.u32 2147483647, %v5865_v59  ;;  %v1180_v48 = vadd.f32 %v1178_v42, %v905_v38 }
 0x20f   : > { %v1962_v24 = vmul.f32 0.6931472, %v3677_v39  ;;  %v1996_v60 = vadd.f32 1.0, %v5983_v46  ;;  %v2858_v50 = vrot.slane %v2665_v11, %v6778_v34  ;;  %v2862_v13 = vrot.slane %v2668_v14, %v6778_v34  ;;  %2796 = vperm.xlu0 %3405, %v2579_v51  }
 0x210   : > { %2778 = vperm.xlu1 %3406, %v2573_v43   ;;  %v6010_v1 = vpop.eup %3680  ;;  %v1965_v18 = vmul.f32 %v5865_v59, %v1964_v55  ;;  %3688 = vlog2.f32 %v1987_v20  ;;  %v2866_v35 = vrot.slane %v2671_v8, %v6778_v34  ;;  %v2398_v17 = vrot.slane %v5573_v10, %v6673_v37  ;;  %1182 = vst.msk [vmem:[#allocation2] sm:$0xff] %vm301_vm8, %v1180_v48 }
 0x211   : > { %v6017_v36 = vpop.eup %3682  ;;  %v3111_v11 = vsel %vm1165_vm2, %v2862_v13, %v2858_v50  ;;  %v2574_v38 = vmul.f32 %v2374_v15, %v5714_v25  ;;  %v2585_v39 = vmul.f32 %v2418_v9, %v2137_v47  ;;  %v2422_v63 = vrot.slane %v5957_v30, %v6667_v44  ;;  %v2674_v47 = vpop.permute.xlu0 %2673 }
 0x212   : > { %v6024_v59 = vmul.f32 0.6931472, %v5959_v12  ;;  %v6788_v8 = vand.u32 2147483647, %v5818_v0  ;;  %v1959_v48 = vsel %vm5989_vm12, %v1956_v27, %v1953_v29  ;;  %vm6034_vm14 = vcmp.lt.f32.partialorder %v1966_v58, 0.0004427343  ;;  %v2683_v15 = vpop.permute.xlu1 %2682 }
 0x213   : > { %v1972_v25 = vmul.f32 -0.5, %v5911_v54  ;;  %v1968_v12 = vsel %vm6034_vm14, %v1965_v18, %v1962_v24  ;;  %3690 = vlog2.f32 %v1996_v60  ;;  %v2005_v0 = vadd.f32 1.0, %v6010_v1  ;;  %2781 = vperm.xlu0 %3405, %v2574_v38  }
 0x214   : > { %vm6028_vm13 = vcmp.lt.f32.partialorder %v6788_v8, 0.0004427343  ;;  %v2870_v42 = vrot.slane %v2674_v47, %v6778_v34  ;;  %2814 = vperm.xlu1 %3406, %v2585_v39   ;;  %v3685_v32 = vpop.eup %3684  ;;  %v2014_v51 = vadd.f32 1.0, %v6017_v36  ;;  %v3112_v43 = vsel %vm1167_vm3, %v2866_v35, %v3111_v11 }
 0x215   : > { %v2874_v9 = vrot.slane %v2677_v5, %v6778_v34  ;;  %v2580_v29 = vmul.f32 %v2398_v17, %v5793_v22  ;;  %v2586_v58 = vmul.f32 %v2422_v63, %v5981_v61  ;;  %v2446_v14 = vrot.slane %v5934_v45, %v6659_v23  ;;  %v2680_v5 = vpop.permute.xlu0 %2679 }
 0x216   : > { %v3113_v27 = vsel %vm1169_vm5, %v2870_v42, %v3112_v43  ;;  %v2442_v24 = vrot.slane %v5934_v45, %v6640_v28  ;;  %v2143_v60 = vsub.f32 %v1959_v48, %v5809_v40  ;;  %v1973_v50 = vadd.f32 1.0, %v1972_v25  ;;  %v6056_v35 = vpop.permute.xlu1 %2688 }
 0x217   : > { %v1975_v13 = vand.u32 2147483647, %v5911_v54  ;;  %v1981_v18 = vmul.f32 -0.5, %v5942_v49  ;;  %v2144_v22 = vsub.f32 %v1968_v12, %v5851_v21  ;;  %v1971_v17 = vmul.f32 0.6931472, %v3685_v32  ;;  %2817 = vperm.xlu0 %3405, %v2586_v58  }
 0x218   : > { %3692 = vlog2.f32 %v2005_v0  ;;  %v2878_v61 = vrot.slane %v2680_v5, %v6778_v34  ;;  %2799 = vperm.xlu1 %3406, %v2580_v29   ;;  %v3114_v28 = vsel %vm1171_vm6, %v2874_v9, %v3113_v27  ;;  %v2882_v23 = vrot.slane %v2683_v15, %v6778_v34 }
 0x219   : > { %3694 = vlog2.f32 %v2014_v51  ;;  %v2402_v40 = vrot.slane %v5573_v10, %v6668_v16  ;;  %v3687_v11 = vpop.eup %3686  ;;  %v2592_v39 = vmul.f32 %v2446_v14, %v2144_v22  ;;  %v2591_v63 = vmul.f32 %v2442_v24, %v2143_v60  ;;  %v2686_v0 = vpop.permute.xlu0 %2685  ;;  %v6804_v22 = vld [vmem:[#allocation17_spill] sm:$0xff] }
 0x21a   : > { %v3115_v38 = vsel %vm1173_vm7, %v2878_v61, %v3114_v28  ;;  %v2426_v21 = vrot.slane %v5957_v30, %v6660_v26  ;;  %v6793_v8 = vsel %vm5923_vm4, %v5889_v56, %v5953_v53  ;;  %v6794_v20 = vand.u32 2147483647, %v5825_v31  ;;  %v6081_v42 = vpop.permute.xlu1 %2694  ;;  %v6805_v61 = vld [vmem:[#allocation68_spill] sm:$0xff] }
 0x21b   : > { %v2139_v48 = vsub.f32 %v6793_v8, %v5749_v52  ;;  %v1974_v47 = vmul.f32 %v5911_v54, %v1973_v50  ;;  %v1982_v15 = vadd.f32 1.0, %v1981_v18  ;;  %v1990_v12 = vmul.f32 -0.5, %v5973_v3  ;;  %2835 = vperm.xlu0 %3405, %v2592_v39  }
 0x21c   : > { %vm6075_vm15 = vcmp.lt.f32.partialorder %v6794_v20, 0.0004427343  ;;  %v1932_v56 = vsel %vm6028_vm13, %v5893_v57, %v6024_v59  ;;  %vm6087_vm0 = vcmp.lt.f32.partialorder %v1975_v13, 0.0004427343  ;;  %v1984_v31 = vand.u32 2147483647, %v5942_v49  ;;  %2832 = vperm.xlu1 %3406, %v2591_v63  }
 0x21d   : > { %v2886_v54 = vrot.slane %v2686_v0, %v6778_v34  ;;  %v1977_v53 = vsel %vm6087_vm0, %v1974_v47, %v1971_v17  ;;  %v1980_v32 = vmul.f32 0.6931472, %v3687_v11  ;;  %v3116_v51 = vsel %vm1175_vm9, %v2882_v23, %v3115_v38  ;;  %v3689_v59 = vpop.eup %3688  ;;  %v6104_v60 = vpop.permute.xlu0 %2691  ;;  %v6809_v0 = vld [vmem:[#allocation29_spill] sm:$0xff] }
 0x21e   : > { %v2406_v57 = vrot.slane %v5573_v10, %v6678_v4  ;;  %v2587_v43 = vmul.f32 %v2426_v21, %v2139_v48  ;;  %v2581_v9 = vmul.f32 %v2402_v40, %v5812_v62  ;;  %v2450_v29 = vrot.slane %v5934_v45, %v6647_v2  ;;  %v6106_v50 = vpop.permute.xlu1 %2712  ;;  %v6817_v62 = vld [vmem:[#allocation4_spill] sm:$0xff] }
 0x21f   : > { %v3117_v55 = vsel %vm1177_vm10, %v2886_v54, %v3116_v51  ;;  %v1983_v27 = vmul.f32 %v5942_v49, %v1982_v15  ;;  %v1991_v58 = vadd.f32 1.0, %v1990_v12  ;;  %v1999_v14 = vmul.f32 -0.5, %v5983_v46  ;;  %v6808_v15 = vld [vmem:[#allocation20_spill] sm:$0xff] }
 0x220   : > { %v3175_v24 = vadd.f32 %v3117_v55, %v1183_v6  ;;  %v1935_v10 = vmul.f32 0.6931472, %v5966_v7  ;;  %v6799_v13 = vand.u32 2147483647, %v5858_v41  ;;  %v2145_v2 = vsub.f32 %v1977_v53, %v5932_v33  ;;  %2820 = vperm.xlu0 %3405, %v2587_v43   ;;  %2802 = vperm.xlu1 %3406, %v2581_v9   ;;  %v3691_v5 = vpop.eup %3690  ;;  %v6807_v33 = vld [vmem:[#allocation19_spill] sm:$0xff]  ;;  %v6814_v9 = vld [vmem:[#allocation16_spill] sm:$0xff] }
 0x221   : > { %vm6116_vm4 = vcmp.lt.f32.partialorder %v1984_v31, 0.0004427343  ;;  %v1993_v49 = vand.u32 2147483647, %v5973_v3  ;;  %v2140_v17 = vsub.f32 %v1932_v56, %v6804_v22  ;;  %v1989_v7 = vmul.f32 0.6931472, %v3689_v59  ;;  %v6135_v20 = vpop.permute.xlu0 %2697 }
 0x222   : > { %vm6111_vm1 = vcmp.lt.f32.partialorder %v6799_v13, 0.0004427343  ;;  %v1986_v41 = vsel %vm6116_vm4, %v1983_v27, %v1980_v32  ;;  %v6806_v28 = vsub.f32 0.0, %v6805_v61  ;;  %3184 = vst.msk [vmem:[#allocation3] sm:$0xff] %vm303_vm11, %v3175_v24  ;;  %v2582_v40 = vmul.f32 %v2406_v57, %v6807_v33  ;;  %v6137_v47 = vpop.permute.xlu1 %2700  ;;  %v6812_v53 = vld [vmem:[#allocation31_spill] sm:$0xff] }
 0x223   : > { %v2593_v11 = vmul.f32 %v2450_v29, %v2145_v2  ;;  %v2454_v38 = vrot.slane %v5934_v45, %v6667_v44  ;;  %v2430_v39 = vrot.slane %v5957_v30, %v6673_v37  ;;  %v1992_v63 = vmul.f32 %v5973_v3, %v1991_v58 }
 0x224   : > { %v2083_v23 = vmin.f32 %v6806_v28, 0.0  ;;  %v2000_v21 = vadd.f32 1.0, %v1999_v14  ;;  %v2008_v8 = vmul.f32 -0.5, %v6010_v1  ;;  %v2017_v48 = vmul.f32 -0.5, %v6017_v36  ;;  %2805 = vperm.xlu0 %3405, %v2582_v40   ;;  %v6818_v40 = vld [vmem:[#allocation18_spill] sm:$0xff] }
 0x225   : > { %v1941_v12 = vsel %vm6075_vm15, %v6808_v15, %v1935_v10  ;;  %v2146_v44 = vsub.f32 %v1986_v41, %v6809_v0  ;;  %vm6143_vm12 = vcmp.lt.f32.partialorder %v1993_v49, 0.0004427343  ;;  %v2002_v3 = vand.u32 2147483647, %v5983_v46  ;;  %2838 = vperm.xlu1 %3406, %v2593_v11   ;;  %v3693_v52 = vpop.eup %3692  ;;  %v6159_v14 = vpop.permute.xlu0 %2715 }
 0x226   : > { %v1944_v31 = vmul.f32 0.6931472, %v6003_v19  ;;  %v1995_v6 = vsel %vm6143_vm12, %v1992_v63, %v1989_v7  ;;  %v1998_v54 = vmul.f32 0.6931472, %v3691_v5  ;;  %v6813_v25 = vsub.f32 0.0, %v6812_v53  ;;  %v3695_v51 = vpop.eup %3694  ;;  %v2704_v24 = vpop.permute.xlu1 %2703 }
 0x227   : > { %v2594_v57 = vmul.f32 %v2454_v38, %v2146_v44  ;;  %v2588_v59 = vmul.f32 %v2430_v39, %v2140_v17  ;;  %v2458_v55 = vrot.slane %v5934_v45, %v6660_v26  ;;  %v2434_v43 = vrot.slane %v5957_v30, %v6668_v16 }
 0x228   : > { %v2084_v32 = vmin.f32 %v6813_v25, 0.0  ;;  %v2141_v29 = vsub.f32 %v1941_v12, %v6814_v9  ;;  %v2001_v19 = vmul.f32 %v5983_v46, %v2000_v21  ;;  %v2009_v27 = vadd.f32 1.0, %v2008_v8  ;;  %v6821_v8 = vld [vmem:[#allocation14_spill] sm:$0xff] }
 0x229   : > { %v2018_v58 = vadd.f32 1.0, %v2017_v48  ;;  %v2147_v10 = vsub.f32 %v1995_v6, %v2083_v23  ;;  %vm6161_vm13 = vcmp.lt.f32.partialorder %v2002_v3, 0.0004427343  ;;  %v2011_v2 = vand.u32 2147483647, %v6010_v1  ;;  %2841 = vperm.xlu0 %3405, %v2594_v57   ;;  %2823 = vperm.xlu1 %3406, %v2588_v59   ;;  %v6178_v33 = vpop.permute.xlu0 %2718 }
 0x22a   : > { %v2020_v26 = vand.u32 2147483647, %v6017_v36  ;;  %v1950_v46 = vsel %vm6111_vm1, %v6817_v62, %v1944_v31  ;;  %v2004_v49 = vsel %vm6161_vm13, %v2001_v19, %v1998_v54  ;;  %v2007_v5 = vmul.f32 0.6931472, %v3693_v52  ;;  %v6180_v18 = vpop.permute.xlu1 %2736 }
 0x22b   : > { %v2016_v22 = vmul.f32 0.6931472, %v3695_v51  ;;  %v2595_v17 = vmul.f32 %v2458_v55, %v2147_v10  ;;  %v2589_v41 = vmul.f32 %v2434_v43, %v2141_v29  ;;  %v2462_v7 = vrot.slane %v5934_v45, %v6673_v37  ;;  %v6819_v37 = vld [vmem:[#allocation69_spill] sm:$0xff] }
 0x22c   : > { %v2438_v61 = vrot.slane %v5957_v30, %v6678_v4  ;;  %v2010_v28 = vmul.f32 %v6010_v1, %v2009_v27  ;;  %v2019_v23 = vmul.f32 %v6017_v36, %v2018_v58  ;;  %v2142_v11 = vsub.f32 %v1950_v46, %v6818_v40 }
 0x22d   : > { %v2148_v38 = vsub.f32 %v2004_v49, %v2084_v32  ;;  %vm2012_vm14 = vcmp.lt.f32.partialorder %v2011_v2, 0.0004427343  ;;  %vm2021_vm15 = vcmp.lt.f32.partialorder %v2020_v26, 0.0004427343  ;;  %2844 = vperm.xlu0 %3405, %v2595_v17   ;;  %2826 = vperm.xlu1 %3406, %v2589_v41   ;;  %v6820_v63 = vsub.f32 0.0, %v6819_v37  ;;  %v2722_v44 = vpop.permute.xlu0 %2721  ;;  %v1185_v37 = vld [vmem:[#allocation3 + $0x10] sm:$0xff] }
 0x22e   : > { %v2013_v39 = vsel %vm2012_vm14, %v2010_v28, %v2007_v5  ;;  %v2022_v30 = vsel %vm2021_vm15, %v2019_v23, %v2016_v22  ;;  %v6822_v1 = vsub.f32 0.0, %v6821_v8  ;;  %v2590_v15 = vmul.f32 %v2438_v61, %v2142_v11  ;;  %v2707_v56 = vpop.permute.xlu1 %2706 }
 0x22f   : > { %v2085_v21 = vmin.f32 %v6820_v63, 0.0  ;;  %v2596_v36 = vmul.f32 %v2462_v7, %v2148_v38  ;;  %v2470_v12 = vrot.slane %v5934_v45, %v6678_v4  ;;  %v2466_v0 = vrot.slane %v5934_v45, %v6668_v16 }
 0x230   : > { %v2086_v48 = vmin.f32 %v6822_v1, 0.0  ;;  %v2894_v31 = vrot.slane %v6104_v60, %v6778_v34  ;;  %v2890_v4 = vrot.slane %v6056_v35, %v6778_v34  ;;  %v2898_v16 = vrot.slane %v6081_v42, %v6778_v34 }
 0x231   : > { %v2149_v3 = vsub.f32 %v2013_v39, %v2085_v21  ;;  %2847 = vperm.xlu0 %3405, %v2596_v36   ;;  %2829 = vperm.xlu1 %3406, %v2590_v15   ;;  %v6193_v53 = vpop.permute.xlu0 %2739  ;;  %v2902_v32 = vrot.slane %v6135_v20, %v6778_v34  ;;  %v2906_v60 = vrot.slane %v6137_v47, %v6778_v34  ;;  %v1184_v20 = vld [vmem:[#allocation3 + $0x8] sm:$0xff] }
 0x232   : > { %v2150_v52 = vsub.f32 %v2022_v30, %v2086_v48  ;;  %v6195_v25 = vpop.permute.xlu1 %2742  ;;  %v3118_v45 = vsel %vm1165_vm2, %v2894_v31, %v2890_v4  ;;  %v2910_v59 = vrot.slane %v2704_v24, %v6778_v34  ;;  %v2914_v35 = vrot.slane %v2707_v56, %v6778_v34 }
 0x233   : > { %v2597_v54 = vmul.f32 %v2466_v0, %v2149_v3  ;;  %v3119_v55 = vsel %vm1167_vm3, %v2898_v16, %v3118_v45  ;;  %v2926_v26 = vrot.slane %v6159_v14, %v6778_v34  ;;  %v2930_v5 = vrot.slane %v6178_v33, %v6778_v34 }
 0x234   : > { %v2598_v6 = vmul.f32 %v2470_v12, %v2150_v52  ;;  %v3120_v43 = vsel %vm1169_vm5, %v2902_v32, %v3119_v55  ;;  %v2922_v22 = vrot.slane %v6106_v50, %v6778_v34  ;;  %v2934_v17 = vrot.slane %v2722_v44, %v6778_v34  ;;  %v3195_v44 = vld [vmem:[#allocation2] sm:$0xff] }
 0x235   : > { %2850 = vperm.xlu1 %3406, %v2597_v54   ;;  %v2725_v51 = vpop.permute.xlu0 %2724  ;;  %v3121_v42 = vsel %vm1171_vm6, %v2906_v60, %v3120_v43  ;;  %v2958_v15 = vrot.slane %v6193_v53, %v6778_v34  ;;  %v2962_v56 = vrot.slane %v6195_v25, %v6778_v34  ;;  %v2954_v3 = vrot.slane %v6180_v18, %v6778_v34 }
 0x236   : > { %2853 = vperm.xlu0 %3405, %v2598_v6   ;;  %v2728_v57 = vpop.permute.xlu1 %2727  ;;  %v3122_v19 = vsel %vm1173_vm7, %v2910_v59, %v3121_v42  ;;  %v2938_v7 = vrot.slane %v2725_v51, %v6778_v34  ;;  %v3125_v14 = vsel %vm1165_vm2, %v2926_v26, %v2922_v22  ;;  %v3196_v53 = vsel %vm301_vm8, %v3195_v44, 0.0  ;;  %v1186_v59 = vld [vmem:[#allocation3 + $0x18] sm:$0xff] }
 0x237   : > { %v3123_v47 = vsel %vm1175_vm9, %v2914_v35, %v3122_v19  ;;  %v2942_v28 = vrot.slane %v2728_v57, %v6778_v34  ;;  %v3126_v23 = vsel %vm1167_vm3, %v2930_v5, %v3125_v14  ;;  %v3132_v16 = vsel %vm1165_vm2, %v2958_v15, %v2954_v3 }
 0x238   : > { %v3127_v33 = vsel %vm1169_vm5, %v2934_v17, %v3126_v23  ;;  %v3133_v25 = vsel %vm1167_vm3, %v2962_v56, %v3132_v16 }
 0x239   : > { %v2710_v9 = vpop.permute.xlu0 %2709  ;;  %v3128_v50 = vsel %vm1171_vm6, %v2938_v7, %v3127_v33  ;;  %v1187_v7 = vld [vmem:[#allocation3 + $0x20] sm:$0xff] }
 0x23a   : > { %v2761_v29 = vpop.permute.xlu1 %2760  ;;  %v2918_v27 = vrot.slane %v2710_v9, %v6778_v34  ;;  %v3129_v39 = vsel %vm1173_vm7, %v2942_v28, %v3128_v50 }
 0x23b   : > { %v2986_v62 = vrot.slane %v2761_v29, %v6778_v34 }
 0x23c   : > { %v3124_v58 = vsel %vm1177_vm10, %v2918_v27, %v3123_v47 }
 0x23d   : > { %v3176_v24 = vadd.f32 %v3124_v58, %v1184_v20  ;;  %v2746_v10 = vpop.permute.xlu0 %2745 }
 0x23e   : > { %v2731_v13 = vpop.permute.xlu1 %2730  ;;  %v2966_v52 = vrot.slane %v2746_v10, %v6778_v34 }
 0x23f   : > { %3185 = vst.msk [vmem:[#allocation3 + $0x8] sm:$0xff] %vm303_vm11, %v3176_v24  ;;  %v2946_v40 = vrot.slane %v2731_v13, %v6778_v34 }
 0x240   : > { %v3134_v18 = vsel %vm1169_vm5, %v2966_v52, %v3133_v25 }
 0x241   : > { %v2764_v2 = vpop.permute.xlu0 %2763  ;;  %v3130_v21 = vsel %vm1175_vm9, %v2946_v40, %v3129_v39 }
 0x242   : > { %v2990_v46 = vrot.slane %v2764_v2, %v6778_v34  ;;  %v6220_v49 = vpop.permute.xlu1 %2766 }
 0x243   : > { %v2994_v47 = vrot.slane %v6220_v49, %v6778_v34 }
 0x244   : > { %v3139_v41 = vsel %vm1165_vm2, %v2990_v46, %v2986_v62 }
 0x245   : > { %v2749_v61 = vpop.permute.xlu0 %2748  ;;  %v3140_v26 = vsel %vm1167_vm3, %v2994_v47, %v3139_v41  ;;  %v1189_v47 = vld [vmem:[#allocation3 + $0x30] sm:$0xff] }
 0x246   : > { %v2752_v11 = vpop.permute.xlu1 %2751  ;;  %v2970_v54 = vrot.slane %v2749_v61, %v6778_v34 }
 0x247   : > { %v2974_v45 = vrot.slane %v2752_v11, %v6778_v34 }
 0x248   : > { %v3135_v60 = vsel %vm1171_vm6, %v2970_v54, %v3134_v18 }
 0x249   : > { %v2734_v38 = vpop.permute.xlu0 %2733  ;;  %v3136_v57 = vsel %vm1173_vm7, %v2974_v45, %v3135_v60 }
 0x24a   : > { %v2950_v63 = vrot.slane %v2734_v38, %v6778_v34  ;;  %v2785_v48 = vpop.permute.xlu1 %2784 }
 0x24b   : > { %v3018_v12 = vrot.slane %v2785_v48, %v6778_v34 }
 0x24c   : > { %v3131_v30 = vsel %vm1177_vm10, %v2950_v63, %v3130_v21 }
 0x24d   : > { %v3177_v8 = vadd.f32 %v3131_v30, %v1185_v37  ;;  %v2770_v1 = vpop.permute.xlu0 %2769 }
 0x24e   : > { %v2755_v6 = vpop.permute.xlu1 %2754  ;;  %v2998_v58 = vrot.slane %v2770_v1, %v6778_v34 }
 0x24f   : > { %3186 = vst.msk [vmem:[#allocation3 + $0x10] sm:$0xff] %vm303_vm11, %v3177_v8  ;;  %v2978_v32 = vrot.slane %v2755_v6, %v6778_v34 }
 0x250   : > { %v3141_v46 = vsel %vm1169_vm5, %v2998_v58, %v3140_v26 }
 0x251   : > { %v2788_v36 = vpop.permute.xlu0 %2787  ;;  %v3137_v35 = vsel %vm1175_vm9, %v2978_v32, %v3136_v57 }
 0x252   : > { %v3022_v0 = vrot.slane %v2788_v36, %v6778_v34  ;;  %v2791_v9 = vpop.permute.xlu1 %2790 }
 0x253   : > { %v3026_v50 = vrot.slane %v2791_v9, %v6778_v34 }
 0x254   : > { %v3146_v31 = vsel %vm1165_vm2, %v3022_v0, %v3018_v12  ;;  %v1188_v0 = vld [vmem:[#allocation3 + $0x28] sm:$0xff] }
 0x255   : > { %v2773_v4 = vpop.permute.xlu0 %2772  ;;  %v3147_v30 = vsel %vm1167_vm3, %v3026_v50, %v3146_v31 }
 0x256   : > { %v2776_v29 = vpop.permute.xlu1 %2775  ;;  %v3002_v24 = vrot.slane %v2773_v4, %v6778_v34 }
 0x257   : > { %v3006_v2 = vrot.slane %v2776_v29, %v6778_v34 }
 0x258   : > { %v3142_v5 = vsel %vm1171_vm6, %v3002_v24, %v3141_v46 }
 0x259   : > { %3197 = vadd.xlane.f32.xlu1 %v3196_v53  ;;  %v2758_v51 = vpop.permute.xlu0 %2757  ;;  %v3143_v49 = vsel %vm1173_vm7, %v3006_v2, %v3142_v5  ;;  %v3207_v2 = vld [vmem:[#allocation3 + $0x8] sm:$0xff] }
 0x25a   : > { %v2982_v55 = vrot.slane %v2758_v51, %v6778_v34 }
 0x25c   : > { %v3138_v43 = vsel %vm1177_vm10, %v2982_v55, %v3137_v35 }
 0x25d   : > { %v3178_v42 = vadd.f32 %v3138_v43, %v1186_v59  ;;  %v2794_v19 = vpop.permute.xlu0 %2793 }
 0x25e   : > { %v3030_v38 = vrot.slane %v2794_v19, %v6778_v34 }
 0x25f   : > { %3187 = vst.msk [vmem:[#allocation3 + $0x18] sm:$0xff] %vm303_vm11, %v3178_v42 }
 0x260   : > { %v3148_v1 = vsel %vm1169_vm5, %v3030_v38, %v3147_v30 }
 0x286   : > { %v2812_v20 = vpop.permute.xlu0 %2811 }
 0x287   : > { %v2809_v27 = vpop.permute.xlu1 %2808  ;;  %v3054_v54 = vrot.slane %v2812_v20, %v6778_v34 }
 0x288   : > { %v3050_v4 = vrot.slane %v2809_v27, %v6778_v34 }
 0x28a   : > { %v2797_v10 = vpop.permute.xlu0 %2796  ;;  %v3153_v18 = vsel %vm1165_vm2, %v3054_v54, %v3050_v4 }
 0x28b   : > { %v2779_v13 = vpop.permute.xlu1 %2778  ;;  %v3034_v39 = vrot.slane %v2797_v10, %v6778_v34 }
 0x28c   : > { %v3010_v62 = vrot.slane %v2779_v13, %v6778_v34 }
 0x28d   : > { %v3149_v48 = vsel %vm1171_vm6, %v3034_v39, %v3148_v1 }
 0x28e   : > { %v2782_v22 = vpop.permute.xlu0 %2781  ;;  %v3144_v14 = vsel %vm1175_vm9, %v3010_v62, %v3143_v49  ;;  %v3206_v49 = vld [vmem:[#allocation3] sm:$0xff] }
 0x28f   : > { %v2815_v17 = vpop.permute.xlu1 %2814  ;;  %v3014_v61 = vrot.slane %v2782_v22, %v6778_v34  ;;  %v3214_v50 = vsel %vm303_vm11, %v3206_v49, 0.0 }
 0x290   : > { %v3058_v53 = vrot.slane %v2815_v17, %v6778_v34 }
 0x291   : > { %v3145_v28 = vsel %vm1177_vm10, %v3014_v61, %v3144_v14 }
 0x292   : > { %v3179_v23 = vadd.f32 %v3145_v28, %v1187_v7  ;;  %v2818_v40 = vpop.permute.xlu0 %2817  ;;  %v3154_v51 = vsel %vm1167_vm3, %v3058_v53, %v3153_v18  ;;  %v3208_v7 = vld [vmem:[#allocation3 + $0x10] sm:$0xff] }
 0x293   : > { %v2800_v41 = vpop.permute.xlu1 %2799  ;;  %v3062_v16 = vrot.slane %v2818_v40, %v6778_v34  ;;  %v3217_v38 = vsel %vm303_vm11, %v3208_v7, 0.0 }
 0x294   : > { %3188 = vst.msk [vmem:[#allocation3 + $0x20] sm:$0xff] %vm303_vm11, %v3179_v23  ;;  %v3038_v21 = vrot.slane %v2800_v41, %v6778_v34  ;;  %v3215_v23 = vsel %vm303_vm11, %v3207_v2, 0.0  ;;  %v1190_v41 = vld [vmem:[#allocation3 + $0x38] sm:$0xff] }
 0x295   : > { %v3155_v35 = vsel %vm1169_vm5, %v3062_v16, %v3154_v51 }
 0x296   : > { %v2836_v33 = vpop.permute.xlu0 %2835  ;;  %v3150_v12 = vsel %vm1173_vm7, %v3038_v21, %v3149_v48 }
 0x297   : > { %v2833_v11 = vpop.permute.xlu1 %2832  ;;  %v3086_v57 = vrot.slane %v2836_v33, %v6778_v34  ;;  %v3209_v33 = vld [vmem:[#allocation3 + $0x18] sm:$0xff] }
 0x298   : > { %v3082_v59 = vrot.slane %v2833_v11, %v6778_v34 }
 0x29a   : > { %v3160_v24 = vsel %vm1165_vm2, %v3086_v57, %v3082_v59 }
 0x29b   : > { %v2821_v37 = vpop.permute.xlu0 %2820  ;;  %v2803_v63 = vpop.permute.xlu1 %2802 }
 0x29c   : > { %v3042_v8 = vrot.slane %v2803_v63, %v6778_v34  ;;  %v3066_v45 = vrot.slane %v2821_v37, %v6778_v34  ;;  %v3210_v37 = vld [vmem:[#allocation3 + $0x20] sm:$0xff]  ;;  %v3216_v63 = vadd.f32 %v3215_v23, %v3214_v50 }
 0x29d   : > { %v3221_v1 = vsel %vm303_vm11, %v3210_v37, 0.0 }
 0x29e   : > { %v3151_v56 = vsel %vm1175_vm9, %v3042_v8, %v3150_v12  ;;  %v3156_v42 = vsel %vm1171_vm6, %v3066_v45, %v3155_v35  ;;  %v3218_v8 = vadd.f32 %v3217_v38, %v3216_v63 }
 0x29f   : > { %v2806_v36 = vpop.permute.xlu0 %2805 }
 0x2a0   : > { %v2839_v15 = vpop.permute.xlu1 %2838  ;;  %v3046_v44 = vrot.slane %v2806_v36, %v6778_v34 }
 0x2a1   : > { %v3090_v43 = vrot.slane %v2839_v15, %v6778_v34 }
 0x2a2   : > { %v3152_v3 = vsel %vm1177_vm10, %v3046_v44, %v3151_v56 }
 0x2a3   : > { %v3180_v52 = vadd.f32 %v3152_v3, %v1188_v0  ;;  %v3161_v26 = vsel %vm1167_vm3, %v3090_v43, %v3160_v24 }
 0x2a4   : > { %v2842_v6 = vpop.permute.xlu0 %2841  ;;  %v2824_v31 = vpop.permute.xlu1 %2823 }
 0x2a5   : > { %3189 = vst.msk [vmem:[#allocation3 + $0x28] sm:$0xff] %vm303_vm11, %v3180_v52  ;;  %v3070_v60 = vrot.slane %v2824_v31, %v6778_v34  ;;  %v3094_v9 = vrot.slane %v2842_v6, %v6778_v34 }
 0x2a7   : > { %v3157_v20 = vsel %vm1173_vm7, %v3070_v60, %v3156_v42  ;;  %v3162_v46 = vsel %vm1169_vm5, %v3094_v9, %v3161_v26 }
 0x2a8   : > { %v2845_v25 = vpop.permute.xlu0 %2844  ;;  %v2827_v32 = vpop.permute.xlu1 %2826 }
 0x2a9   : > { %v3074_v55 = vrot.slane %v2827_v32, %v6778_v34  ;;  %v3098_v27 = vrot.slane %v2845_v25, %v6778_v34 }
 0x2ab   : > { %v3158_v10 = vsel %vm1175_vm9, %v3074_v55, %v3157_v20  ;;  %v3163_v61 = vsel %vm1171_vm6, %v3098_v27, %v3162_v46 }
 0x2ac   : > { %v2848_v29 = vpop.permute.xlu0 %2847  ;;  %v2830_v19 = vpop.permute.xlu1 %2829  ;;  %v3211_v30 = vld [vmem:[#allocation3 + $0x28] sm:$0xff] }
 0x2ad   : > { %v3078_v58 = vrot.slane %v2830_v19, %v6778_v34  ;;  %v3102_v13 = vrot.slane %v2848_v29, %v6778_v34  ;;  %v3223_v15 = vsel %vm303_vm11, %v3211_v30, 0.0 }
 0x2af   : > { %v3159_v62 = vsel %vm1177_vm10, %v3078_v58, %v3158_v10  ;;  %v3164_v40 = vsel %vm1173_vm7, %v3102_v13, %v3163_v61 }
 0x2b0   : > { %v3181_v5 = vadd.f32 %v3159_v62, %v1189_v47  ;;  %v2851_v17 = vpop.permute.xlu1 %2850 }
 0x2b1   : > { %v2854_v22 = vpop.permute.xlu0 %2853  ;;  %v3106_v28 = vrot.slane %v2851_v17, %v6778_v34 }
 0x2b2   : > { %v3110_v14 = vrot.slane %v2854_v22, %v6778_v34  ;;  %3190 = vst.msk [vmem:[#allocation3 + $0x30] sm:$0xff] %vm303_vm11, %v3181_v5  ;;  %v3219_v34 = vsel %vm303_vm11, %v3209_v33, 0.0 }
 0x2b3   : > { %v3165_v11 = vsel %vm1175_vm9, %v3106_v28, %v3164_v40  ;;  %v3220_v48 = vadd.f32 %v3219_v34, %v3218_v8 }
 0x2b4   : > { %v3166_v39 = vsel %vm1177_vm10, %v3110_v14, %v3165_v11 }
 0x2b5   : > { %v3182_v21 = vadd.f32 %v3166_v39, %v1190_v41  ;;  %v3222_v12 = vadd.f32 %v3221_v1, %v3220_v48 }
 0x2b7   : > { %3191 = vst.msk [vmem:[#allocation3 + $0x38] sm:$0xff] %vm303_vm11, %v3182_v21  ;;  %v3224_v44 = vadd.f32 %v3223_v15, %v3222_v12 }
 0x2b9   : > { %v3212_v36 = vld [vmem:[#allocation3 + $0x30] sm:$0xff] }
 0x2ba   : > { %v3225_v0 = vsel %vm303_vm11, %v3212_v36, 0.0 }
 0x2bb   : > { %v3226_v3 = vadd.f32 %v3225_v0, %v3224_v44 }
 0x2be   : > { %v3213_v56 = vld [vmem:[#allocation3 + $0x38] sm:$0xff] }
 0x2bf   : > { %v3227_v52 = vsel %vm303_vm11, %v3213_v56, 0.0 }
 0x2c0   : > { %v3228_v6 = vadd.f32 %v3227_v52, %v3226_v3 }
 0x2c2   : > { %3229 = vadd.xlane.f32.xlu0 %v3228_v6 }
 0x2e2   : > { %v3198_v31 = vpop.xlane.xlu1 %3197 }
 0x2e3   : > { %v3199_v54 = vrot.slane %v3198_v31, 4 }
 0x2e5   : > { %v3200_v4 = vadd.f32 %v3199_v54, %v3198_v31 }
 0x2e7   : > { %v3201_v53 = vrot.slane %v3200_v4, 2 }
 0x2e9   : > { %v3202_v16 = vadd.f32 %v3201_v53, %v3200_v4 }
 0x2eb   : > { %v3203_v45 = vrot.slane %v3202_v16, 1 }
 0x2ed   : > { %v3204_v25 = vadd.f32 %v3203_v45, %v3202_v16 }
 0x2ef   : > { %3374 = vpush %v3204_v25 }
 0x320   : > { %s3375_s9 = spop %3374 }
 0x34b   : > { %v3230_v32 = vpop.xlane.xlu0 %3229 }
 0x34c   : > { %v3231_v18 = vrot.slane %v3230_v32, 4 }
 0x34e   : > { %v3232_v60 = vadd.f32 %v3231_v18, %v3230_v32 }
 0x350   : > { %v3233_v51 = vrot.slane %v3232_v60, 2 }
 0x352   : > { %v3234_v57 = vadd.f32 %v3233_v51, %v3232_v60 }
 0x354   : > { %v3235_v59 = vrot.slane %v3234_v57, 1 }
 0x356   : > { %v3236_v55 = vadd.f32 %v3235_v59, %v3234_v57 }
 0x358   : > { %3376 = vpush %v3236_v55 }
 0x389   : > { %s3377_s10 = spop %3376 }
 0x38a   : > { %s3238_s14 = sadd.f32 %s3377_s10, %s3375_s9 }
 0x38c   : > { %v3239_v35 = vstv %s3238_s14 }
 0x38d   : > { %3240 = vst [vmem:[%s296_s13] sm:$0xff] %v3239_v35 }
 0x38e PF: > { %s14_s17 = sadd.s32 1, %s3718_s17   ;;  %s6823_s15 = smov %s3714_s16 }
 0x38f   : > { %p11_p6 = scmp.ge.s32.totalorder %s14_s17, 4   ;;  %s6824_s16 = smov %s6826_s18 }
 0x391   :  { %13 = sbr.rel (!%p11_p6) target bundleno = 2 (0x2), region = 83 }

</bundles_post_ra>
